<compile_context>
chip_gen: v7x
topology: tpu7x:2x2x1
jax: 0.10.0
libtpu: 0.0.40
codegen_flags: <defaults>
</compile_context>

<pallas_src>
import math

import jax
import jax.numpy as jnp
from jax import lax
from jax.experimental import pallas as pl
from jax.experimental.pallas import tpu as pltpu


TC = 16  # timesteps per sequential grid step (bf16-tile friendly, amortizes step overhead)


def _round_up(v, m):
    return ((v + m - 1) // m) * m


def gru_fused_kernel(x_ref, wih_ref, whh_ref, bproj_ref, bhn_ref, out_ref,
                     h_ref, gi_ref):
    """Fused GRU chunk: input projection for tc timesteps + sequential recurrence.

    x_ref     : (tc, Bp, Ep)   bf16   time-major input chunk
    wih_ref   : (Ep, 3*Hp)     bf16   input->hidden weights (gate-major padded [r|z|n])
    whh_ref   : (Hp, 3*Hp)     bf16   hidden->hidden weights (gate-major padded)
    bproj_ref : (1, 3*Hp)      f32    b_ih with b_hh's r/z parts folded in
    bhn_ref   : (1, Hp)        f32    b_hn (only bias left inside the recurrence)
    out_ref   : (tc, Bp, Hp)          time-major output hidden states for this chunk
    h_ref     : (Bp, Hp) f32   VMEM scratch: recurrent state carried across chunks
    gi_ref    : (tc, Bp, 3*Hp) f32 VMEM scratch: this chunk's input projection
    """
    t = pl.program_id(0)

    @pl.when(t == 0)
    def _():
        h_ref[...] = jnp.zeros_like(h_ref)

    tc, Bp, Ep = x_ref.shape
    Hp = h_ref.shape[-1]
    G = 3 * Hp

    # Whole-chunk input projection: one MXU-shaped matmul (M = tc*Bp), bias folded in.
    x2 = x_ref[...].reshape(tc * Bp, Ep)
    gi = jnp.dot(x2, wih_ref[...], preferred_element_type=jnp.float32) + bproj_ref[...]
    gi_ref[...] = gi.reshape(tc, Bp, G)

    whh = whh_ref[...]                                        # resident, read once per chunk
    bhn_b = jnp.broadcast_to(bhn_ref[...], (Bp, Hp))          # hoisted out of the step loop

    def step(i, h):
        gi_i = gi_ref[i]                                      # (Bp, 3Hp) full-tile load
        gh = jnp.dot(h.astype(jnp.bfloat16), whh,
                     preferred_element_type=jnp.float32)      # (Bp, 3Hp)
        # Gate slices land on 128-lane boundaries (Hp is a multiple of 128) -> free.
        r = jax.nn.sigmoid(gi_i[:, :Hp] + gh[:, :Hp])
        z = jax.nn.sigmoid(gi_i[:, Hp:2 * Hp] + gh[:, Hp:2 * Hp])
        n = jnp.tanh(gi_i[:, 2 * Hp:] + r * (gh[:, 2 * Hp:] + bhn_b))
        h = (1.0 - z) * n + z * h
        out_ref[i] = h.astype(out_ref.dtype)                  # (Bp, Hp) full-tile store
        return h

    h = lax.fori_loop(0, tc, step, h_ref[...], unroll=True)
    h_ref[...] = h


def gru_forward(x, wih_p, whh_p, b_proj, b_hn, hidden_size, tc=TC):
    """Single-layer batch_first GRU with zero initial hidden state.

    x      : (B, T, E) f32
    wih_p  : (Ep, 3*Hp) bf16   pre-transposed / gate-block padded
    whh_p  : (Hp, 3*Hp) bf16
    b_proj : (1, 3*Hp)  f32
    b_hn   : (1, Hp)    f32
    returns (B, T, hidden_size)
    """
    B, T, E = x.shape
    Ep = wih_p.shape[0]
    Hp = whh_p.shape[0]
    G = 3 * Hp

    Bp = _round_up(max(B, 16), 16)          # bf16 tile-friendly batch padding
    Tp = _round_up(max(T, tc), tc)
    n_chunks = Tp // tc

    # Time-major, zero-padded input (padded rows/cols/timesteps are provably inert;
    # padded batch rows evolve under bias only and are sliced off at the end).
    xp = jnp.zeros((Tp, Bp, Ep), jnp.bfloat16)
    xp = xp.at[:T, :B, :E].set(jnp.transpose(x, (1, 0, 2)).astype(jnp.bfloat16))

    out_p = pl.pallas_call(
        gru_fused_kernel,
        out_shape=jax.ShapeDtypeStruct((Tp, Bp, Hp), x.dtype),
        grid_spec=pltpu.PrefetchScalarGridSpec(
            num_scalar_prefetch=0,
            grid=(n_chunks,),
            in_specs=[
                pl.BlockSpec((tc, Bp, Ep), lambda t: (t, 0, 0)),   # x chunk (time-major)
                pl.BlockSpec((Ep, G), lambda t: (0, 0)),           # W_ih (resident)
                pl.BlockSpec((Hp, G), lambda t: (0, 0)),           # W_hh (resident)
                pl.BlockSpec((1, G), lambda t: (0, 0)),            # folded projection bias
                pl.BlockSpec((1, Hp), lambda t: (0, 0)),           # b_hn
            ],
            out_specs=pl.BlockSpec((tc, Bp, Hp), lambda t: (t, 0, 0)),
            scratch_shapes=[
                pltpu.VMEM((Bp, Hp), jnp.float32),       # recurrent state h
                pltpu.VMEM((tc, Bp, G), jnp.float32),    # per-chunk input projection
            ],
        ),
        compiler_params=pltpu.CompilerParams(
            dimension_semantics=("arbitrary",),          # recurrence: sequential grid
            vmem_limit_bytes=32 * 1024 * 1024,           # TODO(synk): re-derive per chip gen
        ),
    )(xp, wih_p, whh_p, b_proj, b_hn)

    # (Tp, Bp, Hp) -> (B, T, H)
    return jnp.transpose(out_p[:T, :B, :hidden_size], (1, 0, 2))


class Module2Pallas:
    """JAX/Pallas equivalent of Module_2: GRU(batch_first) + Dropout (identity in eval)."""
    # TODO(synk): training-mode dropout (random mask) not implemented; eval-mode identity used.

    def __init__(self, embedding_dim, hidden_size, dropout, key):
        self.embedding_dim = embedding_dim
        self.hidden_size = hidden_size
        self.dropout = dropout

        H, E = hidden_size, embedding_dim
        k = 1.0 / math.sqrt(H)
        k1, k2, k3, k4 = jax.random.split(key, 4)
        # PyTorch nn.GRU init: uniform(-1/sqrt(H), 1/sqrt(H)); gate order [r, z, n].
        w_ih = jax.random.uniform(k1, (3 * H, E), jnp.float32, -k, k)
        w_hh = jax.random.uniform(k2, (3 * H, H), jnp.float32, -k, k)
        b_ih = jax.random.uniform(k3, (3 * H,), jnp.float32, -k, k)
        b_hh = jax.random.uniform(k4, (3 * H,), jnp.float32, -k, k)

        Hp = _round_up(H, 128)
        Ep = _round_up(E, 128)

        # One-time weight prep: gate-block padding + transpose + bf16 cast.
        # Columns laid out [r(0:Hp) | z(Hp:2Hp) | n(2Hp:3Hp)], zeros in all padding, so
        # padded hidden columns stay exactly 0 through the recurrence (no contamination).
        wih3 = jnp.pad(w_ih.reshape(3, H, E), ((0, 0), (0, Hp - H), (0, Ep - E)))
        self.wih_p = jnp.transpose(wih3, (2, 0, 1)).reshape(Ep, 3 * Hp).astype(jnp.bfloat16)

        whh3 = jnp.pad(w_hh.reshape(3, H, H), ((0, 0), (0, Hp - H), (0, Hp - H)))
        self.whh_p = jnp.transpose(whh3, (2, 0, 1)).reshape(Hp, 3 * Hp).astype(jnp.bfloat16)

        # Fold b_hh's r/z parts into the projection bias; b_hn stays separate because
        # PyTorch computes n = tanh(W_in x + b_in + r * (W_hn h + b_hn)).
        b3_ih = b_ih.reshape(3, H)
        b3_hh = b_hh.reshape(3, H)
        b_proj = b3_ih.at[0].add(b3_hh[0]).at[1].add(b3_hh[1])
        self.b_proj = jnp.pad(b_proj, ((0, 0), (0, Hp - H))).reshape(1, 3 * Hp)
        self.b_hn = jnp.pad(b3_hh[2], (0, Hp - H)).reshape(1, Hp)

    def __call__(self, x):
        gru_out = gru_forward(x, self.wih_p, self.whh_p, self.b_proj, self.b_hn,
                              self.hidden_size)
        # dropout_layer: identity at inference.
        return gru_out


if __name__ == "__main__":
    B, T, E, H = 2, 8, 32, 32
    key = jax.random.PRNGKey(0)
    kx, kp = jax.random.split(key)
    x = jax.random.normal(kx, (B, T, E), dtype=jnp.float32)

    mod = Module2Pallas(embedding_dim=E, hidden_size=H, dropout=0.1, key=kp)
    out = mod(x)
    out = jax.block_until_ready(out)
    assert out.shape == (B, T, H)
    print("KERNEL_OK")
</pallas_src>

<mosaic_0001>
module attributes {stable_mosaic.version = 11 : i64} {
  func.func @gru_fused_kernel(%arg0: i32, %arg1: memref<16x16x128xbf16, #tpu.memory_space<vmem>>, %arg2: memref<128x384xbf16, #tpu.memory_space<vmem>>, %arg3: memref<128x384xbf16, #tpu.memory_space<vmem>>, %arg4: memref<1x384xf32, #tpu.memory_space<vmem>>, %arg5: memref<1x128xf32, #tpu.memory_space<vmem>>, %arg6: memref<16x16x128xf32, #tpu.memory_space<vmem>>, %arg7: memref<16x128xf32, #tpu.memory_space<vmem>>, %arg8: memref<16x16x384xf32, #tpu.memory_space<vmem>>) attributes {dimension_semantics = [#tpu.dimension_semantics<arbitrary>], iteration_bounds = array<i64: 1>, scalar_prefetch = 0 : i64, scratch_operands = 2 : i64, tpu.core_type = #tpu.core_type<tc>, window_params = [{transform_indices = @transform_0, window_bounds = array<i64: 16, 16, 128>}, {pipeline_mode = #tpu.pipeline_mode<synchronous>, transform_indices = @transform_1, window_bounds = array<i64: 128, 384>}, {pipeline_mode = #tpu.pipeline_mode<synchronous>, transform_indices = @transform_2, window_bounds = array<i64: 128, 384>}, {pipeline_mode = #tpu.pipeline_mode<synchronous>, transform_indices = @transform_3, window_bounds = array<i64: 1, 384>}, {pipeline_mode = #tpu.pipeline_mode<synchronous>, transform_indices = @transform_4, window_bounds = array<i64: 1, 128>}, {transform_indices = @transform_5, window_bounds = array<i64: 16, 16, 128>}]} {
    %c0_i32 = arith.constant 0 : i32
    %0 = arith.cmpi eq, %arg0, %c0_i32 : i32
    %1 = arith.extui %0 : i1 to i32
    %c0_i32_0 = arith.constant 0 : i32
    %2 = arith.cmpi ne, %1, %c0_i32_0 : i32
    scf.if %2 {
      %cst_147 = arith.constant 0.000000e+00 : f32
      %594 = vector.broadcast %cst_147 : f32 to vector<16x128xf32>
      %c0_148 = arith.constant 0 : index
      %c0_149 = arith.constant 0 : index
      %595 = vector.load %arg7[%c0_148, %c0_149] : memref<16x128xf32, #tpu.memory_space<vmem>>, vector<16x128xf32>
      tpu.vector_store %arg7[%c0_148, %c0_149], %594 {strides = array<i32>} : memref<16x128xf32, #tpu.memory_space<vmem>>, vector<16x128xf32>,
    } else {
    }
    %c0 = arith.constant 0 : index
    %c0_1 = arith.constant 0 : index
    %c0_2 = arith.constant 0 : index
    %3 = vector.load %arg1[%c0, %c0_1, %c0_2] : memref<16x16x128xbf16, #tpu.memory_space<vmem>>, vector<16x16x128xbf16>
    %4 = vector.shape_cast %3 : vector<16x16x128xbf16> to vector<256x128xbf16>
    %c0_3 = arith.constant 0 : index
    %c0_4 = arith.constant 0 : index
    %5 = vector.load %arg2[%c0_3, %c0_4] : memref<128x384xbf16, #tpu.memory_space<vmem>>, vector<128x384xbf16>
    %cst = arith.constant dense<0.000000e+00> : vector<256x384xf32>
    %6 = tpu.matmul %4, %5, %cst {dimension_numbers = #tpu.dot_dimension_numbers<[1], [0], [0], [1], [0, 0, 1, 1], [], []>} : vector<256x128xbf16>, vector<128x384xbf16>, vector<256x384xf32> -> vector<256x384xf32>
    %c0_5 = arith.constant 0 : index
    %c0_6 = arith.constant 0 : index
    %7 = vector.load %arg4[%c0_5, %c0_6] : memref<1x384xf32, #tpu.memory_space<vmem>>, vector<1x384xf32>
    %8 = vector.broadcast %7 : vector<1x384xf32> to vector<256x384xf32>
    %9 = arith.addf %6, %8 : vector<256x384xf32>
    %10 = vector.shape_cast %9 : vector<256x384xf32> to vector<16x16x384xf32>
    %c0_7 = arith.constant 0 : index
    %c0_8 = arith.constant 0 : index
    %c0_9 = arith.constant 0 : index
    %11 = vector.load %arg8[%c0_7, %c0_8, %c0_9] : memref<16x16x384xf32, #tpu.memory_space<vmem>>, vector<16x16x384xf32>
    tpu.vector_store %arg8[%c0_7, %c0_8, %c0_9], %10 {strides = array<i32>} : memref<16x16x384xf32, #tpu.memory_space<vmem>>, vector<16x16x384xf32>,
    %c0_10 = arith.constant 0 : index
    %c0_11 = arith.constant 0 : index
    %12 = vector.load %arg3[%c0_10, %c0_11] : memref<128x384xbf16, #tpu.memory_space<vmem>>, vector<128x384xbf16>
    %c0_12 = arith.constant 0 : index
    %c0_13 = arith.constant 0 : index
    %13 = vector.load %arg5[%c0_12, %c0_13] : memref<1x128xf32, #tpu.memory_space<vmem>>, vector<1x128xf32>
    %14 = vector.shape_cast %13 : vector<1x128xf32> to vector<1x128xf32>
    %15 = vector.broadcast %14 : vector<1x128xf32> to vector<16x128xf32>
    %c0_14 = arith.constant 0 : index
    %c0_15 = arith.constant 0 : index
    %16 = vector.load %arg7[%c0_14, %c0_15] : memref<16x128xf32, #tpu.memory_space<vmem>>, vector<16x128xf32>
    %c0_i32_16 = arith.constant 0 : i32
    %17 = arith.index_cast %c0_i32_16 : i32 to index
    %c0_17 = arith.constant 0 : index
    %c0_18 = arith.constant 0 : index
    %18 = vector.load %arg8[%17, %c0_17, %c0_18] : memref<16x16x384xf32, #tpu.memory_space<vmem>>, vector<1x16x384xf32>
    %19 = vector.shape_cast %18 : vector<1x16x384xf32> to vector<16x384xf32>
    %20 = arith.truncf %16 : vector<16x128xf32> to vector<16x128xbf16>
    %cst_19 = arith.constant dense<0.000000e+00> : vector<16x384xf32>
    %21 = tpu.matmul %20, %12, %cst_19 {dimension_numbers = #tpu.dot_dimension_numbers<[1], [0], [0], [1], [0, 0, 1, 1], [], []>} : vector<16x128xbf16>, vector<128x384xbf16>, vector<16x384xf32> -> vector<16x384xf32>
    %22 = vector.extract_strided_slice %19 {offsets = [0, 0], sizes = [16, 128], strides = [1, 1]} : vector<16x384xf32> to vector<16x128xf32>
    %23 = vector.extract_strided_slice %21 {offsets = [0, 0], sizes = [16, 128], strides = [1, 1]} : vector<16x384xf32> to vector<16x128xf32>
    %24 = arith.addf %22, %23 : vector<16x128xf32>
    %25 = arith.negf %24 : vector<16x128xf32>
    %26 = math.exp %25 : vector<16x128xf32>
    %cst_20 = arith.constant 1.000000e+00 : f32
    %27 = vector.broadcast %cst_20 : f32 to vector<16x128xf32>
    %28 = arith.addf %27, %26 : vector<16x128xf32>
    %29 = arith.divf %27, %28 : vector<16x128xf32>
    %30 = vector.extract_strided_slice %19 {offsets = [0, 128], sizes = [16, 128], strides = [1, 1]} : vector<16x384xf32> to vector<16x128xf32>
    %31 = vector.extract_strided_slice %21 {offsets = [0, 128], sizes = [16, 128], strides = [1, 1]} : vector<16x384xf32> to vector<16x128xf32>
    %32 = arith.addf %30, %31 : vector<16x128xf32>
    %33 = arith.negf %32 : vector<16x128xf32>
    %34 = math.exp %33 : vector<16x128xf32>
    %cst_21 = arith.constant 1.000000e+00 : f32
    %35 = vector.broadcast %cst_21 : f32 to vector<16x128xf32>
    %36 = arith.addf %35, %34 : vector<16x128xf32>
    %37 = arith.divf %35, %36 : vector<16x128xf32>
    %38 = vector.extract_strided_slice %19 {offsets = [0, 256], sizes = [16, 128], strides = [1, 1]} : vector<16x384xf32> to vector<16x128xf32>
    %39 = vector.extract_strided_slice %21 {offsets = [0, 256], sizes = [16, 128], strides = [1, 1]} : vector<16x384xf32> to vector<16x128xf32>
    %40 = arith.addf %39, %15 : vector<16x128xf32>
    %41 = arith.mulf %29, %40 : vector<16x128xf32>
    %42 = arith.addf %38, %41 : vector<16x128xf32>
    %43 = math.tanh %42 : vector<16x128xf32>
    %cst_22 = arith.constant 1.000000e+00 : f32
    %44 = vector.broadcast %cst_22 : f32 to vector<16x128xf32>
    %45 = arith.subf %44, %37 : vector<16x128xf32>
    %46 = arith.mulf %45, %43 : vector<16x128xf32>
    %47 = arith.mulf %37, %16 : vector<16x128xf32>
    %48 = arith.addf %46, %47 : vector<16x128xf32>
    %49 = arith.index_cast %c0_i32_16 : i32 to index
    %c0_23 = arith.constant 0 : index
    %c0_24 = arith.constant 0 : index
    %50 = vector.load %arg6[%49, %c0_23, %c0_24] : memref<16x16x128xf32, #tpu.memory_space<vmem>>, vector<1x16x128xf32>
    %51 = vector.shape_cast %50 : vector<1x16x128xf32> to vector<16x128xf32>
    %52 = vector.shape_cast %48 : vector<16x128xf32> to vector<1x16x128xf32>
    tpu.vector_store %arg6[%49, %c0_23, %c0_24], %52 {strides = array<i32>} : memref<16x16x128xf32, #tpu.memory_space<vmem>>, vector<1x16x128xf32>,
    %c1_i32 = arith.constant 1 : i32
    %53 = arith.index_cast %c1_i32 : i32 to index
    %c0_25 = arith.constant 0 : index
    %c0_26 = arith.constant 0 : index
    %54 = vector.load %arg8[%53, %c0_25, %c0_26] : memref<16x16x384xf32, #tpu.memory_space<vmem>>, vector<1x16x384xf32>
    %55 = vector.shape_cast %54 : vector<1x16x384xf32> to vector<16x384xf32>
    %56 = arith.truncf %48 : vector<16x128xf32> to vector<16x128xbf16>
    %cst_27 = arith.constant dense<0.000000e+00> : vector<16x384xf32>
    %57 = tpu.matmul %56, %12, %cst_27 {dimension_numbers = #tpu.dot_dimension_numbers<[1], [0], [0], [1], [0, 0, 1, 1], [], []>} : vector<16x128xbf16>, vector<128x384xbf16>, vector<16x384xf32> -> vector<16x384xf32>
    %58 = vector.extract_strided_slice %55 {offsets = [0, 0], sizes = [16, 128], strides = [1, 1]} : vector<16x384xf32> to vector<16x128xf32>
    %59 = vector.extract_strided_slice %57 {offsets = [0, 0], sizes = [16, 128], strides = [1, 1]} : vector<16x384xf32> to vector<16x128xf32>
    %60 = arith.addf %58, %59 : vector<16x128xf32>
    %61 = arith.negf %60 : vector<16x128xf32>
    %62 = math.exp %61 : vector<16x128xf32>
    %cst_28 = arith.constant 1.000000e+00 : f32
    %63 = vector.broadcast %cst_28 : f32 to vector<16x128xf32>
    %64 = arith.addf %63, %62 : vector<16x128xf32>
    %65 = arith.divf %63, %64 : vector<16x128xf32>
    %66 = vector.extract_strided_slice %55 {offsets = [0, 128], sizes = [16, 128], strides = [1, 1]} : vector<16x384xf32> to vector<16x128xf32>
    %67 = vector.extract_strided_slice %57 {offsets = [0, 128], sizes = [16, 128], strides = [1, 1]} : vector<16x384xf32> to vector<16x128xf32>
    %68 = arith.addf %66, %67 : vector<16x128xf32>
    %69 = arith.negf %68 : vector<16x128xf32>
    %70 = math.exp %69 : vector<16x128xf32>
    %cst_29 = arith.constant 1.000000e+00 : f32
    %71 = vector.broadcast %cst_29 : f32 to vector<16x128xf32>
    %72 = arith.addf %71, %70 : vector<16x128xf32>
    %73 = arith.divf %71, %72 : vector<16x128xf32>
    %74 = vector.extract_strided_slice %55 {offsets = [0, 256], sizes = [16, 128], strides = [1, 1]} : vector<16x384xf32> to vector<16x128xf32>
    %75 = vector.extract_strided_slice %57 {offsets = [0, 256], sizes = [16, 128], strides = [1, 1]} : vector<16x384xf32> to vector<16x128xf32>
    %76 = arith.addf %75, %15 : vector<16x128xf32>
    %77 = arith.mulf %65, %76 : vector<16x128xf32>
    %78 = arith.addf %74, %77 : vector<16x128xf32>
    %79 = math.tanh %78 : vector<16x128xf32>
    %cst_30 = arith.constant 1.000000e+00 : f32
    %80 = vector.broadcast %cst_30 : f32 to vector<16x128xf32>
    %81 = arith.subf %80, %73 : vector<16x128xf32>
    %82 = arith.mulf %81, %79 : vector<16x128xf32>
    %83 = arith.mulf %73, %48 : vector<16x128xf32>
    %84 = arith.addf %82, %83 : vector<16x128xf32>
    %85 = arith.index_cast %c1_i32 : i32 to index
    %c0_31 = arith.constant 0 : index
    %c0_32 = arith.constant 0 : index
    %86 = vector.load %arg6[%85, %c0_31, %c0_32] : memref<16x16x128xf32, #tpu.memory_space<vmem>>, vector<1x16x128xf32>
    %87 = vector.shape_cast %86 : vector<1x16x128xf32> to vector<16x128xf32>
    %88 = vector.shape_cast %84 : vector<16x128xf32> to vector<1x16x128xf32>
    tpu.vector_store %arg6[%85, %c0_31, %c0_32], %88 {strides = array<i32>} : memref<16x16x128xf32, #tpu.memory_space<vmem>>, vector<1x16x128xf32>,
    %c2_i32 = arith.constant 2 : i32
    %89 = arith.index_cast %c2_i32 : i32 to index
    %c0_33 = arith.constant 0 : index
    %c0_34 = arith.constant 0 : index
    %90 = vector.load %arg8[%89, %c0_33, %c0_34] : memref<16x16x384xf32, #tpu.memory_space<vmem>>, vector<1x16x384xf32>
    %91 = vector.shape_cast %90 : vector<1x16x384xf32> to vector<16x384xf32>
    %92 = arith.truncf %84 : vector<16x128xf32> to vector<16x128xbf16>
    %cst_35 = arith.constant dense<0.000000e+00> : vector<16x384xf32>
    %93 = tpu.matmul %92, %12, %cst_35 {dimension_numbers = #tpu.dot_dimension_numbers<[1], [0], [0], [1], [0, 0, 1, 1], [], []>} : vector<16x128xbf16>, vector<128x384xbf16>, vector<16x384xf32> -> vector<16x384xf32>
    %94 = vector.extract_strided_slice %91 {offsets = [0, 0], sizes = [16, 128], strides = [1, 1]} : vector<16x384xf32> to vector<16x128xf32>
    %95 = vector.extract_strided_slice %93 {offsets = [0, 0], sizes = [16, 128], strides = [1, 1]} : vector<16x384xf32> to vector<16x128xf32>
    %96 = arith.addf %94, %95 : vector<16x128xf32>
    %97 = arith.negf %96 : vector<16x128xf32>
    %98 = math.exp %97 : vector<16x128xf32>
    %cst_36 = arith.constant 1.000000e+00 : f32
    %99 = vector.broadcast %cst_36 : f32 to vector<16x128xf32>
    %100 = arith.addf %99, %98 : vector<16x128xf32>
    %101 = arith.divf %99, %100 : vector<16x128xf32>
    %102 = vector.extract_strided_slice %91 {offsets = [0, 128], sizes = [16, 128], strides = [1, 1]} : vector<16x384xf32> to vector<16x128xf32>
    %103 = vector.extract_strided_slice %93 {offsets = [0, 128], sizes = [16, 128], strides = [1, 1]} : vector<16x384xf32> to vector<16x128xf32>
    %104 = arith.addf %102, %103 : vector<16x128xf32>
    %105 = arith.negf %104 : vector<16x128xf32>
    %106 = math.exp %105 : vector<16x128xf32>
    %cst_37 = arith.constant 1.000000e+00 : f32
    %107 = vector.broadcast %cst_37 : f32 to vector<16x128xf32>
    %108 = arith.addf %107, %106 : vector<16x128xf32>
    %109 = arith.divf %107, %108 : vector<16x128xf32>
    %110 = vector.extract_strided_slice %91 {offsets = [0, 256], sizes = [16, 128], strides = [1, 1]} : vector<16x384xf32> to vector<16x128xf32>
    %111 = vector.extract_strided_slice %93 {offsets = [0, 256], sizes = [16, 128], strides = [1, 1]} : vector<16x384xf32> to vector<16x128xf32>
    %112 = arith.addf %111, %15 : vector<16x128xf32>
    %113 = arith.mulf %101, %112 : vector<16x128xf32>
    %114 = arith.addf %110, %113 : vector<16x128xf32>
    %115 = math.tanh %114 : vector<16x128xf32>
    %cst_38 = arith.constant 1.000000e+00 : f32
    %116 = vector.broadcast %cst_38 : f32 to vector<16x128xf32>
    %117 = arith.subf %116, %109 : vector<16x128xf32>
    %118 = arith.mulf %117, %115 : vector<16x128xf32>
    %119 = arith.mulf %109, %84 : vector<16x128xf32>
    %120 = arith.addf %118, %119 : vector<16x128xf32>
    %121 = arith.index_cast %c2_i32 : i32 to index
    %c0_39 = arith.constant 0 : index
    %c0_40 = arith.constant 0 : index
    %122 = vector.load %arg6[%121, %c0_39, %c0_40] : memref<16x16x128xf32, #tpu.memory_space<vmem>>, vector<1x16x128xf32>
    %123 = vector.shape_cast %122 : vector<1x16x128xf32> to vector<16x128xf32>
    %124 = vector.shape_cast %120 : vector<16x128xf32> to vector<1x16x128xf32>
    tpu.vector_store %arg6[%121, %c0_39, %c0_40], %124 {strides = array<i32>} : memref<16x16x128xf32, #tpu.memory_space<vmem>>, vector<1x16x128xf32>,
    %c3_i32 = arith.constant 3 : i32
    %125 = arith.index_cast %c3_i32 : i32 to index
    %c0_41 = arith.constant 0 : index
    %c0_42 = arith.constant 0 : index
    %126 = vector.load %arg8[%125, %c0_41, %c0_42] : memref<16x16x384xf32, #tpu.memory_space<vmem>>, vector<1x16x384xf32>
    %127 = vector.shape_cast %126 : vector<1x16x384xf32> to vector<16x384xf32>
    %128 = arith.truncf %120 : vector<16x128xf32> to vector<16x128xbf16>
    %cst_43 = arith.constant dense<0.000000e+00> : vector<16x384xf32>
    %129 = tpu.matmul %128, %12, %cst_43 {dimension_numbers = #tpu.dot_dimension_numbers<[1], [0], [0], [1], [0, 0, 1, 1], [], []>} : vector<16x128xbf16>, vector<128x384xbf16>, vector<16x384xf32> -> vector<16x384xf32>
    %130 = vector.extract_strided_slice %127 {offsets = [0, 0], sizes = [16, 128], strides = [1, 1]} : vector<16x384xf32> to vector<16x128xf32>
    %131 = vector.extract_strided_slice %129 {offsets = [0, 0], sizes = [16, 128], strides = [1, 1]} : vector<16x384xf32> to vector<16x128xf32>
    %132 = arith.addf %130, %131 : vector<16x128xf32>
    %133 = arith.negf %132 : vector<16x128xf32>
    %134 = math.exp %133 : vector<16x128xf32>
    %cst_44 = arith.constant 1.000000e+00 : f32
    %135 = vector.broadcast %cst_44 : f32 to vector<16x128xf32>
    %136 = arith.addf %135, %134 : vector<16x128xf32>
    %137 = arith.divf %135, %136 : vector<16x128xf32>
    %138 = vector.extract_strided_slice %127 {offsets = [0, 128], sizes = [16, 128], strides = [1, 1]} : vector<16x384xf32> to vector<16x128xf32>
    %139 = vector.extract_strided_slice %129 {offsets = [0, 128], sizes = [16, 128], strides = [1, 1]} : vector<16x384xf32> to vector<16x128xf32>
    %140 = arith.addf %138, %139 : vector<16x128xf32>
    %141 = arith.negf %140 : vector<16x128xf32>
    %142 = math.exp %141 : vector<16x128xf32>
    %cst_45 = arith.constant 1.000000e+00 : f32
    %143 = vector.broadcast %cst_45 : f32 to vector<16x128xf32>
    %144 = arith.addf %143, %142 : vector<16x128xf32>
    %145 = arith.divf %143, %144 : vector<16x128xf32>
    %146 = vector.extract_strided_slice %127 {offsets = [0, 256], sizes = [16, 128], strides = [1, 1]} : vector<16x384xf32> to vector<16x128xf32>
    %147 = vector.extract_strided_slice %129 {offsets = [0, 256], sizes = [16, 128], strides = [1, 1]} : vector<16x384xf32> to vector<16x128xf32>
    %148 = arith.addf %147, %15 : vector<16x128xf32>
    %149 = arith.mulf %137, %148 : vector<16x128xf32>
    %150 = arith.addf %146, %149 : vector<16x128xf32>
    %151 = math.tanh %150 : vector<16x128xf32>
    %cst_46 = arith.constant 1.000000e+00 : f32
    %152 = vector.broadcast %cst_46 : f32 to vector<16x128xf32>
    %153 = arith.subf %152, %145 : vector<16x128xf32>
    %154 = arith.mulf %153, %151 : vector<16x128xf32>
    %155 = arith.mulf %145, %120 : vector<16x128xf32>
    %156 = arith.addf %154, %155 : vector<16x128xf32>
    %157 = arith.index_cast %c3_i32 : i32 to index
    %c0_47 = arith.constant 0 : index
    %c0_48 = arith.constant 0 : index
    %158 = vector.load %arg6[%157, %c0_47, %c0_48] : memref<16x16x128xf32, #tpu.memory_space<vmem>>, vector<1x16x128xf32>
    %159 = vector.shape_cast %158 : vector<1x16x128xf32> to vector<16x128xf32>
    %160 = vector.shape_cast %156 : vector<16x128xf32> to vector<1x16x128xf32>
    tpu.vector_store %arg6[%157, %c0_47, %c0_48], %160 {strides = array<i32>} : memref<16x16x128xf32, #tpu.memory_space<vmem>>, vector<1x16x128xf32>,
    %c4_i32 = arith.constant 4 : i32
    %161 = arith.index_cast %c4_i32 : i32 to index
    %c0_49 = arith.constant 0 : index
    %c0_50 = arith.constant 0 : index
    %162 = vector.load %arg8[%161, %c0_49, %c0_50] : memref<16x16x384xf32, #tpu.memory_space<vmem>>, vector<1x16x384xf32>
    %163 = vector.shape_cast %162 : vector<1x16x384xf32> to vector<16x384xf32>
    %164 = arith.truncf %156 : vector<16x128xf32> to vector<16x128xbf16>
    %cst_51 = arith.constant dense<0.000000e+00> : vector<16x384xf32>
    %165 = tpu.matmul %164, %12, %cst_51 {dimension_numbers = #tpu.dot_dimension_numbers<[1], [0], [0], [1], [0, 0, 1, 1], [], []>} : vector<16x128xbf16>, vector<128x384xbf16>, vector<16x384xf32> -> vector<16x384xf32>
    %166 = vector.extract_strided_slice %163 {offsets = [0, 0], sizes = [16, 128], strides = [1, 1]} : vector<16x384xf32> to vector<16x128xf32>
    %167 = vector.extract_strided_slice %165 {offsets = [0, 0], sizes = [16, 128], strides = [1, 1]} : vector<16x384xf32> to vector<16x128xf32>
    %168 = arith.addf %166, %167 : vector<16x128xf32>
    %169 = arith.negf %168 : vector<16x128xf32>
    %170 = math.exp %169 : vector<16x128xf32>
    %cst_52 = arith.constant 1.000000e+00 : f32
    %171 = vector.broadcast %cst_52 : f32 to vector<16x128xf32>
    %172 = arith.addf %171, %170 : vector<16x128xf32>
    %173 = arith.divf %171, %172 : vector<16x128xf32>
    %174 = vector.extract_strided_slice %163 {offsets = [0, 128], sizes = [16, 128], strides = [1, 1]} : vector<16x384xf32> to vector<16x128xf32>
    %175 = vector.extract_strided_slice %165 {offsets = [0, 128], sizes = [16, 128], strides = [1, 1]} : vector<16x384xf32> to vector<16x128xf32>
    %176 = arith.addf %174, %175 : vector<16x128xf32>
    %177 = arith.negf %176 : vector<16x128xf32>
    %178 = math.exp %177 : vector<16x128xf32>
    %cst_53 = arith.constant 1.000000e+00 : f32
    %179 = vector.broadcast %cst_53 : f32 to vector<16x128xf32>
    %180 = arith.addf %179, %178 : vector<16x128xf32>
    %181 = arith.divf %179, %180 : vector<16x128xf32>
    %182 = vector.extract_strided_slice %163 {offsets = [0, 256], sizes = [16, 128], strides = [1, 1]} : vector<16x384xf32> to vector<16x128xf32>
    %183 = vector.extract_strided_slice %165 {offsets = [0, 256], sizes = [16, 128], strides = [1, 1]} : vector<16x384xf32> to vector<16x128xf32>
    %184 = arith.addf %183, %15 : vector<16x128xf32>
    %185 = arith.mulf %173, %184 : vector<16x128xf32>
    %186 = arith.addf %182, %185 : vector<16x128xf32>
    %187 = math.tanh %186 : vector<16x128xf32>
    %cst_54 = arith.constant 1.000000e+00 : f32
    %188 = vector.broadcast %cst_54 : f32 to vector<16x128xf32>
    %189 = arith.subf %188, %181 : vector<16x128xf32>
    %190 = arith.mulf %189, %187 : vector<16x128xf32>
    %191 = arith.mulf %181, %156 : vector<16x128xf32>
    %192 = arith.addf %190, %191 : vector<16x128xf32>
    %193 = arith.index_cast %c4_i32 : i32 to index
    %c0_55 = arith.constant 0 : index
    %c0_56 = arith.constant 0 : index
    %194 = vector.load %arg6[%193, %c0_55, %c0_56] : memref<16x16x128xf32, #tpu.memory_space<vmem>>, vector<1x16x128xf32>
    %195 = vector.shape_cast %194 : vector<1x16x128xf32> to vector<16x128xf32>
    %196 = vector.shape_cast %192 : vector<16x128xf32> to vector<1x16x128xf32>
    tpu.vector_store %arg6[%193, %c0_55, %c0_56], %196 {strides = array<i32>} : memref<16x16x128xf32, #tpu.memory_space<vmem>>, vector<1x16x128xf32>,
    %c5_i32 = arith.constant 5 : i32
    %197 = arith.index_cast %c5_i32 : i32 to index
    %c0_57 = arith.constant 0 : index
    %c0_58 = arith.constant 0 : index
    %198 = vector.load %arg8[%197, %c0_57, %c0_58] : memref<16x16x384xf32, #tpu.memory_space<vmem>>, vector<1x16x384xf32>
    %199 = vector.shape_cast %198 : vector<1x16x384xf32> to vector<16x384xf32>
    %200 = arith.truncf %192 : vector<16x128xf32> to vector<16x128xbf16>
    %cst_59 = arith.constant dense<0.000000e+00> : vector<16x384xf32>
    %201 = tpu.matmul %200, %12, %cst_59 {dimension_numbers = #tpu.dot_dimension_numbers<[1], [0], [0], [1], [0, 0, 1, 1], [], []>} : vector<16x128xbf16>, vector<128x384xbf16>, vector<16x384xf32> -> vector<16x384xf32>
    %202 = vector.extract_strided_slice %199 {offsets = [0, 0], sizes = [16, 128], strides = [1, 1]} : vector<16x384xf32> to vector<16x128xf32>
    %203 = vector.extract_strided_slice %201 {offsets = [0, 0], sizes = [16, 128], strides = [1, 1]} : vector<16x384xf32> to vector<16x128xf32>
    %204 = arith.addf %202, %203 : vector<16x128xf32>
    %205 = arith.negf %204 : vector<16x128xf32>
    %206 = math.exp %205 : vector<16x128xf32>
    %cst_60 = arith.constant 1.000000e+00 : f32
    %207 = vector.broadcast %cst_60 : f32 to vector<16x128xf32>
    %208 = arith.addf %207, %206 : vector<16x128xf32>
    %209 = arith.divf %207, %208 : vector<16x128xf32>
    %210 = vector.extract_strided_slice %199 {offsets = [0, 128], sizes = [16, 128], strides = [1, 1]} : vector<16x384xf32> to vector<16x128xf32>
    %211 = vector.extract_strided_slice %201 {offsets = [0, 128], sizes = [16, 128], strides = [1, 1]} : vector<16x384xf32> to vector<16x128xf32>
    %212 = arith.addf %210, %211 : vector<16x128xf32>
    %213 = arith.negf %212 : vector<16x128xf32>
    %214 = math.exp %213 : vector<16x128xf32>
    %cst_61 = arith.constant 1.000000e+00 : f32
    %215 = vector.broadcast %cst_61 : f32 to vector<16x128xf32>
    %216 = arith.addf %215, %214 : vector<16x128xf32>
    %217 = arith.divf %215, %216 : vector<16x128xf32>
    %218 = vector.extract_strided_slice %199 {offsets = [0, 256], sizes = [16, 128], strides = [1, 1]} : vector<16x384xf32> to vector<16x128xf32>
    %219 = vector.extract_strided_slice %201 {offsets = [0, 256], sizes = [16, 128], strides = [1, 1]} : vector<16x384xf32> to vector<16x128xf32>
    %220 = arith.addf %219, %15 : vector<16x128xf32>
    %221 = arith.mulf %209, %220 : vector<16x128xf32>
    %222 = arith.addf %218, %221 : vector<16x128xf32>
    %223 = math.tanh %222 : vector<16x128xf32>
    %cst_62 = arith.constant 1.000000e+00 : f32
    %224 = vector.broadcast %cst_62 : f32 to vector<16x128xf32>
    %225 = arith.subf %224, %217 : vector<16x128xf32>
    %226 = arith.mulf %225, %223 : vector<16x128xf32>
    %227 = arith.mulf %217, %192 : vector<16x128xf32>
    %228 = arith.addf %226, %227 : vector<16x128xf32>
    %229 = arith.index_cast %c5_i32 : i32 to index
    %c0_63 = arith.constant 0 : index
    %c0_64 = arith.constant 0 : index
    %230 = vector.load %arg6[%229, %c0_63, %c0_64] : memref<16x16x128xf32, #tpu.memory_space<vmem>>, vector<1x16x128xf32>
    %231 = vector.shape_cast %230 : vector<1x16x128xf32> to vector<16x128xf32>
    %232 = vector.shape_cast %228 : vector<16x128xf32> to vector<1x16x128xf32>
    tpu.vector_store %arg6[%229, %c0_63, %c0_64], %232 {strides = array<i32>} : memref<16x16x128xf32, #tpu.memory_space<vmem>>, vector<1x16x128xf32>,
    %c6_i32 = arith.constant 6 : i32
    %233 = arith.index_cast %c6_i32 : i32 to index
    %c0_65 = arith.constant 0 : index
    %c0_66 = arith.constant 0 : index
    %234 = vector.load %arg8[%233, %c0_65, %c0_66] : memref<16x16x384xf32, #tpu.memory_space<vmem>>, vector<1x16x384xf32>
    %235 = vector.shape_cast %234 : vector<1x16x384xf32> to vector<16x384xf32>
    %236 = arith.truncf %228 : vector<16x128xf32> to vector<16x128xbf16>
    %cst_67 = arith.constant dense<0.000000e+00> : vector<16x384xf32>
    %237 = tpu.matmul %236, %12, %cst_67 {dimension_numbers = #tpu.dot_dimension_numbers<[1], [0], [0], [1], [0, 0, 1, 1], [], []>} : vector<16x128xbf16>, vector<128x384xbf16>, vector<16x384xf32> -> vector<16x384xf32>
    %238 = vector.extract_strided_slice %235 {offsets = [0, 0], sizes = [16, 128], strides = [1, 1]} : vector<16x384xf32> to vector<16x128xf32>
    %239 = vector.extract_strided_slice %237 {offsets = [0, 0], sizes = [16, 128], strides = [1, 1]} : vector<16x384xf32> to vector<16x128xf32>
    %240 = arith.addf %238, %239 : vector<16x128xf32>
    %241 = arith.negf %240 : vector<16x128xf32>
    %242 = math.exp %241 : vector<16x128xf32>
    %cst_68 = arith.constant 1.000000e+00 : f32
    %243 = vector.broadcast %cst_68 : f32 to vector<16x128xf32>
    %244 = arith.addf %243, %242 : vector<16x128xf32>
    %245 = arith.divf %243, %244 : vector<16x128xf32>
    %246 = vector.extract_strided_slice %235 {offsets = [0, 128], sizes = [16, 128], strides = [1, 1]} : vector<16x384xf32> to vector<16x128xf32>
    %247 = vector.extract_strided_slice %237 {offsets = [0, 128], sizes = [16, 128], strides = [1, 1]} : vector<16x384xf32> to vector<16x128xf32>
    %248 = arith.addf %246, %247 : vector<16x128xf32>
    %249 = arith.negf %248 : vector<16x128xf32>
    %250 = math.exp %249 : vector<16x128xf32>
    %cst_69 = arith.constant 1.000000e+00 : f32
    %251 = vector.broadcast %cst_69 : f32 to vector<16x128xf32>
    %252 = arith.addf %251, %250 : vector<16x128xf32>
    %253 = arith.divf %251, %252 : vector<16x128xf32>
    %254 = vector.extract_strided_slice %235 {offsets = [0, 256], sizes = [16, 128], strides = [1, 1]} : vector<16x384xf32> to vector<16x128xf32>
    %255 = vector.extract_strided_slice %237 {offsets = [0, 256], sizes = [16, 128], strides = [1, 1]} : vector<16x384xf32> to vector<16x128xf32>
    %256 = arith.addf %255, %15 : vector<16x128xf32>
    %257 = arith.mulf %245, %256 : vector<16x128xf32>
    %258 = arith.addf %254, %257 : vector<16x128xf32>
    %259 = math.tanh %258 : vector<16x128xf32>
    %cst_70 = arith.constant 1.000000e+00 : f32
    %260 = vector.broadcast %cst_70 : f32 to vector<16x128xf32>
    %261 = arith.subf %260, %253 : vector<16x128xf32>
    %262 = arith.mulf %261, %259 : vector<16x128xf32>
    %263 = arith.mulf %253, %228 : vector<16x128xf32>
    %264 = arith.addf %262, %263 : vector<16x128xf32>
    %265 = arith.index_cast %c6_i32 : i32 to index
    %c0_71 = arith.constant 0 : index
    %c0_72 = arith.constant 0 : index
    %266 = vector.load %arg6[%265, %c0_71, %c0_72] : memref<16x16x128xf32, #tpu.memory_space<vmem>>, vector<1x16x128xf32>
    %267 = vector.shape_cast %266 : vector<1x16x128xf32> to vector<16x128xf32>
    %268 = vector.shape_cast %264 : vector<16x128xf32> to vector<1x16x128xf32>
    tpu.vector_store %arg6[%265, %c0_71, %c0_72], %268 {strides = array<i32>} : memref<16x16x128xf32, #tpu.memory_space<vmem>>, vector<1x16x128xf32>,
    %c7_i32 = arith.constant 7 : i32
    %269 = arith.index_cast %c7_i32 : i32 to index
    %c0_73 = arith.constant 0 : index
    %c0_74 = arith.constant 0 : index
    %270 = vector.load %arg8[%269, %c0_73, %c0_74] : memref<16x16x384xf32, #tpu.memory_space<vmem>>, vector<1x16x384xf32>
    %271 = vector.shape_cast %270 : vector<1x16x384xf32> to vector<16x384xf32>
    %272 = arith.truncf %264 : vector<16x128xf32> to vector<16x128xbf16>
    %cst_75 = arith.constant dense<0.000000e+00> : vector<16x384xf32>
    %273 = tpu.matmul %272, %12, %cst_75 {dimension_numbers = #tpu.dot_dimension_numbers<[1], [0], [0], [1], [0, 0, 1, 1], [], []>} : vector<16x128xbf16>, vector<128x384xbf16>, vector<16x384xf32> -> vector<16x384xf32>
    %274 = vector.extract_strided_slice %271 {offsets = [0, 0], sizes = [16, 128], strides = [1, 1]} : vector<16x384xf32> to vector<16x128xf32>
    %275 = vector.extract_strided_slice %273 {offsets = [0, 0], sizes = [16, 128], strides = [1, 1]} : vector<16x384xf32> to vector<16x128xf32>
    %276 = arith.addf %274, %275 : vector<16x128xf32>
    %277 = arith.negf %276 : vector<16x128xf32>
    %278 = math.exp %277 : vector<16x128xf32>
    %cst_76 = arith.constant 1.000000e+00 : f32
    %279 = vector.broadcast %cst_76 : f32 to vector<16x128xf32>
    %280 = arith.addf %279, %278 : vector<16x128xf32>
    %281 = arith.divf %279, %280 : vector<16x128xf32>
    %282 = vector.extract_strided_slice %271 {offsets = [0, 128], sizes = [16, 128], strides = [1, 1]} : vector<16x384xf32> to vector<16x128xf32>
    %283 = vector.extract_strided_slice %273 {offsets = [0, 128], sizes = [16, 128], strides = [1, 1]} : vector<16x384xf32> to vector<16x128xf32>
    %284 = arith.addf %282, %283 : vector<16x128xf32>
    %285 = arith.negf %284 : vector<16x128xf32>
    %286 = math.exp %285 : vector<16x128xf32>
    %cst_77 = arith.constant 1.000000e+00 : f32
    %287 = vector.broadcast %cst_77 : f32 to vector<16x128xf32>
    %288 = arith.addf %287, %286 : vector<16x128xf32>
    %289 = arith.divf %287, %288 : vector<16x128xf32>
    %290 = vector.extract_strided_slice %271 {offsets = [0, 256], sizes = [16, 128], strides = [1, 1]} : vector<16x384xf32> to vector<16x128xf32>
    %291 = vector.extract_strided_slice %273 {offsets = [0, 256], sizes = [16, 128], strides = [1, 1]} : vector<16x384xf32> to vector<16x128xf32>
    %292 = arith.addf %291, %15 : vector<16x128xf32>
    %293 = arith.mulf %281, %292 : vector<16x128xf32>
    %294 = arith.addf %290, %293 : vector<16x128xf32>
    %295 = math.tanh %294 : vector<16x128xf32>
    %cst_78 = arith.constant 1.000000e+00 : f32
    %296 = vector.broadcast %cst_78 : f32 to vector<16x128xf32>
    %297 = arith.subf %296, %289 : vector<16x128xf32>
    %298 = arith.mulf %297, %295 : vector<16x128xf32>
    %299 = arith.mulf %289, %264 : vector<16x128xf32>
    %300 = arith.addf %298, %299 : vector<16x128xf32>
    %301 = arith.index_cast %c7_i32 : i32 to index
    %c0_79 = arith.constant 0 : index
    %c0_80 = arith.constant 0 : index
    %302 = vector.load %arg6[%301, %c0_79, %c0_80] : memref<16x16x128xf32, #tpu.memory_space<vmem>>, vector<1x16x128xf32>
    %303 = vector.shape_cast %302 : vector<1x16x128xf32> to vector<16x128xf32>
    %304 = vector.shape_cast %300 : vector<16x128xf32> to vector<1x16x128xf32>
    tpu.vector_store %arg6[%301, %c0_79, %c0_80], %304 {strides = array<i32>} : memref<16x16x128xf32, #tpu.memory_space<vmem>>, vector<1x16x128xf32>,
    %c8_i32 = arith.constant 8 : i32
    %305 = arith.index_cast %c8_i32 : i32 to index
    %c0_81 = arith.constant 0 : index
    %c0_82 = arith.constant 0 : index
    %306 = vector.load %arg8[%305, %c0_81, %c0_82] : memref<16x16x384xf32, #tpu.memory_space<vmem>>, vector<1x16x384xf32>
    %307 = vector.shape_cast %306 : vector<1x16x384xf32> to vector<16x384xf32>
    %308 = arith.truncf %300 : vector<16x128xf32> to vector<16x128xbf16>
    %cst_83 = arith.constant dense<0.000000e+00> : vector<16x384xf32>
    %309 = tpu.matmul %308, %12, %cst_83 {dimension_numbers = #tpu.dot_dimension_numbers<[1], [0], [0], [1], [0, 0, 1, 1], [], []>} : vector<16x128xbf16>, vector<128x384xbf16>, vector<16x384xf32> -> vector<16x384xf32>
    %310 = vector.extract_strided_slice %307 {offsets = [0, 0], sizes = [16, 128], strides = [1, 1]} : vector<16x384xf32> to vector<16x128xf32>
    %311 = vector.extract_strided_slice %309 {offsets = [0, 0], sizes = [16, 128], strides = [1, 1]} : vector<16x384xf32> to vector<16x128xf32>
    %312 = arith.addf %310, %311 : vector<16x128xf32>
    %313 = arith.negf %312 : vector<16x128xf32>
    %314 = math.exp %313 : vector<16x128xf32>
    %cst_84 = arith.constant 1.000000e+00 : f32
    %315 = vector.broadcast %cst_84 : f32 to vector<16x128xf32>
    %316 = arith.addf %315, %314 : vector<16x128xf32>
    %317 = arith.divf %315, %316 : vector<16x128xf32>
    %318 = vector.extract_strided_slice %307 {offsets = [0, 128], sizes = [16, 128], strides = [1, 1]} : vector<16x384xf32> to vector<16x128xf32>
    %319 = vector.extract_strided_slice %309 {offsets = [0, 128], sizes = [16, 128], strides = [1, 1]} : vector<16x384xf32> to vector<16x128xf32>
    %320 = arith.addf %318, %319 : vector<16x128xf32>
    %321 = arith.negf %320 : vector<16x128xf32>
    %322 = math.exp %321 : vector<16x128xf32>
    %cst_85 = arith.constant 1.000000e+00 : f32
    %323 = vector.broadcast %cst_85 : f32 to vector<16x128xf32>
    %324 = arith.addf %323, %322 : vector<16x128xf32>
    %325 = arith.divf %323, %324 : vector<16x128xf32>
    %326 = vector.extract_strided_slice %307 {offsets = [0, 256], sizes = [16, 128], strides = [1, 1]} : vector<16x384xf32> to vector<16x128xf32>
    %327 = vector.extract_strided_slice %309 {offsets = [0, 256], sizes = [16, 128], strides = [1, 1]} : vector<16x384xf32> to vector<16x128xf32>
    %328 = arith.addf %327, %15 : vector<16x128xf32>
    %329 = arith.mulf %317, %328 : vector<16x128xf32>
    %330 = arith.addf %326, %329 : vector<16x128xf32>
    %331 = math.tanh %330 : vector<16x128xf32>
    %cst_86 = arith.constant 1.000000e+00 : f32
    %332 = vector.broadcast %cst_86 : f32 to vector<16x128xf32>
    %333 = arith.subf %332, %325 : vector<16x128xf32>
    %334 = arith.mulf %333, %331 : vector<16x128xf32>
    %335 = arith.mulf %325, %300 : vector<16x128xf32>
    %336 = arith.addf %334, %335 : vector<16x128xf32>
    %337 = arith.index_cast %c8_i32 : i32 to index
    %c0_87 = arith.constant 0 : index
    %c0_88 = arith.constant 0 : index
    %338 = vector.load %arg6[%337, %c0_87, %c0_88] : memref<16x16x128xf32, #tpu.memory_space<vmem>>, vector<1x16x128xf32>
    %339 = vector.shape_cast %338 : vector<1x16x128xf32> to vector<16x128xf32>
    %340 = vector.shape_cast %336 : vector<16x128xf32> to vector<1x16x128xf32>
    tpu.vector_store %arg6[%337, %c0_87, %c0_88], %340 {strides = array<i32>} : memref<16x16x128xf32, #tpu.memory_space<vmem>>, vector<1x16x128xf32>,
    %c9_i32 = arith.constant 9 : i32
    %341 = arith.index_cast %c9_i32 : i32 to index
    %c0_89 = arith.constant 0 : index
    %c0_90 = arith.constant 0 : index
    %342 = vector.load %arg8[%341, %c0_89, %c0_90] : memref<16x16x384xf32, #tpu.memory_space<vmem>>, vector<1x16x384xf32>
    %343 = vector.shape_cast %342 : vector<1x16x384xf32> to vector<16x384xf32>
    %344 = arith.truncf %336 : vector<16x128xf32> to vector<16x128xbf16>
    %cst_91 = arith.constant dense<0.000000e+00> : vector<16x384xf32>
    %345 = tpu.matmul %344, %12, %cst_91 {dimension_numbers = #tpu.dot_dimension_numbers<[1], [0], [0], [1], [0, 0, 1, 1], [], []>} : vector<16x128xbf16>, vector<128x384xbf16>, vector<16x384xf32> -> vector<16x384xf32>
    %346 = vector.extract_strided_slice %343 {offsets = [0, 0], sizes = [16, 128], strides = [1, 1]} : vector<16x384xf32> to vector<16x128xf32>
    %347 = vector.extract_strided_slice %345 {offsets = [0, 0], sizes = [16, 128], strides = [1, 1]} : vector<16x384xf32> to vector<16x128xf32>
    %348 = arith.addf %346, %347 : vector<16x128xf32>
    %349 = arith.negf %348 : vector<16x128xf32>
    %350 = math.exp %349 : vector<16x128xf32>
    %cst_92 = arith.constant 1.000000e+00 : f32
    %351 = vector.broadcast %cst_92 : f32 to vector<16x128xf32>
    %352 = arith.addf %351, %350 : vector<16x128xf32>
    %353 = arith.divf %351, %352 : vector<16x128xf32>
    %354 = vector.extract_strided_slice %343 {offsets = [0, 128], sizes = [16, 128], strides = [1, 1]} : vector<16x384xf32> to vector<16x128xf32>
    %355 = vector.extract_strided_slice %345 {offsets = [0, 128], sizes = [16, 128], strides = [1, 1]} : vector<16x384xf32> to vector<16x128xf32>
    %356 = arith.addf %354, %355 : vector<16x128xf32>
    %357 = arith.negf %356 : vector<16x128xf32>
    %358 = math.exp %357 : vector<16x128xf32>
    %cst_93 = arith.constant 1.000000e+00 : f32
    %359 = vector.broadcast %cst_93 : f32 to vector<16x128xf32>
    %360 = arith.addf %359, %358 : vector<16x128xf32>
    %361 = arith.divf %359, %360 : vector<16x128xf32>
    %362 = vector.extract_strided_slice %343 {offsets = [0, 256], sizes = [16, 128], strides = [1, 1]} : vector<16x384xf32> to vector<16x128xf32>
    %363 = vector.extract_strided_slice %345 {offsets = [0, 256], sizes = [16, 128], strides = [1, 1]} : vector<16x384xf32> to vector<16x128xf32>
    %364 = arith.addf %363, %15 : vector<16x128xf32>
    %365 = arith.mulf %353, %364 : vector<16x128xf32>
    %366 = arith.addf %362, %365 : vector<16x128xf32>
    %367 = math.tanh %366 : vector<16x128xf32>
    %cst_94 = arith.constant 1.000000e+00 : f32
    %368 = vector.broadcast %cst_94 : f32 to vector<16x128xf32>
    %369 = arith.subf %368, %361 : vector<16x128xf32>
    %370 = arith.mulf %369, %367 : vector<16x128xf32>
    %371 = arith.mulf %361, %336 : vector<16x128xf32>
    %372 = arith.addf %370, %371 : vector<16x128xf32>
    %373 = arith.index_cast %c9_i32 : i32 to index
    %c0_95 = arith.constant 0 : index
    %c0_96 = arith.constant 0 : index
    %374 = vector.load %arg6[%373, %c0_95, %c0_96] : memref<16x16x128xf32, #tpu.memory_space<vmem>>, vector<1x16x128xf32>
    %375 = vector.shape_cast %374 : vector<1x16x128xf32> to vector<16x128xf32>
    %376 = vector.shape_cast %372 : vector<16x128xf32> to vector<1x16x128xf32>
    tpu.vector_store %arg6[%373, %c0_95, %c0_96], %376 {strides = array<i32>} : memref<16x16x128xf32, #tpu.memory_space<vmem>>, vector<1x16x128xf32>,
    %c10_i32 = arith.constant 10 : i32
    %377 = arith.index_cast %c10_i32 : i32 to index
    %c0_97 = arith.constant 0 : index
    %c0_98 = arith.constant 0 : index
    %378 = vector.load %arg8[%377, %c0_97, %c0_98] : memref<16x16x384xf32, #tpu.memory_space<vmem>>, vector<1x16x384xf32>
    %379 = vector.shape_cast %378 : vector<1x16x384xf32> to vector<16x384xf32>
    %380 = arith.truncf %372 : vector<16x128xf32> to vector<16x128xbf16>
    %cst_99 = arith.constant dense<0.000000e+00> : vector<16x384xf32>
    %381 = tpu.matmul %380, %12, %cst_99 {dimension_numbers = #tpu.dot_dimension_numbers<[1], [0], [0], [1], [0, 0, 1, 1], [], []>} : vector<16x128xbf16>, vector<128x384xbf16>, vector<16x384xf32> -> vector<16x384xf32>
    %382 = vector.extract_strided_slice %379 {offsets = [0, 0], sizes = [16, 128], strides = [1, 1]} : vector<16x384xf32> to vector<16x128xf32>
    %383 = vector.extract_strided_slice %381 {offsets = [0, 0], sizes = [16, 128], strides = [1, 1]} : vector<16x384xf32> to vector<16x128xf32>
    %384 = arith.addf %382, %383 : vector<16x128xf32>
    %385 = arith.negf %384 : vector<16x128xf32>
    %386 = math.exp %385 : vector<16x128xf32>
    %cst_100 = arith.constant 1.000000e+00 : f32
    %387 = vector.broadcast %cst_100 : f32 to vector<16x128xf32>
    %388 = arith.addf %387, %386 : vector<16x128xf32>
    %389 = arith.divf %387, %388 : vector<16x128xf32>
    %390 = vector.extract_strided_slice %379 {offsets = [0, 128], sizes = [16, 128], strides = [1, 1]} : vector<16x384xf32> to vector<16x128xf32>
    %391 = vector.extract_strided_slice %381 {offsets = [0, 128], sizes = [16, 128], strides = [1, 1]} : vector<16x384xf32> to vector<16x128xf32>
    %392 = arith.addf %390, %391 : vector<16x128xf32>
    %393 = arith.negf %392 : vector<16x128xf32>
    %394 = math.exp %393 : vector<16x128xf32>
    %cst_101 = arith.constant 1.000000e+00 : f32
    %395 = vector.broadcast %cst_101 : f32 to vector<16x128xf32>
    %396 = arith.addf %395, %394 : vector<16x128xf32>
    %397 = arith.divf %395, %396 : vector<16x128xf32>
    %398 = vector.extract_strided_slice %379 {offsets = [0, 256], sizes = [16, 128], strides = [1, 1]} : vector<16x384xf32> to vector<16x128xf32>
    %399 = vector.extract_strided_slice %381 {offsets = [0, 256], sizes = [16, 128], strides = [1, 1]} : vector<16x384xf32> to vector<16x128xf32>
    %400 = arith.addf %399, %15 : vector<16x128xf32>
    %401 = arith.mulf %389, %400 : vector<16x128xf32>
    %402 = arith.addf %398, %401 : vector<16x128xf32>
    %403 = math.tanh %402 : vector<16x128xf32>
    %cst_102 = arith.constant 1.000000e+00 : f32
    %404 = vector.broadcast %cst_102 : f32 to vector<16x128xf32>
    %405 = arith.subf %404, %397 : vector<16x128xf32>
    %406 = arith.mulf %405, %403 : vector<16x128xf32>
    %407 = arith.mulf %397, %372 : vector<16x128xf32>
    %408 = arith.addf %406, %407 : vector<16x128xf32>
    %409 = arith.index_cast %c10_i32 : i32 to index
    %c0_103 = arith.constant 0 : index
    %c0_104 = arith.constant 0 : index
    %410 = vector.load %arg6[%409, %c0_103, %c0_104] : memref<16x16x128xf32, #tpu.memory_space<vmem>>, vector<1x16x128xf32>
    %411 = vector.shape_cast %410 : vector<1x16x128xf32> to vector<16x128xf32>
    %412 = vector.shape_cast %408 : vector<16x128xf32> to vector<1x16x128xf32>
    tpu.vector_store %arg6[%409, %c0_103, %c0_104], %412 {strides = array<i32>} : memref<16x16x128xf32, #tpu.memory_space<vmem>>, vector<1x16x128xf32>,
    %c11_i32 = arith.constant 11 : i32
    %413 = arith.index_cast %c11_i32 : i32 to index
    %c0_105 = arith.constant 0 : index
    %c0_106 = arith.constant 0 : index
    %414 = vector.load %arg8[%413, %c0_105, %c0_106] : memref<16x16x384xf32, #tpu.memory_space<vmem>>, vector<1x16x384xf32>
    %415 = vector.shape_cast %414 : vector<1x16x384xf32> to vector<16x384xf32>
    %416 = arith.truncf %408 : vector<16x128xf32> to vector<16x128xbf16>
    %cst_107 = arith.constant dense<0.000000e+00> : vector<16x384xf32>
    %417 = tpu.matmul %416, %12, %cst_107 {dimension_numbers = #tpu.dot_dimension_numbers<[1], [0], [0], [1], [0, 0, 1, 1], [], []>} : vector<16x128xbf16>, vector<128x384xbf16>, vector<16x384xf32> -> vector<16x384xf32>
    %418 = vector.extract_strided_slice %415 {offsets = [0, 0], sizes = [16, 128], strides = [1, 1]} : vector<16x384xf32> to vector<16x128xf32>
    %419 = vector.extract_strided_slice %417 {offsets = [0, 0], sizes = [16, 128], strides = [1, 1]} : vector<16x384xf32> to vector<16x128xf32>
    %420 = arith.addf %418, %419 : vector<16x128xf32>
    %421 = arith.negf %420 : vector<16x128xf32>
    %422 = math.exp %421 : vector<16x128xf32>
    %cst_108 = arith.constant 1.000000e+00 : f32
    %423 = vector.broadcast %cst_108 : f32 to vector<16x128xf32>
    %424 = arith.addf %423, %422 : vector<16x128xf32>
    %425 = arith.divf %423, %424 : vector<16x128xf32>
    %426 = vector.extract_strided_slice %415 {offsets = [0, 128], sizes = [16, 128], strides = [1, 1]} : vector<16x384xf32> to vector<16x128xf32>
    %427 = vector.extract_strided_slice %417 {offsets = [0, 128], sizes = [16, 128], strides = [1, 1]} : vector<16x384xf32> to vector<16x128xf32>
    %428 = arith.addf %426, %427 : vector<16x128xf32>
    %429 = arith.negf %428 : vector<16x128xf32>
    %430 = math.exp %429 : vector<16x128xf32>
    %cst_109 = arith.constant 1.000000e+00 : f32
    %431 = vector.broadcast %cst_109 : f32 to vector<16x128xf32>
    %432 = arith.addf %431, %430 : vector<16x128xf32>
    %433 = arith.divf %431, %432 : vector<16x128xf32>
    %434 = vector.extract_strided_slice %415 {offsets = [0, 256], sizes = [16, 128], strides = [1, 1]} : vector<16x384xf32> to vector<16x128xf32>
    %435 = vector.extract_strided_slice %417 {offsets = [0, 256], sizes = [16, 128], strides = [1, 1]} : vector<16x384xf32> to vector<16x128xf32>
    %436 = arith.addf %435, %15 : vector<16x128xf32>
    %437 = arith.mulf %425, %436 : vector<16x128xf32>
    %438 = arith.addf %434, %437 : vector<16x128xf32>
    %439 = math.tanh %438 : vector<16x128xf32>
    %cst_110 = arith.constant 1.000000e+00 : f32
    %440 = vector.broadcast %cst_110 : f32 to vector<16x128xf32>
    %441 = arith.subf %440, %433 : vector<16x128xf32>
    %442 = arith.mulf %441, %439 : vector<16x128xf32>
    %443 = arith.mulf %433, %408 : vector<16x128xf32>
    %444 = arith.addf %442, %443 : vector<16x128xf32>
    %445 = arith.index_cast %c11_i32 : i32 to index
    %c0_111 = arith.constant 0 : index
    %c0_112 = arith.constant 0 : index
    %446 = vector.load %arg6[%445, %c0_111, %c0_112] : memref<16x16x128xf32, #tpu.memory_space<vmem>>, vector<1x16x128xf32>
    %447 = vector.shape_cast %446 : vector<1x16x128xf32> to vector<16x128xf32>
    %448 = vector.shape_cast %444 : vector<16x128xf32> to vector<1x16x128xf32>
    tpu.vector_store %arg6[%445, %c0_111, %c0_112], %448 {strides = array<i32>} : memref<16x16x128xf32, #tpu.memory_space<vmem>>, vector<1x16x128xf32>,
    %c12_i32 = arith.constant 12 : i32
    %449 = arith.index_cast %c12_i32 : i32 to index
    %c0_113 = arith.constant 0 : index
    %c0_114 = arith.constant 0 : index
    %450 = vector.load %arg8[%449, %c0_113, %c0_114] : memref<16x16x384xf32, #tpu.memory_space<vmem>>, vector<1x16x384xf32>
    %451 = vector.shape_cast %450 : vector<1x16x384xf32> to vector<16x384xf32>
    %452 = arith.truncf %444 : vector<16x128xf32> to vector<16x128xbf16>
    %cst_115 = arith.constant dense<0.000000e+00> : vector<16x384xf32>
    %453 = tpu.matmul %452, %12, %cst_115 {dimension_numbers = #tpu.dot_dimension_numbers<[1], [0], [0], [1], [0, 0, 1, 1], [], []>} : vector<16x128xbf16>, vector<128x384xbf16>, vector<16x384xf32> -> vector<16x384xf32>
    %454 = vector.extract_strided_slice %451 {offsets = [0, 0], sizes = [16, 128], strides = [1, 1]} : vector<16x384xf32> to vector<16x128xf32>
    %455 = vector.extract_strided_slice %453 {offsets = [0, 0], sizes = [16, 128], strides = [1, 1]} : vector<16x384xf32> to vector<16x128xf32>
    %456 = arith.addf %454, %455 : vector<16x128xf32>
    %457 = arith.negf %456 : vector<16x128xf32>
    %458 = math.exp %457 : vector<16x128xf32>
    %cst_116 = arith.constant 1.000000e+00 : f32
    %459 = vector.broadcast %cst_116 : f32 to vector<16x128xf32>
    %460 = arith.addf %459, %458 : vector<16x128xf32>
    %461 = arith.divf %459, %460 : vector<16x128xf32>
    %462 = vector.extract_strided_slice %451 {offsets = [0, 128], sizes = [16, 128], strides = [1, 1]} : vector<16x384xf32> to vector<16x128xf32>
    %463 = vector.extract_strided_slice %453 {offsets = [0, 128], sizes = [16, 128], strides = [1, 1]} : vector<16x384xf32> to vector<16x128xf32>
    %464 = arith.addf %462, %463 : vector<16x128xf32>
    %465 = arith.negf %464 : vector<16x128xf32>
    %466 = math.exp %465 : vector<16x128xf32>
    %cst_117 = arith.constant 1.000000e+00 : f32
    %467 = vector.broadcast %cst_117 : f32 to vector<16x128xf32>
    %468 = arith.addf %467, %466 : vector<16x128xf32>
    %469 = arith.divf %467, %468 : vector<16x128xf32>
    %470 = vector.extract_strided_slice %451 {offsets = [0, 256], sizes = [16, 128], strides = [1, 1]} : vector<16x384xf32> to vector<16x128xf32>
    %471 = vector.extract_strided_slice %453 {offsets = [0, 256], sizes = [16, 128], strides = [1, 1]} : vector<16x384xf32> to vector<16x128xf32>
    %472 = arith.addf %471, %15 : vector<16x128xf32>
    %473 = arith.mulf %461, %472 : vector<16x128xf32>
    %474 = arith.addf %470, %473 : vector<16x128xf32>
    %475 = math.tanh %474 : vector<16x128xf32>
    %cst_118 = arith.constant 1.000000e+00 : f32
    %476 = vector.broadcast %cst_118 : f32 to vector<16x128xf32>
    %477 = arith.subf %476, %469 : vector<16x128xf32>
    %478 = arith.mulf %477, %475 : vector<16x128xf32>
    %479 = arith.mulf %469, %444 : vector<16x128xf32>
    %480 = arith.addf %478, %479 : vector<16x128xf32>
    %481 = arith.index_cast %c12_i32 : i32 to index
    %c0_119 = arith.constant 0 : index
    %c0_120 = arith.constant 0 : index
    %482 = vector.load %arg6[%481, %c0_119, %c0_120] : memref<16x16x128xf32, #tpu.memory_space<vmem>>, vector<1x16x128xf32>
    %483 = vector.shape_cast %482 : vector<1x16x128xf32> to vector<16x128xf32>
    %484 = vector.shape_cast %480 : vector<16x128xf32> to vector<1x16x128xf32>
    tpu.vector_store %arg6[%481, %c0_119, %c0_120], %484 {strides = array<i32>} : memref<16x16x128xf32, #tpu.memory_space<vmem>>, vector<1x16x128xf32>,
    %c13_i32 = arith.constant 13 : i32
    %485 = arith.index_cast %c13_i32 : i32 to index
    %c0_121 = arith.constant 0 : index
    %c0_122 = arith.constant 0 : index
    %486 = vector.load %arg8[%485, %c0_121, %c0_122] : memref<16x16x384xf32, #tpu.memory_space<vmem>>, vector<1x16x384xf32>
    %487 = vector.shape_cast %486 : vector<1x16x384xf32> to vector<16x384xf32>
    %488 = arith.truncf %480 : vector<16x128xf32> to vector<16x128xbf16>
    %cst_123 = arith.constant dense<0.000000e+00> : vector<16x384xf32>
    %489 = tpu.matmul %488, %12, %cst_123 {dimension_numbers = #tpu.dot_dimension_numbers<[1], [0], [0], [1], [0, 0, 1, 1], [], []>} : vector<16x128xbf16>, vector<128x384xbf16>, vector<16x384xf32> -> vector<16x384xf32>
    %490 = vector.extract_strided_slice %487 {offsets = [0, 0], sizes = [16, 128], strides = [1, 1]} : vector<16x384xf32> to vector<16x128xf32>
    %491 = vector.extract_strided_slice %489 {offsets = [0, 0], sizes = [16, 128], strides = [1, 1]} : vector<16x384xf32> to vector<16x128xf32>
    %492 = arith.addf %490, %491 : vector<16x128xf32>
    %493 = arith.negf %492 : vector<16x128xf32>
    %494 = math.exp %493 : vector<16x128xf32>
    %cst_124 = arith.constant 1.000000e+00 : f32
    %495 = vector.broadcast %cst_124 : f32 to vector<16x128xf32>
    %496 = arith.addf %495, %494 : vector<16x128xf32>
    %497 = arith.divf %495, %496 : vector<16x128xf32>
    %498 = vector.extract_strided_slice %487 {offsets = [0, 128], sizes = [16, 128], strides = [1, 1]} : vector<16x384xf32> to vector<16x128xf32>
    %499 = vector.extract_strided_slice %489 {offsets = [0, 128], sizes = [16, 128], strides = [1, 1]} : vector<16x384xf32> to vector<16x128xf32>
    %500 = arith.addf %498, %499 : vector<16x128xf32>
    %501 = arith.negf %500 : vector<16x128xf32>
    %502 = math.exp %501 : vector<16x128xf32>
    %cst_125 = arith.constant 1.000000e+00 : f32
    %503 = vector.broadcast %cst_125 : f32 to vector<16x128xf32>
    %504 = arith.addf %503, %502 : vector<16x128xf32>
    %505 = arith.divf %503, %504 : vector<16x128xf32>
    %506 = vector.extract_strided_slice %487 {offsets = [0, 256], sizes = [16, 128], strides = [1, 1]} : vector<16x384xf32> to vector<16x128xf32>
    %507 = vector.extract_strided_slice %489 {offsets = [0, 256], sizes = [16, 128], strides = [1, 1]} : vector<16x384xf32> to vector<16x128xf32>
    %508 = arith.addf %507, %15 : vector<16x128xf32>
    %509 = arith.mulf %497, %508 : vector<16x128xf32>
    %510 = arith.addf %506, %509 : vector<16x128xf32>
    %511 = math.tanh %510 : vector<16x128xf32>
    %cst_126 = arith.constant 1.000000e+00 : f32
    %512 = vector.broadcast %cst_126 : f32 to vector<16x128xf32>
    %513 = arith.subf %512, %505 : vector<16x128xf32>
    %514 = arith.mulf %513, %511 : vector<16x128xf32>
    %515 = arith.mulf %505, %480 : vector<16x128xf32>
    %516 = arith.addf %514, %515 : vector<16x128xf32>
    %517 = arith.index_cast %c13_i32 : i32 to index
    %c0_127 = arith.constant 0 : index
    %c0_128 = arith.constant 0 : index
    %518 = vector.load %arg6[%517, %c0_127, %c0_128] : memref<16x16x128xf32, #tpu.memory_space<vmem>>, vector<1x16x128xf32>
    %519 = vector.shape_cast %518 : vector<1x16x128xf32> to vector<16x128xf32>
    %520 = vector.shape_cast %516 : vector<16x128xf32> to vector<1x16x128xf32>
    tpu.vector_store %arg6[%517, %c0_127, %c0_128], %520 {strides = array<i32>} : memref<16x16x128xf32, #tpu.memory_space<vmem>>, vector<1x16x128xf32>,
    %c14_i32 = arith.constant 14 : i32
    %521 = arith.index_cast %c14_i32 : i32 to index
    %c0_129 = arith.constant 0 : index
    %c0_130 = arith.constant 0 : index
    %522 = vector.load %arg8[%521, %c0_129, %c0_130] : memref<16x16x384xf32, #tpu.memory_space<vmem>>, vector<1x16x384xf32>
    %523 = vector.shape_cast %522 : vector<1x16x384xf32> to vector<16x384xf32>
    %524 = arith.truncf %516 : vector<16x128xf32> to vector<16x128xbf16>
    %cst_131 = arith.constant dense<0.000000e+00> : vector<16x384xf32>
    %525 = tpu.matmul %524, %12, %cst_131 {dimension_numbers = #tpu.dot_dimension_numbers<[1], [0], [0], [1], [0, 0, 1, 1], [], []>} : vector<16x128xbf16>, vector<128x384xbf16>, vector<16x384xf32> -> vector<16x384xf32>
    %526 = vector.extract_strided_slice %523 {offsets = [0, 0], sizes = [16, 128], strides = [1, 1]} : vector<16x384xf32> to vector<16x128xf32>
    %527 = vector.extract_strided_slice %525 {offsets = [0, 0], sizes = [16, 128], strides = [1, 1]} : vector<16x384xf32> to vector<16x128xf32>
    %528 = arith.addf %526, %527 : vector<16x128xf32>
    %529 = arith.negf %528 : vector<16x128xf32>
    %530 = math.exp %529 : vector<16x128xf32>
    %cst_132 = arith.constant 1.000000e+00 : f32
    %531 = vector.broadcast %cst_132 : f32 to vector<16x128xf32>
    %532 = arith.addf %531, %530 : vector<16x128xf32>
    %533 = arith.divf %531, %532 : vector<16x128xf32>
    %534 = vector.extract_strided_slice %523 {offsets = [0, 128], sizes = [16, 128], strides = [1, 1]} : vector<16x384xf32> to vector<16x128xf32>
    %535 = vector.extract_strided_slice %525 {offsets = [0, 128], sizes = [16, 128], strides = [1, 1]} : vector<16x384xf32> to vector<16x128xf32>
    %536 = arith.addf %534, %535 : vector<16x128xf32>
    %537 = arith.negf %536 : vector<16x128xf32>
    %538 = math.exp %537 : vector<16x128xf32>
    %cst_133 = arith.constant 1.000000e+00 : f32
    %539 = vector.broadcast %cst_133 : f32 to vector<16x128xf32>
    %540 = arith.addf %539, %538 : vector<16x128xf32>
    %541 = arith.divf %539, %540 : vector<16x128xf32>
    %542 = vector.extract_strided_slice %523 {offsets = [0, 256], sizes = [16, 128], strides = [1, 1]} : vector<16x384xf32> to vector<16x128xf32>
    %543 = vector.extract_strided_slice %525 {offsets = [0, 256], sizes = [16, 128], strides = [1, 1]} : vector<16x384xf32> to vector<16x128xf32>
    %544 = arith.addf %543, %15 : vector<16x128xf32>
    %545 = arith.mulf %533, %544 : vector<16x128xf32>
    %546 = arith.addf %542, %545 : vector<16x128xf32>
    %547 = math.tanh %546 : vector<16x128xf32>
    %cst_134 = arith.constant 1.000000e+00 : f32
    %548 = vector.broadcast %cst_134 : f32 to vector<16x128xf32>
    %549 = arith.subf %548, %541 : vector<16x128xf32>
    %550 = arith.mulf %549, %547 : vector<16x128xf32>
    %551 = arith.mulf %541, %516 : vector<16x128xf32>
    %552 = arith.addf %550, %551 : vector<16x128xf32>
    %553 = arith.index_cast %c14_i32 : i32 to index
    %c0_135 = arith.constant 0 : index
    %c0_136 = arith.constant 0 : index
    %554 = vector.load %arg6[%553, %c0_135, %c0_136] : memref<16x16x128xf32, #tpu.memory_space<vmem>>, vector<1x16x128xf32>
    %555 = vector.shape_cast %554 : vector<1x16x128xf32> to vector<16x128xf32>
    %556 = vector.shape_cast %552 : vector<16x128xf32> to vector<1x16x128xf32>
    tpu.vector_store %arg6[%553, %c0_135, %c0_136], %556 {strides = array<i32>} : memref<16x16x128xf32, #tpu.memory_space<vmem>>, vector<1x16x128xf32>,
    %c15_i32 = arith.constant 15 : i32
    %557 = arith.index_cast %c15_i32 : i32 to index
    %c0_137 = arith.constant 0 : index
    %c0_138 = arith.constant 0 : index
    %558 = vector.load %arg8[%557, %c0_137, %c0_138] : memref<16x16x384xf32, #tpu.memory_space<vmem>>, vector<1x16x384xf32>
    %559 = vector.shape_cast %558 : vector<1x16x384xf32> to vector<16x384xf32>
    %560 = arith.truncf %552 : vector<16x128xf32> to vector<16x128xbf16>
    %cst_139 = arith.constant dense<0.000000e+00> : vector<16x384xf32>
    %561 = tpu.matmul %560, %12, %cst_139 {dimension_numbers = #tpu.dot_dimension_numbers<[1], [0], [0], [1], [0, 0, 1, 1], [], []>} : vector<16x128xbf16>, vector<128x384xbf16>, vector<16x384xf32> -> vector<16x384xf32>
    %562 = vector.extract_strided_slice %559 {offsets = [0, 0], sizes = [16, 128], strides = [1, 1]} : vector<16x384xf32> to vector<16x128xf32>
    %563 = vector.extract_strided_slice %561 {offsets = [0, 0], sizes = [16, 128], strides = [1, 1]} : vector<16x384xf32> to vector<16x128xf32>
    %564 = arith.addf %562, %563 : vector<16x128xf32>
    %565 = arith.negf %564 : vector<16x128xf32>
    %566 = math.exp %565 : vector<16x128xf32>
    %cst_140 = arith.constant 1.000000e+00 : f32
    %567 = vector.broadcast %cst_140 : f32 to vector<16x128xf32>
    %568 = arith.addf %567, %566 : vector<16x128xf32>
    %569 = arith.divf %567, %568 : vector<16x128xf32>
    %570 = vector.extract_strided_slice %559 {offsets = [0, 128], sizes = [16, 128], strides = [1, 1]} : vector<16x384xf32> to vector<16x128xf32>
    %571 = vector.extract_strided_slice %561 {offsets = [0, 128], sizes = [16, 128], strides = [1, 1]} : vector<16x384xf32> to vector<16x128xf32>
    %572 = arith.addf %570, %571 : vector<16x128xf32>
    %573 = arith.negf %572 : vector<16x128xf32>
    %574 = math.exp %573 : vector<16x128xf32>
    %cst_141 = arith.constant 1.000000e+00 : f32
    %575 = vector.broadcast %cst_141 : f32 to vector<16x128xf32>
    %576 = arith.addf %575, %574 : vector<16x128xf32>
    %577 = arith.divf %575, %576 : vector<16x128xf32>
    %578 = vector.extract_strided_slice %559 {offsets = [0, 256], sizes = [16, 128], strides = [1, 1]} : vector<16x384xf32> to vector<16x128xf32>
    %579 = vector.extract_strided_slice %561 {offsets = [0, 256], sizes = [16, 128], strides = [1, 1]} : vector<16x384xf32> to vector<16x128xf32>
    %580 = arith.addf %579, %15 : vector<16x128xf32>
    %581 = arith.mulf %569, %580 : vector<16x128xf32>
    %582 = arith.addf %578, %581 : vector<16x128xf32>
    %583 = math.tanh %582 : vector<16x128xf32>
    %cst_142 = arith.constant 1.000000e+00 : f32
    %584 = vector.broadcast %cst_142 : f32 to vector<16x128xf32>
    %585 = arith.subf %584, %577 : vector<16x128xf32>
    %586 = arith.mulf %585, %583 : vector<16x128xf32>
    %587 = arith.mulf %577, %552 : vector<16x128xf32>
    %588 = arith.addf %586, %587 : vector<16x128xf32>
    %589 = arith.index_cast %c15_i32 : i32 to index
    %c0_143 = arith.constant 0 : index
    %c0_144 = arith.constant 0 : index
    %590 = vector.load %arg6[%589, %c0_143, %c0_144] : memref<16x16x128xf32, #tpu.memory_space<vmem>>, vector<1x16x128xf32>
    %591 = vector.shape_cast %590 : vector<1x16x128xf32> to vector<16x128xf32>
    %592 = vector.shape_cast %588 : vector<16x128xf32> to vector<1x16x128xf32>
    tpu.vector_store %arg6[%589, %c0_143, %c0_144], %592 {strides = array<i32>} : memref<16x16x128xf32, #tpu.memory_space<vmem>>, vector<1x16x128xf32>,
    %c16_i32 = arith.constant 16 : i32
    %c0_145 = arith.constant 0 : index
    %c0_146 = arith.constant 0 : index
    %593 = vector.load %arg7[%c0_145, %c0_146] : memref<16x128xf32, #tpu.memory_space<vmem>>, vector<16x128xf32>
    tpu.vector_store %arg7[%c0_145, %c0_146], %588 {strides = array<i32>} : memref<16x128xf32, #tpu.memory_space<vmem>>, vector<16x128xf32>,
    return
  }
  func.func @transform_0(%arg0: i32) -> (i32, i32, i32) {
    %c0_i32 = arith.constant 0 : i32
    %c0_i32_0 = arith.constant 0 : i32
    %c0_i32_1 = arith.constant 0 : i32
    return %arg0, %c0_i32, %c0_i32_0 : i32, i32, i32
  }
  func.func @transform_1(%arg0: i32) -> (i32, i32) {
    %c0_i32 = arith.constant 0 : i32
    %c0_i32_0 = arith.constant 0 : i32
    %c0_i32_1 = arith.constant 0 : i32
    return %c0_i32, %c0_i32_0 : i32, i32
  }
  func.func @transform_2(%arg0: i32) -> (i32, i32) {
    %c0_i32 = arith.constant 0 : i32
    %c0_i32_0 = arith.constant 0 : i32
    %c0_i32_1 = arith.constant 0 : i32
    return %c0_i32, %c0_i32_0 : i32, i32
  }
  func.func @transform_3(%arg0: i32) -> (i32, i32) {
    %c0_i32 = arith.constant 0 : i32
    %c0_i32_0 = arith.constant 0 : i32
    %c0_i32_1 = arith.constant 0 : i32
    return %c0_i32, %c0_i32_0 : i32, i32
  }
  func.func @transform_4(%arg0: i32) -> (i32, i32) {
    %c0_i32 = arith.constant 0 : i32
    %c0_i32_0 = arith.constant 0 : i32
    %c0_i32_1 = arith.constant 0 : i32
    return %c0_i32, %c0_i32_0 : i32, i32
  }
  func.func @transform_5(%arg0: i32) -> (i32, i32, i32) {
    %c0_i32 = arith.constant 0 : i32
    %c0_i32_0 = arith.constant 0 : i32
    %c0_i32_1 = arith.constant 0 : i32
    return %arg0, %c0_i32, %c0_i32_0 : i32, i32, i32
  }
}

</mosaic_0001>

<bundles_post_ra>
// kernel: tpu_custom_call.1
= control target key start
LH: loop header
LB: loop body
LE: loop exit
PB: predicated region body
PF: predicated region fallthrough
CT: control target
= control target key end

     0   :  { %10 = vsyncpa [#allocation5], 0  ;;  %s5895_s0 = inlined_call_operand.hbm [shape: bf16[16,16,128], index: 0, kind: input, shape index: {}]   ;;  %s5896_s1 = inlined_call_operand.hbm [shape: bf16[128,384], index: 1, kind: input, shape index: {}]   ;;  %s5897_s2 = inlined_call_operand.hbm [shape: bf16[128,384], index: 2, kind: input, shape index: {}]   ;;  %s5898_s3 = inlined_call_operand.vmem [shape: f32[1,384], index: 3, kind: input, shape index: {}]   ;;  %s5899_s4 = inlined_call_operand.vmem [shape: f32[1,128], index: 4, kind: input, shape index: {}]   ;;  %s5900_s5 = inlined_call_operand.hbm [shape: f32[16,16,128], index: 5, kind: output, shape index: {}]  }
   0x1   :  { %11 = vsyncpa [#allocation8], 0 }
   0x2   :  { %12 = vsyncpa [#allocation6], 0  ;;  %s4602_s18 = smov [#allocation7]   ;;  %s4508_s22 = scalar_lea.hbm %s5896_s1, 3072 }
   0x3   :  { %s30_s19 = sshll.u32 %s4602_s18, 4  ;;  %p4509_p0 = scmp.ne.s32.totalorder %s5896_s1, %s4508_s22  ;;  %s31_s19 = int_to_ptr.vmem [resolvable:$true] %s30_s19 }
   0x4   :  { %p4512_p1 = scmp.lt.u32.totalorder %s4508_s22, %s5896_s1 }
   0x6   :  { %p4514_p2 = pnand %p4512_p1, %p4509_p0 }
   0x8   :  { %4517 = shalt.err (!%p4514_p2)
}
   0x9   :  { %s4518_s27 = scalar_lea.vmem %s31_s19, 3072  ;;  %p4523_p4 = scmp.lt.s32.totalorder %s31_s19, %s31_s19 }
   0xa   :  { %p4519_p3 = scmp.ne.s32.totalorder %s31_s19, %s4518_s27  ;;  %p4524_p5 = scmp.lt.s32.totalorder %s4518_s27, %s4518_s27 }
   0xc   :  { %p4525_p6 = por %p4524_p5, %p4523_p4 }
   0xe   :  { %p4526_p7 = pnand %p4525_p6, %p4519_p3 }
  0x10   :  { %4529 = shalt.err (!%p4526_p7)
}
  0x11   :  { %s4603_s28 = smov 192   ;;  %s4604_s29 = smov 12  }
  0x12   :  { %36 = dma.hbm_to_vmem [thread:$0]  %s5896_s1, 3072, %s31_s19, [#allocation8], %s4603_s28, %s4603_s28, %s4604_s29  }
  0x13   :  { %s4605_s7 = smov [#allocation4]   ;;  %s4530_s11 = scalar_lea.hbm %s5895_s0, 2048 }
  0x14   :  { %s18_s8 = sshll.u32 %s4605_s7, 4  ;;  %p4531_p8 = scmp.ne.s32.totalorder %s5895_s0, %s4530_s11  ;;  %s19_s8 = int_to_ptr.vmem [resolvable:$true] %s18_s8 }
  0x15   :  { %p4534_p9 = scmp.lt.u32.totalorder %s4530_s11, %s5895_s0 }
  0x17   :  { %p4536_p10 = pnand %p4534_p9, %p4531_p8 }
  0x19   :  { %4539 = shalt.err (!%p4536_p10)
}
  0x1a   :  { %s4540_s16 = scalar_lea.vmem %s19_s8, 2048  ;;  %p4545_p12 = scmp.lt.s32.totalorder %s19_s8, %s19_s8 }
  0x1b   :  { %p4541_p11 = scmp.ne.s32.totalorder %s19_s8, %s4540_s16  ;;  %p4546_p13 = scmp.lt.s32.totalorder %s4540_s16, %s4540_s16 }
  0x1d   :  { %p4547_p0 = por %p4546_p13, %p4545_p12 }
  0x1f   :  { %p4548_p1 = pnand %p4547_p0, %p4541_p11 }
  0x21   :  { %4551 = shalt.err (!%p4548_p1)
}
  0x22   :  { %s4606_s1 = smov 64   ;;  %s4607_s17 = smov 4  }
  0x23   :  { %24 = dma.hbm_to_vmem [thread:$0]  %s5895_s0, 2048, %s19_s8, [#allocation5], %s4606_s1, %s4606_s1, %s4607_s17  }
  0x24   :  { %s4608_s20 = smov [#allocation9]   ;;  %s4552_s24 = scalar_lea.hbm %s5897_s2, 3072 }
  0x25   :  { %s42_s21 = sshll.u32 %s4608_s20, 4  ;;  %p4553_p2 = scmp.ne.s32.totalorder %s5897_s2, %s4552_s24  ;;  %s43_s21 = int_to_ptr.vmem [resolvable:$true] %s42_s21 }
  0x26   :  { %p4556_p3 = scmp.lt.u32.totalorder %s4552_s24, %s5897_s2 }
  0x28   :  { %p4558_p4 = pnand %p4556_p3, %p4553_p2 }
  0x2a   :  { %4561 = shalt.err (!%p4558_p4)
}
  0x2b   :  { %s4562_s6 = scalar_lea.vmem %s43_s21, 3072  ;;  %p4567_p6 = scmp.lt.s32.totalorder %s43_s21, %s43_s21 }
  0x2c   :  { %p4563_p5 = scmp.ne.s32.totalorder %s43_s21, %s4562_s6  ;;  %p4568_p7 = scmp.lt.s32.totalorder %s4562_s6, %s4562_s6 }
  0x2e   :  { %p4569_p8 = por %p4568_p7, %p4567_p6 }
  0x30   :  { %p4570_p9 = pnand %p4569_p8, %p4563_p5 }
  0x32   :  { %4573 = shalt.err (!%p4570_p9)
}
  0x33   :  { %48 = dma.hbm_to_vmem [thread:$0]  %s5897_s2, 3072, %s43_s21, [#allocation8], %s4603_s28, %s4603_s28, %s4604_s29  }
  0x34   :  { %4596 = dma.done.wait [#allocation5], 2048  }
  0x35   :  { %4597 = vsyncadd [#allocation5], 4294965248 }
  0x36   :  { %4598 = dma.done.wait [#allocation8], 6144  }
  0x37   :  { %4599 = vsyncadd [#allocation8], 4294961152  ;;  %v5901_v0 = vmov 0   ;;  %v4058_v1 = vld [vmem:[#allocation7 + $0x4] ss:$12 sps:$4 sm:$0xff]   ;;  %v4707_v25 = vld [vmem:[#allocation4 + $0x8] sm:$0xff]  }
  0x38   :  { %406 = vmatprep.mubr.bf16.mxu0 %v5901_v0  ;;  %526 = vmatprep.mubr.bf16.mxu1 %v5901_v0  ;;  %v4060_v2 = vld [vmem:[#allocation7] ss:$12 sps:$4 sm:$0xff]   ;;  %v4061_v3 = vld [vmem:[#allocation7 + $0x1c] ss:$12 sps:$4 sm:$0xff]   ;;  %v4063_v4 = vld [vmem:[#allocation7 + $0x18] ss:$12 sps:$4 sm:$0xff]  }
  0x39   :  { %374 = vmatprep.subr.bf16.mxu0 %v4058_v1  ;;  %3900 = vmatprep.subr.bf16.mxu1 %v4058_v1  ;;  %v4064_v5 = vld [vmem:[#allocation7 + $0x34] ss:$12 sps:$4 sm:$0xff]   ;;  %v4066_v6 = vld [vmem:[#allocation7 + $0x30] ss:$12 sps:$4 sm:$0xff]   ;;  %v4067_v7 = vld [vmem:[#allocation7 + $0x4c] ss:$12 sps:$4 sm:$0xff]  }
  0x3a   :  { %375 = vmatpush1.bf16.msra.mxu0 %v4060_v2  ;;  %3908 = vmatpush1.bf16.msra.mxu1 %v4060_v2  ;;  %v4069_v8 = vld [vmem:[#allocation7 + $0x48] ss:$12 sps:$4 sm:$0xff]   ;;  %v4070_v9 = vld [vmem:[#allocation7 + $0x64] ss:$12 sps:$4 sm:$0xff]   ;;  %v4072_v10 = vld [vmem:[#allocation7 + $0x60] ss:$12 sps:$4 sm:$0xff]  }
  0x3b   :  { %376 = vmatprep.subr.bf16.mxu0 %v4061_v3  ;;  %3901 = vmatprep.subr.bf16.mxu1 %v4061_v3  ;;  %v4073_v11 = vld [vmem:[#allocation7 + $0x7c] ss:$12 sps:$4 sm:$0xff]   ;;  %v4075_v12 = vld [vmem:[#allocation7 + $0x78] ss:$12 sps:$4 sm:$0xff]   ;;  %v4076_v13 = vld [vmem:[#allocation7 + $0x94] ss:$12 sps:$4 sm:$0xff]  }
  0x3c   :  { %v4078_v14 = vld [vmem:[#allocation7 + $0x90] ss:$12 sps:$4 sm:$0xff]   ;;  %v4079_v15 = vld [vmem:[#allocation7 + $0xac] ss:$12 sps:$4 sm:$0xff]   ;;  %v4081_v16 = vld [vmem:[#allocation7 + $0xa8] ss:$12 sps:$4 sm:$0xff]  }
  0x3d   :  { %v4690_v17 = vld [vmem:[#allocation9 + $0x4] ss:$12 sps:$4 sm:$0xff]   ;;  %v4093_v18 = vld [vmem:[#allocation7 + $0x8] ss:$12 sps:$4 sm:$0xff]   ;;  %v4696_v21 = vld [vmem:[#allocation9] ss:$12 sps:$4 sm:$0xff]  }
  0x3e   :  { %377 = vmatpush1.bf16.msra.mxu0 %v4063_v4  ;;  %3909 = vmatpush1.bf16.msra.mxu1 %v4063_v4  ;;  %v4692_v19 = vld [vmem:[#allocation4] sm:$0xff]   ;;  %v4699_v22 = vld [vmem:[#allocation9 + $0x1c] ss:$12 sps:$4 sm:$0xff]   ;;  %v4719_v30 = vld [vmem:[#allocation9 + $0x4c] ss:$12 sps:$4 sm:$0xff]   ;;  %v5903_v51 = vmov 0.0  }
  0x3f   :  { %378 = vmatprep.subr.bf16.mxu0 %v4064_v5  ;;  %3902 = vmatprep.subr.bf16.mxu1 %v4064_v5  ;;  %v4694_v20 = vld [vmem:[#allocation4 + $0x60] sm:$0xff]   ;;  %v4713_v28 = vld [vmem:[#allocation4 + $0x68] sm:$0xff]   ;;  %v4716_v29 = vld [vmem:[#allocation9 + $0x30] ss:$12 sps:$4 sm:$0xff]   ;;  %vm4611_vm0 = vmmov 0   ;;  %v4612_v3 = vmov 0.0|0.0  }
  0x40   :  { %v4097_v23 = vld [vmem:[#allocation7 + $0x20] ss:$12 sps:$4 sm:$0xff]   ;;  %v4705_v24 = vld [vmem:[#allocation9 + $0x18] ss:$12 sps:$4 sm:$0xff]   ;;  %v4101_v31 = vld [vmem:[#allocation7 + $0x50] ss:$12 sps:$4 sm:$0xff]  }
  0x41   :  { %v4710_v26 = vld [vmem:[#allocation9 + $0x34] ss:$12 sps:$4 sm:$0xff]   ;;  %v4100_v27 = vld [vmem:[#allocation7 + $0x38] ss:$12 sps:$4 sm:$0xff]   ;;  %v4737_v39 = vld [vmem:[#allocation9 + $0x7c] ss:$12 sps:$4 sm:$0xff]  }
  0x42   :  { %379 = vmatpush1.bf16.msra.mxu0 %v4066_v6  ;;  %3910 = vmatpush1.bf16.msra.mxu1 %v4066_v6  ;;  %v4725_v32 = vld [vmem:[#allocation9 + $0x48] ss:$12 sps:$4 sm:$0xff]   ;;  %v4728_v34 = vld [vmem:[#allocation9 + $0x64] ss:$12 sps:$4 sm:$0xff]   ;;  %v4108_v37 = vld [vmem:[#allocation7 + $0x80] ss:$12 sps:$4 sm:$0xff]  }
  0x43   :  { %380 = vmatprep.subr.bf16.mxu0 %v4067_v7  ;;  %3903 = vmatprep.subr.bf16.mxu1 %v4067_v7  ;;  %v4090_v33 = vld [vmem:[#allocation4 + $0x10] sm:$0xff]   ;;  %v4735_v38 = vld [vmem:[#allocation9 + $0x60] ss:$12 sps:$4 sm:$0xff]   ;;  %v4743_v40 = vld [vmem:[#allocation9 + $0x78] ss:$12 sps:$4 sm:$0xff]  }
  0x44   :  { %v4107_v35 = vld [vmem:[#allocation7 + $0x68] ss:$12 sps:$4 sm:$0xff]   ;;  %v4111_v41 = vld [vmem:[#allocation7 + $0x98] ss:$12 sps:$4 sm:$0xff]   ;;  %v4751_v45 = vld [vmem:[#allocation9 + $0x90] ss:$12 sps:$4 sm:$0xff]  }
  0x45   :  { %v4731_v36 = vld [vmem:[#allocation4 + $0x70] sm:$0xff]   ;;  %v4091_v43 = vld [vmem:[#allocation4 + $0x18] sm:$0xff]   ;;  %v4098_v49 = vld [vmem:[#allocation4 + $0x20] sm:$0xff]  }
  0x46   :  { %381 = vmatpush1.bf16.msra.mxu0 %v4069_v8  ;;  %3911 = vmatpush1.bf16.msra.mxu1 %v4069_v8  ;;  %v4746_v42 = vld [vmem:[#allocation9 + $0x94] ss:$12 sps:$4 sm:$0xff]   ;;  %v4748_v44 = vld [vmem:[#allocation4 + $0x78] sm:$0xff]   ;;  %v4105_v53 = vld [vmem:[#allocation4 + $0x28] sm:$0xff]  }
  0x47   :  { %382 = vmatprep.subr.bf16.mxu0 %v4070_v9  ;;  %3904 = vmatprep.subr.bf16.mxu1 %v4070_v9  ;;  %v4115_v46 = vld [vmem:[#allocation7 + $0xb0] ss:$12 sps:$4 sm:$0xff]   ;;  %v4754_v47 = vld [vmem:[#allocation9 + $0xac] ss:$12 sps:$4 sm:$0xff]   ;;  %v4760_v48 = vld [vmem:[#allocation9 + $0xa8] ss:$12 sps:$4 sm:$0xff]  }
  0x48   :  { %v4763_v50 = vld [vmem:[#allocation9 + $0x8] ss:$12 sps:$4 sm:$0xff]   ;;  %v4771_v52 = vld [vmem:[#allocation9 + $0x20] ss:$12 sps:$4 sm:$0xff]   ;;  %v4775_v54 = vld [vmem:[#allocation9 + $0x38] ss:$12 sps:$4 sm:$0xff]  }
  0x49   :  { %v4780_v55 = vld [vmem:[#allocation9 + $0x50] ss:$12 sps:$4 sm:$0xff]   ;;  %v4784_v57 = vld [vmem:[#allocation9 + $0x68] ss:$12 sps:$4 sm:$0xff]   ;;  %v4789_v58 = vld [vmem:[#allocation9 + $0x80] ss:$12 sps:$4 sm:$0xff]  }
  0x4a   :  { %383 = vmatpush1.bf16.msra.mxu0 %v4072_v10  ;;  %3912 = vmatpush1.bf16.msra.mxu1 %v4072_v10  ;;  %v4109_v56 = vld [vmem:[#allocation4 + $0x30] sm:$0xff]   ;;  %v4116_v59 = vld [vmem:[#allocation4 + $0x38] sm:$0xff]   ;;  %v4121_v61 = vld [vmem:[#allocation4 + $0x40] sm:$0xff]  }
  0x4b   :  { %384 = vmatprep.subr.bf16.mxu0 %v4073_v11  ;;  %3905 = vmatprep.subr.bf16.mxu1 %v4073_v11  ;;  %v4793_v60 = vld [vmem:[#allocation9 + $0x98] ss:$12 sps:$4 sm:$0xff]   ;;  %v4798_v62 = vld [vmem:[#allocation9 + $0xb0] ss:$12 sps:$4 sm:$0xff]   ;;  %v4123_v63 = vld [vmem:[#allocation4 + $0x48] sm:$0xff]  }
  0x4c   :  { %v4128_v1 = vld [vmem:[#allocation4 + $0x50] sm:$0xff]   ;;  %v4133_v2 = vld [vmem:[#allocation4 + $0x58] sm:$0xff]  }
  0x4e   :  { %385 = vmatpush1.bf16.msra.mxu0 %v4075_v12  ;;  %3913 = vmatpush1.bf16.msra.mxu1 %v4075_v12 }
  0x4f   :  { %386 = vmatprep.subr.bf16.mxu0 %v4076_v13  ;;  %3906 = vmatprep.subr.bf16.mxu1 %v4076_v13 }
  0x52   :  { %387 = vmatpush1.bf16.msra.mxu0 %v4078_v14  ;;  %3914 = vmatpush1.bf16.msra.mxu1 %v4078_v14 }
  0x53   :  { %388 = vmatprep.subr.bf16.mxu0 %v4079_v15  ;;  %3907 = vmatprep.subr.bf16.mxu1 %v4079_v15 }
  0x56   :  { %389 = vmatpush1.bf16.msra.mxu0 %v4081_v16  ;;  %3915 = vmatpush1.bf16.msra.mxu1 %v4081_v16  ;;  %v135_v16 = vlaneseq }
  0x57   :  { %1000 = vmatprep.subr.bf16.mxu0 %v4690_v17  ;;  %3532 = vmatprep.subr.bf16.mxu1 %v4093_v18 }
  0x59   :  { %407 = vmatmul.mubr.bf16.vlgmr.msra.gmra.mrb[0].mxu0 %v4692_v19  ;;  %527 = vmatmul.mubr.bf16.vlgmr.msra.gmra.mrb[0].mxu1 %v4694_v20 }
  0x5a   :  { %1001 = vmatpush1.bf16.msra.mxu0 %v4696_v21  ;;  %416 = vmatprep.mubr.bf16.mxu0 %v5901_v0 }
  0x5b   :  { %1002 = vmatprep.subr.bf16.mxu0 %v4699_v22  ;;  %3533 = vmatpush3.bf16.msra.mxu1 %v4093_v18  ;;  %v4872_v18 = vshrl.u32 %v135_v16, 7 }
  0x5c   :  { %3534 = vmatprep.subr.bf16.mxu1 %v4097_v23  ;;  %536 = vmatprep.mubr.bf16.mxu1 %v5901_v0 }
  0x5e   :  { %1003 = vmatpush1.bf16.msra.mxu0 %v4705_v24 }
  0x5f   :  { %1004 = vmatprep.subr.bf16.mxu0 %v4710_v26  ;;  %3535 = vmatpush3.bf16.msra.mxu1 %v4097_v23 }
  0x60   :  { %3536 = vmatprep.subr.bf16.mxu1 %v4100_v27 }
  0x61   :  { %417 = vmatmul.mubr.bf16.gmra.mrb[4].mxu0 %v4707_v25  ;;  %537 = vmatmul.mubr.bf16.gmra.mrb[4].mxu1 %v4713_v28 }
  0x62   :  { %426 = vmatprep.mubr.bf16.mxu0 %v5901_v0  ;;  %1005 = vmatpush1.bf16.msra.mxu0 %v4716_v29 }
  0x63   :  { %3537 = vmatpush3.bf16.msra.mxu1 %v4100_v27  ;;  %1006 = vmatprep.subr.bf16.mxu0 %v4719_v30 }
  0x64   :  { %3538 = vmatprep.subr.bf16.mxu1 %v4101_v31  ;;  %546 = vmatprep.mubr.bf16.mxu1 %v5901_v0 }
  0x66   :  { %1007 = vmatpush1.bf16.msra.mxu0 %v4725_v32 }
  0x67   :  { %3539 = vmatpush3.bf16.msra.mxu1 %v4101_v31  ;;  %1008 = vmatprep.subr.bf16.mxu0 %v4728_v34 }
  0x68   :  { %3540 = vmatprep.subr.bf16.mxu1 %v4107_v35 }
  0x69   :  { %427 = vmatmul.mubr.bf16.gmra.mrb[8].mxu0 %v4090_v33  ;;  %547 = vmatmul.mubr.bf16.gmra.mrb[8].mxu1 %v4731_v36 }
  0x6a   :  { %436 = vmatprep.mubr.bf16.mxu0 %v5901_v0  ;;  %556 = vmatprep.mubr.bf16.mxu1 %v5901_v0 }
  0x6b   :  { %3541 = vmatpush3.bf16.msra.mxu1 %v4107_v35  ;;  %1009 = vmatpush1.bf16.msra.mxu0 %v4735_v38 }
  0x6c   :  { %3542 = vmatprep.subr.bf16.mxu1 %v4108_v37  ;;  %1010 = vmatprep.subr.bf16.mxu0 %v4737_v39 }
  0x6f   :  { %3543 = vmatpush3.bf16.msra.mxu1 %v4108_v37  ;;  %1011 = vmatpush1.bf16.msra.mxu0 %v4743_v40 }
  0x70   :  { %3544 = vmatprep.subr.bf16.mxu1 %v4111_v41  ;;  %1012 = vmatprep.subr.bf16.mxu0 %v4746_v42 }
  0x71   :  { %437 = vmatmul.mubr.bf16.gmra.mrb[12].mxu0 %v4091_v43  ;;  %557 = vmatmul.mubr.bf16.gmra.mrb[12].mxu1 %v4748_v44 }
  0x72   :  { %446 = vmatprep.mubr.bf16.mxu0 %v5901_v0  ;;  %3548 = vmatprep.mubr.bf16.mxu1 %v4692_v19 }
  0x73   :  { %3545 = vmatpush3.bf16.msra.mxu1 %v4111_v41  ;;  %1013 = vmatpush1.bf16.msra.mxu0 %v4751_v45 }
  0x74   :  { %3546 = vmatprep.subr.bf16.mxu1 %v4115_v46  ;;  %1014 = vmatprep.subr.bf16.mxu0 %v4754_v47 }
  0x77   :  { %3547 = vmatpush3.bf16.msra.mxu1 %v4115_v46  ;;  %1015 = vmatpush1.bf16.msra.mxu0 %v4760_v48 }
  0x78   :  { %3580 = vmatprep.subr.bf16.mxu1 %v5903_v51  ;;  %1138 = vmatprep.subr.bf16.mxu0 %v4690_v17 }
  0x79   :  { %447 = vmatmul.mubr.bf16.gmra.mrb[16].mxu0 %v4098_v49 }
  0x7a   :  { %456 = vmatprep.mubr.bf16.mxu0 %v5901_v0  ;;  %3549 = vmatmul.mubr.bf16.vlgmr.msra.gmra.mrb[16].mxu1 %v4707_v25  ;;  %v145_v25 = vsub.s32 2, %v4872_v18 }
  0x7b   :  { %3581 = vmatpush3.bf16.msra.mxu1 %v4763_v50  ;;  %3552 = vmatprep.mubr.bf16.mxu1 %v4090_v33 }
  0x7c   :  { %3582 = vmatprep.subr.bf16.mxu1 %v5903_v51 }
  0x7f   :  { %3583 = vmatpush3.bf16.msra.mxu1 %v4771_v52 }
  0x80   :  { %3584 = vmatprep.subr.bf16.mxu1 %v5903_v51 }
  0x81   :  { %457 = vmatmul.mubr.bf16.gmra.mrb[20].mxu0 %v4105_v53 }
  0x82   :  { %466 = vmatprep.mubr.bf16.mxu0 %v5901_v0  ;;  %3553 = vmatmul.mubr.bf16.gmra.mrb[20].mxu1 %v4091_v43 }
  0x83   :  { %3556 = vmatprep.mubr.bf16.mxu1 %v4098_v49  ;;  %3585 = vmatpush3.bf16.msra.mxu1 %v4775_v54 }
  0x84   :  { %3586 = vmatprep.subr.bf16.mxu1 %v5903_v51 }
  0x87   :  { %3587 = vmatpush3.bf16.msra.mxu1 %v4780_v55 }
  0x88   :  { %3588 = vmatprep.subr.bf16.mxu1 %v5903_v51 }
  0x89   :  { %467 = vmatmul.mubr.bf16.gmra.mrb[24].mxu0 %v4109_v56 }
  0x8a   :  { %476 = vmatprep.mubr.bf16.mxu0 %v5901_v0  ;;  %3557 = vmatmul.mubr.bf16.gmra.mrb[24].mxu1 %v4105_v53 }
  0x8b   :  { %3560 = vmatprep.mubr.bf16.mxu1 %v4109_v56  ;;  %3589 = vmatpush3.bf16.msra.mxu1 %v4784_v57 }
  0x8c   :  { %3590 = vmatprep.subr.bf16.mxu1 %v5903_v51 }
  0x8f   :  { %3591 = vmatpush3.bf16.msra.mxu1 %v4789_v58 }
  0x90   :  { %3592 = vmatprep.subr.bf16.mxu1 %v5903_v51 }
  0x91   :  { %477 = vmatmul.mubr.bf16.gmra.mrb[28].mxu0 %v4116_v59 }
  0x92   :  { %486 = vmatprep.mubr.bf16.mxu0 %v5901_v0  ;;  %3561 = vmatmul.mubr.bf16.gmra.mrb[28].mxu1 %v4116_v59 }
  0x93   :  { %3564 = vmatprep.mubr.bf16.mxu1 %v4121_v61  ;;  %3593 = vmatpush3.bf16.msra.mxu1 %v4793_v60 }
  0x94   :  { %3594 = vmatprep.subr.bf16.mxu1 %v5903_v51 }
  0x97   :  { %3595 = vmatpush3.bf16.msra.mxu1 %v4798_v62 }
  0x98   :  { %3600 = vmatprep.subr.bf16.mxu1 %v5903_v51 }
  0x99   :  { %487 = vmatmul.mubr.bf16.gmra.mrb[32].mxu0 %v4121_v61 }
  0x9a   :  { %496 = vmatprep.mubr.bf16.mxu0 %v5901_v0  ;;  %3565 = vmatmul.mubr.bf16.gmra.mrb[32].mxu1 %v4123_v63 }
  0x9b   :  { %3568 = vmatprep.mubr.bf16.mxu1 %v4128_v1 }
  0xa1   :  { %497 = vmatmul.mubr.bf16.gmra.mrb[36].mxu0 %v4123_v63 }
  0xa2   :  { %506 = vmatprep.mubr.bf16.mxu0 %v5901_v0  ;;  %3569 = vmatmul.mubr.bf16.gmra.mrb[36].mxu1 %v4133_v2 }
  0xa3   :  { %3572 = vmatprep.mubr.bf16.mxu1 %v4694_v20 }
  0xa9   :  { %507 = vmatmul.mubr.bf16.gmra.mrb[40].mxu0 %v4128_v1 }
  0xaa   :  { %516 = vmatprep.mubr.bf16.mxu0 %v5901_v0  ;;  %3573 = vmatmul.mubr.bf16.gmra.mrb[40].mxu1 %v4713_v28  ;;  %v4886_v28 = vld [vmem:[%s5898_s3] sm:$0x7] }
  0xab   :  { %3576 = vmatprep.mubr.bf16.mxu1 %v4731_v36  ;;  %v4889_v31 = vrot.slane %v4886_v28, %v145_v25 }
  0xb1   :  { %517 = vmatmul.mubr.bf16.gmra.mrb[44].mxu0 %v4133_v2 }
  0xb2   :  { %1032 = vmatprep.mubr.bf16.mxu0 %v5901_v0  ;;  %3577 = vmatmul.mubr.bf16.gmra.mrb[44].mxu1 %v4748_v44 }
  0xb3   :  { %3596 = vmatprep.mubr.msk.bf16.mxu1 %vm4611_vm0, %v5903_v51 }
  0xb9   :  { %1033 = vmatmul.mubr.bf16.vlgmr.msra.gmra.mrb[0].mxu0 %v4612_v3 }
  0xba   :  { %3597 = vmatmul.mubr.bf16.vlgmr.msra.gmra.mrb[48].mxu1 %v4612_v3  ;;  %1139 = vmatpush1.bf16.msra.mxu0 %v4696_v21 }
  0xbb   :  { %3601 = vmatpush3.bf16.msra.mxu1 %v4763_v50  ;;  %1140 = vmatprep.subr.bf16.mxu0 %v4699_v22 }
  0xbc   :  { %3602 = vmatprep.subr.bf16.mxu1 %v5903_v51  ;;  %1170 = vmatprep.mubr.bf16.mxu0 %v5901_v0 }
  0xbd   :  { %3616 = vmatprep.mubr.msk.bf16.mxu1 %vm4611_vm0, %v5903_v51 }
  0xbe   :  { %1141 = vmatpush1.bf16.msra.mxu0 %v4705_v24 }
  0xbf   :  { %3603 = vmatpush3.bf16.msra.mxu1 %v4771_v52  ;;  %1142 = vmatprep.subr.bf16.mxu0 %v4710_v26 }
  0xc0   :  { %3604 = vmatprep.subr.bf16.mxu1 %v5903_v51 }
  0xc2   :  { %1143 = vmatpush1.bf16.msra.mxu0 %v4716_v29 }
  0xc3   :  { %3605 = vmatpush3.bf16.msra.mxu1 %v4775_v54  ;;  %1144 = vmatprep.subr.bf16.mxu0 %v4719_v30 }
  0xc4   :  { %3606 = vmatprep.subr.bf16.mxu1 %v5903_v51 }
  0xc6   :  { %1145 = vmatpush1.bf16.msra.mxu0 %v4725_v32 }
  0xc7   :  { %3607 = vmatpush3.bf16.msra.mxu1 %v4780_v55  ;;  %1146 = vmatprep.subr.bf16.mxu0 %v4728_v34 }
  0xc8   :  { %3608 = vmatprep.subr.bf16.mxu1 %v5903_v51 }
  0xca   :  { %1147 = vmatpush1.bf16.msra.mxu0 %v4735_v38 }
  0xcb   :  { %3609 = vmatpush3.bf16.msra.mxu1 %v4784_v57  ;;  %1148 = vmatprep.subr.bf16.mxu0 %v4737_v39 }
  0xcc   :  { %3610 = vmatprep.subr.bf16.mxu1 %v5903_v51 }
  0xce   :  { %1149 = vmatpush1.bf16.msra.mxu0 %v4743_v40 }
  0xcf   :  { %3611 = vmatpush3.bf16.msra.mxu1 %v4789_v58  ;;  %1150 = vmatprep.subr.bf16.mxu0 %v4746_v42 }
  0xd0   :  { %3612 = vmatprep.subr.bf16.mxu1 %v5903_v51 }
  0xd2   :  { %1151 = vmatpush1.bf16.msra.mxu0 %v4751_v45 }
  0xd3   :  { %3613 = vmatpush3.bf16.msra.mxu1 %v4793_v60  ;;  %1152 = vmatprep.subr.bf16.mxu0 %v4754_v47 }
  0xd4   :  { %3614 = vmatprep.subr.bf16.mxu1 %v5903_v51 }
  0xd6   :  { %1153 = vmatpush1.bf16.msra.mxu0 %v4760_v48 }
  0xd7   :  { %3615 = vmatpush3.bf16.msra.mxu1 %v4798_v62  ;;  %1277 = vmatprep.subr.bf16.mxu0 %v4690_v17 }
  0xd8   :  { %3620 = vmatprep.subr.bf16.mxu1 %v5903_v51 }
 0x12c   :  { %v4848_v4 = vpop.f32.mrb[0].mxu1 }
 0x12d   :  { %5905 = vst [vmem:[#allocation14_spill] sm:$0xff] %v4848_v4  ;;  %v4850_v5 = vpop.f32.mrb[1].mxu1 }
 0x12e   :  { %5906 = vst [vmem:[#allocation15_spill] sm:$0xff] %v4850_v5  ;;  %v4852_v6 = vpop.f32.mrb[2].mxu1 }
 0x12f   :  { %5907 = vst [vmem:[#allocation16_spill] sm:$0xff] %v4852_v6  ;;  %v4854_v7 = vpop.f32.mrb[3].mxu1 }
 0x130   :  { %5908 = vst [vmem:[#allocation17_spill] sm:$0xff] %v4854_v7 }
 0x134   :  { %v4856_v8 = vpop.f32.mrb[4].mxu1 }
 0x135   :  { %5909 = vst [vmem:[#allocation18_spill] sm:$0xff] %v4856_v8  ;;  %v4858_v9 = vpop.f32.mrb[5].mxu1 }
 0x136   :  { %5910 = vst [vmem:[#allocation19_spill] sm:$0xff] %v4858_v9  ;;  %v4860_v10 = vpop.f32.mrb[6].mxu1 }
 0x137   :  { %5911 = vst [vmem:[#allocation20_spill] sm:$0xff] %v4860_v10  ;;  %v4862_v11 = vpop.f32.mrb[7].mxu1 }
 0x138   :  { %5912 = vst [vmem:[#allocation21_spill] sm:$0xff] %v4862_v11 }
 0x13c   :  { %v4864_v12 = vpop.f32.mrb[8].mxu1 }
 0x13d   :  { %5913 = vst [vmem:[#allocation22_spill] sm:$0xff] %v4864_v12  ;;  %v4866_v13 = vpop.f32.mrb[9].mxu1 }
 0x13e   :  { %5914 = vst [vmem:[#allocation23_spill] sm:$0xff] %v4866_v13  ;;  %v4868_v14 = vpop.f32.mrb[10].mxu1 }
 0x13f   :  { %5915 = vst [vmem:[#allocation24_spill] sm:$0xff] %v4868_v14  ;;  %v4870_v15 = vpop.f32.mrb[11].mxu1 }
 0x140   :  { %5916 = vst [vmem:[#allocation25_spill] sm:$0xff] %v4870_v15 }
 0x144   :  { %v4874_v19 = vpop.f32.mrb[12].mxu1 }
 0x145   :  { %5917 = vst [vmem:[#allocation26_spill] sm:$0xff] %v4874_v19  ;;  %v4876_v20 = vpop.f32.mrb[13].mxu1 }
 0x146   :  { %5918 = vst [vmem:[#allocation27_spill] sm:$0xff] %v4876_v20  ;;  %v4878_v23 = vpop.f32.mrb[14].mxu1 }
 0x147   :  { %5919 = vst [vmem:[#allocation28_spill] sm:$0xff] %v4878_v23  ;;  %v4881_v27 = vpop.f32.mrb[15].mxu1 }
 0x148   :  { %5920 = vst [vmem:[#allocation29_spill] sm:$0xff] %v4881_v27 }
 0x14d   :  { %v3550_v33 = vpop.f32.mrb[16].mxu1 }
 0x14e   :  { %v4892_v35 = vadd.f32 %v3550_v33, %v4889_v31  ;;  %v4894_v36 = vpop.f32.mrb[17].mxu1 }
 0x14f   :  { %v3551_v37 = vpop.f32.mrb[18].mxu1 }
 0x150   :  { %v4897_v41 = vadd.f32 %v3551_v37, %v4889_v31  ;;  %v4899_v43 = vpop.f32.mrb[19].mxu1 }
 0x155   :  { %v3554_v44 = vpop.f32.mrb[20].mxu1 }
 0x156   :  { %v4902_v46 = vadd.f32 %v3554_v44, %v4889_v31  ;;  %v617_v49 = vpop.f32.mrb[21].mxu1 }
 0x157   :  { %v4905_v53 = vadd.f32 %v617_v49, %v4889_v31  ;;  %v3555_v56 = vpop.f32.mrb[22].mxu1 }
 0x158   :  { %v4908_v59 = vadd.f32 %v3555_v56, %v4889_v31  ;;  %v620_v61 = vpop.f32.mrb[23].mxu1 }
 0x159   :  { %v4911_v63 = vadd.f32 %v620_v61, %v4889_v31 }
 0x15d   :  { %v3558_v1 = vpop.f32.mrb[24].mxu1 }
 0x15e   :  { %v4914_v2 = vadd.f32 %v3558_v1, %v4889_v31  ;;  %v633_v3 = vpop.f32.mrb[25].mxu1 }
 0x15f   :  { %v4917_v16 = vadd.f32 %v633_v3, %v4889_v31  ;;  %v3559_v25 = vpop.f32.mrb[26].mxu1 }
 0x160   :  { %v4920_v33 = vadd.f32 %v3559_v25, %v4889_v31  ;;  %v636_v37 = vpop.f32.mrb[27].mxu1 }
 0x161   :  { %v4923_v44 = vadd.f32 %v636_v37, %v4889_v31 }
 0x165   :  { %v3562_v49 = vpop.f32.mrb[28].mxu1 }
 0x166   :  { %v4926_v56 = vadd.f32 %v3562_v49, %v4889_v31  ;;  %v649_v61 = vpop.f32.mrb[29].mxu1 }
 0x167   :  { %v4929_v1 = vadd.f32 %v649_v61, %v4889_v31  ;;  %v3563_v0 = vpop.f32.mrb[30].mxu1 }
 0x168   :  { %v4932_v3 = vadd.f32 %v3563_v0, %v4889_v31  ;;  %v652_v51 = vpop.f32.mrb[31].mxu1 }
 0x169   :  { %v4935_v25 = vadd.f32 %v652_v51, %v4889_v31 }
 0x16d   :  { %v3566_v27 = vpop.f32.mrb[32].mxu1 }
 0x16e   :  { %v4938_v37 = vadd.f32 %v3566_v27, %v4889_v31  ;;  %v665_v23 = vpop.f32.mrb[33].mxu1 }
 0x16f   :  { %v4941_v49 = vadd.f32 %v665_v23, %v4889_v31  ;;  %v3567_v20 = vpop.f32.mrb[34].mxu1 }
 0x170   :  { %5921 = vst [vmem:[#allocation30_spill] sm:$0xff] %v4938_v37  ;;  %v4944_v61 = vadd.f32 %v3567_v20, %v4889_v31  ;;  %v668_v19 = vpop.f32.mrb[35].mxu1 }
 0x171   :  { %5922 = vst [vmem:[#allocation31_spill] sm:$0xff] %v4941_v49  ;;  %v4947_v0 = vadd.f32 %v668_v19, %v4889_v31 }
 0x172   :  { %5923 = vst [vmem:[#allocation32_spill] sm:$0xff] %v4944_v61 }
 0x173   :  { %5924 = vst [vmem:[#allocation33_spill] sm:$0xff] %v4947_v0 }
 0x175   :  { %v3570_v15 = vpop.f32.mrb[36].mxu1 }
 0x176   :  { %v4950_v51 = vadd.f32 %v3570_v15, %v4889_v31  ;;  %v681_v14 = vpop.f32.mrb[37].mxu1 }
 0x177   :  { %v4953_v27 = vadd.f32 %v681_v14, %v4889_v31  ;;  %v3571_v13 = vpop.f32.mrb[38].mxu1 }
 0x178   :  { %5925 = vst [vmem:[#allocation34_spill] sm:$0xff] %v4950_v51  ;;  %v4956_v23 = vadd.f32 %v3571_v13, %v4889_v31  ;;  %v684_v12 = vpop.f32.mrb[39].mxu1 }
 0x179   :  { %5926 = vst [vmem:[#allocation35_spill] sm:$0xff] %v4953_v27  ;;  %v4959_v20 = vadd.f32 %v684_v12, %v4889_v31 }
 0x17a   :  { %5927 = vst [vmem:[#allocation36_spill] sm:$0xff] %v4956_v23 }
 0x17b   :  { %5928 = vst [vmem:[#allocation37_spill] sm:$0xff] %v4959_v20 }
 0x17d   :  { %v3574_v11 = vpop.f32.mrb[40].mxu1 }
 0x17e   :  { %v4962_v19 = vadd.f32 %v3574_v11, %v4889_v31  ;;  %v697_v10 = vpop.f32.mrb[41].mxu1  ;;  %v137_v11 = vsub.s32 0, %v4872_v18 }
 0x17f   :  { %v4965_v15 = vadd.f32 %v697_v10, %v4889_v31  ;;  %v3575_v9 = vpop.f32.mrb[42].mxu1 }
 0x180   :  { %5929 = vst [vmem:[#allocation38_spill] sm:$0xff] %v4962_v19  ;;  %v4968_v14 = vadd.f32 %v3575_v9, %v4889_v31  ;;  %v700_v8 = vpop.f32.mrb[43].mxu1 }
 0x181   :  { %5930 = vst [vmem:[#allocation39_spill] sm:$0xff] %v4965_v15  ;;  %v4971_v13 = vadd.f32 %v700_v8, %v4889_v31  ;;  %v141_v8 = vsub.s32 1, %v4872_v18 }
 0x182   :  { %5931 = vst [vmem:[#allocation40_spill] sm:$0xff] %v4968_v14 }
 0x183   :  { %5932 = vst [vmem:[#allocation41_spill] sm:$0xff] %v4971_v13  ;;  %v4988_v13 = vrot.slane %v4886_v28, %v137_v11 }
 0x185   :  { %v3578_v7 = vpop.f32.mrb[44].mxu1 }
 0x186   :  { %v4974_v12 = vadd.f32 %v3578_v7, %v4889_v31  ;;  %v713_v6 = vpop.f32.mrb[45].mxu1 }
 0x187   :  { %v4978_v19 = vadd.f32 %v713_v6, %v4889_v31  ;;  %v3579_v10 = vpop.f32.mrb[46].mxu1  ;;  %v4992_v6 = vrot.slane %v4886_v28, %v141_v8 }
 0x188   :  { %5933 = vst [vmem:[#allocation42_spill] sm:$0xff] %v4974_v12  ;;  %v4981_v15 = vadd.f32 %v3579_v10, %v4889_v31  ;;  %v716_v9 = vpop.f32.mrb[47].mxu1 }
 0x189   :  { %5934 = vst [vmem:[#allocation43_spill] sm:$0xff] %v4978_v19  ;;  %v4984_v14 = vadd.f32 %v716_v9, %v4889_v31 }
 0x18a   :  { %5935 = vst [vmem:[#allocation44_spill] sm:$0xff] %v4981_v15 }
 0x18b   :  { %5936 = vst [vmem:[#allocation45_spill] sm:$0xff] %v4984_v14 }
 0x18c   :  { %v1034_v7 = vpop.f32.mrb[0].mxu0 }
 0x18d   :  { %v3916_v12 = vadd.f32 %v1034_v7, %v4988_v13  ;;  %v1036_v5 = vpop.f32.mrb[1].mxu0  ;;  %v1077_v4 = vpop.f32.mrb[48].mxu1 }
 0x18e   :  { %v1038_v19 = vpop.f32.mrb[2].mxu0  ;;  %v3598_v10 = vpop.f32.mrb[49].mxu1  ;;  %v3917_v18 = vadd.f32 %v1036_v5, %v4992_v6  ;;  %v5000_v5 = vld [vmem:[%s5899_s4] ss:$0 sm:$0xff] }
 0x18f   :  { %v3300_v15 = vmul.f32 -1.442695, %v3916_v12  ;;  %v3918_v23 = vadd.f32 %v1038_v19, %v4988_v13  ;;  %v1040_v9 = vpop.f32.mrb[3].mxu0  ;;  %v1080_v14 = vpop.f32.mrb[50].mxu1 }
 0x190   :  { %v3599_v51 = vpop.f32.mrb[51].mxu1  ;;  %v3919_v20 = vadd.f32 %v1040_v9, %v4992_v6  ;;  %v3302_v7 = vmul.f32 -1.442695, %v3917_v18 }
 0x191   :  { %4138 = vpow2.f32 %v3300_v15  ;;  %v3301_v11 = vmul.f32 -1.442695, %v3918_v23  ;;  %v1112_v15 = vadd.f32 %v5000_v5, %v1077_v4 }
 0x192   :  { %v3303_v27 = vmul.f32 -1.442695, %v3919_v20 }
 0x193   :  { %4140 = vpow2.f32 %v3301_v11  ;;  %v1113_v11 = vadd.f32 %v5000_v5, %v1080_v14 }
 0x194   :  { %4142 = vpow2.f32 %v3302_v7 }
 0x195   :  { %4144 = vpow2.f32 %v3303_v27  ;;  %v602_v27 = vadd.f32 %v4894_v36, %v4889_v31 }
 0x19b   :  { %v4139_v28 = vpop.eup %4138 }
 0x19c   :  { %v1092_v8 = vadd.f32 1.0, %v4139_v28  ;;  %v605_v28 = vadd.f32 %v4899_v43, %v4889_v31  ;;  %v5937_v43 = vmov 0.0  }
 0x19d   :  { %v4141_v10 = vpop.eup %4140 }
 0x19e   :  { %4146 = vrcp.f32 %v1092_v8  ;;  %v1093_v12 = vadd.f32 1.0, %v4141_v10  ;;  %v4143_v19 = vpop.eup %4142 }
 0x19f   :  { %v4145_v51 = vpop.eup %4144  ;;  %v1106_v23 = vadd.f32 1.0, %v4143_v19 }
 0x1a0   :  { %4148 = vrcp.f32 %v1093_v12  ;;  %v1107_v9 = vadd.f32 1.0, %v4145_v51 }
 0x1a1   :  { %4150 = vrcp.f32 %v1106_v23 }
 0x1a2   :  { %4152 = vrcp.f32 %v1107_v9 }
 0x1a8   :  { %v4147_v20 = vpop.eup %4146 }
 0x1a9   :  { %v1114_v18 = vmul.f32 %v4147_v20, %v1112_v15 }
 0x1aa   :  { %v4149_v7 = vpop.eup %4148 }
 0x1ab   :  { %v1116_v8 = vadd.f32 %v1114_v18, %v602_v27  ;;  %v1115_v10 = vmul.f32 %v4149_v7, %v1113_v11  ;;  %v4151_v4 = vpop.eup %4150 }
 0x1ac   :  { %v4153_v19 = vpop.eup %4152  ;;  %v1120_v51 = vsub.f32 1.0, %v4151_v4  ;;  %v1124_v23 = vmul.f32 0.0, %v4151_v4 }
 0x1ad   :  { %4154 = vtanh.f32 %v1116_v8  ;;  %v1117_v12 = vadd.f32 %v1115_v10, %v605_v28  ;;  %v1121_v37 = vsub.f32 1.0, %v4153_v19  ;;  %v1125_v14 = vmul.f32 0.0, %v4153_v19 }
 0x1af   :  { %4156 = vtanh.f32 %v1117_v12 }
 0x1b7   :  { %v4155_v61 = vpop.eup %4154 }
 0x1b8   :  { %v1122_v36 = vmul.f32 %v4155_v61, %v1120_v51 }
 0x1b9   :  { %v4157_v15 = vpop.eup %4156 }
 0x1ba   :  { %v1123_v20 = vmul.f32 %v4157_v15, %v1121_v37  ;;  %v5008_v0 = vadd.f32 %v1124_v23, %v1122_v36  ;;  %v5938_v37 = vmov 0  }
 0x1bc   :  { %v5010_v49 = vadd.f32 %v1125_v14, %v1123_v20  ;;  %1128 = vst [vmem:[#allocation10] sm:$0xff] %v5008_v0 }
 0x1be   :  { %1129 = vst [vmem:[#allocation10 + $0x8] sm:$0xff] %v5010_v49  ;;  %v1137_v31 = vpack.c.bf16 %v5010_v49, %v5008_v0 }
 0x1c0   :  { %1171 = vmatmul.mubr.bf16.vlgmr.msra.gmra.mrb[4].mxu0 %v1137_v31  ;;  %3617 = vmatmul.mubr.bf16.vlgmr.msra.gmra.mrb[52].mxu1 %v1137_v31 }
 0x1c1   :  { %1278 = vmatpush1.bf16.msra.mxu0 %v4696_v21  ;;  %3621 = vmatpush3.bf16.msra.mxu1 %v4763_v50 }
 0x1c2   :  { %1279 = vmatprep.subr.bf16.mxu0 %v4699_v22  ;;  %3622 = vmatprep.subr.bf16.mxu1 %v5937_v43 }
 0x1c3   :  { %1309 = vmatprep.mubr.bf16.mxu0 %v5938_v37  ;;  %3636 = vmatprep.mubr.msk.bf16.mxu1 %vm4611_vm0, %v5937_v43 }
 0x1c5   :  { %1280 = vmatpush1.bf16.msra.mxu0 %v4705_v24  ;;  %3623 = vmatpush3.bf16.msra.mxu1 %v4771_v52 }
 0x1c6   :  { %1281 = vmatprep.subr.bf16.mxu0 %v4710_v26  ;;  %3624 = vmatprep.subr.bf16.mxu1 %v5937_v43 }
 0x1c9   :  { %1282 = vmatpush1.bf16.msra.mxu0 %v4716_v29  ;;  %3625 = vmatpush3.bf16.msra.mxu1 %v4775_v54 }
 0x1ca   :  { %1283 = vmatprep.subr.bf16.mxu0 %v4719_v30  ;;  %3626 = vmatprep.subr.bf16.mxu1 %v5937_v43 }
 0x1cd   :  { %1284 = vmatpush1.bf16.msra.mxu0 %v4725_v32  ;;  %3627 = vmatpush3.bf16.msra.mxu1 %v4780_v55 }
 0x1ce   :  { %1285 = vmatprep.subr.bf16.mxu0 %v4728_v34  ;;  %3628 = vmatprep.subr.bf16.mxu1 %v5937_v43 }
 0x1d1   :  { %1286 = vmatpush1.bf16.msra.mxu0 %v4735_v38  ;;  %3629 = vmatpush3.bf16.msra.mxu1 %v4784_v57 }
 0x1d2   :  { %1287 = vmatprep.subr.bf16.mxu0 %v4737_v39  ;;  %3630 = vmatprep.subr.bf16.mxu1 %v5937_v43 }
 0x1d5   :  { %1288 = vmatpush1.bf16.msra.mxu0 %v4743_v40  ;;  %3631 = vmatpush3.bf16.msra.mxu1 %v4789_v58 }
 0x1d6   :  { %1289 = vmatprep.subr.bf16.mxu0 %v4746_v42  ;;  %3632 = vmatprep.subr.bf16.mxu1 %v5937_v43 }
 0x1d9   :  { %1290 = vmatpush1.bf16.msra.mxu0 %v4751_v45  ;;  %3633 = vmatpush3.bf16.msra.mxu1 %v4793_v60 }
 0x1da   :  { %1291 = vmatprep.subr.bf16.mxu0 %v4754_v47  ;;  %3634 = vmatprep.subr.bf16.mxu1 %v5937_v43 }
 0x1dd   :  { %1292 = vmatpush1.bf16.msra.mxu0 %v4760_v48  ;;  %3635 = vmatpush3.bf16.msra.mxu1 %v4798_v62 }
 0x1de   :  { %1416 = vmatprep.subr.bf16.mxu0 %v4690_v17  ;;  %3640 = vmatprep.subr.bf16.mxu1 %v5937_v43 }
 0x293   :  { %v1172_v61 = vpop.f32.mrb[4].mxu0  ;;  %v1215_v9 = vpop.f32.mrb[52].mxu1 }
 0x294   :  { %v3920_v27 = vadd.f32 %v1172_v61, %v4988_v13  ;;  %v1174_v18 = vpop.f32.mrb[5].mxu0  ;;  %v3618_v11 = vpop.f32.mrb[53].mxu1 }
 0x295   :  { %v1176_v7 = vpop.f32.mrb[6].mxu0  ;;  %v1218_v28 = vpop.f32.mrb[54].mxu1  ;;  %v3921_v19 = vadd.f32 %v1174_v18, %v4992_v6  ;;  %v1250_v18 = vadd.f32 %v5000_v5, %v1215_v9 }
 0x296   :  { %v3304_v8 = vmul.f32 -1.442695, %v3920_v27  ;;  %v3922_v10 = vadd.f32 %v1176_v7, %v4988_v13  ;;  %v1178_v12 = vpop.f32.mrb[7].mxu0  ;;  %v3619_v4 = vpop.f32.mrb[55].mxu1 }
 0x297   :  { %v3923_v17 = vadd.f32 %v1178_v12, %v4992_v6  ;;  %v3306_v36 = vmul.f32 -1.442695, %v3921_v19  ;;  %v1251_v12 = vadd.f32 %v5000_v5, %v1218_v28 }
 0x298   :  { %4158 = vpow2.f32 %v3304_v8  ;;  %v3305_v51 = vmul.f32 -1.442695, %v3922_v10 }
 0x299   :  { %v3307_v23 = vmul.f32 -1.442695, %v3923_v17 }
 0x29a   :  { %4160 = vpow2.f32 %v3305_v51 }
 0x29b   :  { %4162 = vpow2.f32 %v3306_v36 }
 0x29c   :  { %4164 = vpow2.f32 %v3307_v23 }
 0x2a2   :  { %v4159_v15 = vpop.eup %4158 }
 0x2a3   :  { %v1230_v20 = vadd.f32 1.0, %v4159_v15 }
 0x2a4   :  { %v4161_v14 = vpop.eup %4160 }
 0x2a5   :  { %4166 = vrcp.f32 %v1230_v20  ;;  %v1231_v31 = vadd.f32 1.0, %v4161_v14  ;;  %v4163_v61 = vpop.eup %4162 }
 0x2a6   :  { %v4165_v27 = vpop.eup %4164  ;;  %v1244_v11 = vadd.f32 1.0, %v4163_v61 }
 0x2a7   :  { %4168 = vrcp.f32 %v1231_v31  ;;  %v1245_v7 = vadd.f32 1.0, %v4165_v27 }
 0x2a8   :  { %4170 = vrcp.f32 %v1244_v11 }
 0x2a9   :  { %4172 = vrcp.f32 %v1245_v7 }
 0x2af   :  { %v4167_v8 = vpop.eup %4166 }
 0x2b0   :  { %v1252_v10 = vmul.f32 %v4167_v8, %v1250_v18 }
 0x2b1   :  { %v4169_v4 = vpop.eup %4168 }
 0x2b2   :  { %v1254_v19 = vadd.f32 %v1252_v10, %v4892_v35  ;;  %v1253_v51 = vmul.f32 %v4169_v4, %v1251_v12  ;;  %v4171_v36 = vpop.eup %4170 }
 0x2b3   :  { %v4173_v23 = vpop.eup %4172  ;;  %v1258_v15 = vsub.f32 1.0, %v4171_v36  ;;  %v1262_v31 = vmul.f32 %v4171_v36, %v5008_v0 }
 0x2b4   :  { %4174 = vtanh.f32 %v1254_v19  ;;  %v1255_v17 = vadd.f32 %v1253_v51, %v4897_v41  ;;  %v1259_v9 = vsub.f32 1.0, %v4173_v23  ;;  %v1263_v28 = vmul.f32 %v4173_v23, %v5010_v49 }
 0x2b6   :  { %4176 = vtanh.f32 %v1255_v17 }
 0x2be   :  { %v4175_v20 = vpop.eup %4174 }
 0x2bf   :  { %v1260_v14 = vmul.f32 %v4175_v20, %v1258_v15 }
 0x2c0   :  { %v4177_v61 = vpop.eup %4176 }
 0x2c1   :  { %v1261_v27 = vmul.f32 %v4177_v61, %v1259_v9  ;;  %v5061_v11 = vadd.f32 %v1262_v31, %v1260_v14 }
 0x2c3   :  { %v5063_v35 = vadd.f32 %v1263_v28, %v1261_v27  ;;  %1267 = vst [vmem:[#allocation10 + $0x10] sm:$0xff] %v5061_v11 }
 0x2c5   :  { %1268 = vst [vmem:[#allocation10 + $0x18] sm:$0xff] %v5063_v35  ;;  %v1276_v41 = vpack.c.bf16 %v5063_v35, %v5061_v11 }
 0x2c7   :  { %1310 = vmatmul.mubr.bf16.vlgmr.msra.gmra.mrb[8].mxu0 %v1276_v41  ;;  %3637 = vmatmul.mubr.bf16.vlgmr.msra.gmra.mrb[56].mxu1 %v1276_v41 }
 0x2c8   :  { %1417 = vmatpush1.bf16.msra.mxu0 %v4696_v21  ;;  %3641 = vmatpush3.bf16.msra.mxu1 %v4763_v50  ;;  %v5102_v21 = vld [vmem:[#allocation9 + $0x4] ss:$12 sps:$4 sm:$0xff]  }
 0x2c9   :  { %1418 = vmatprep.subr.bf16.mxu0 %v4699_v22  ;;  %3642 = vmatprep.subr.bf16.mxu1 %v5937_v43 }
 0x2ca   :  { %1448 = vmatprep.mubr.bf16.mxu0 %v5938_v37  ;;  %3656 = vmatprep.mubr.msk.bf16.mxu1 %vm4611_vm0, %v5937_v43 }
 0x2cc   :  { %1419 = vmatpush1.bf16.msra.mxu0 %v4705_v24  ;;  %3643 = vmatpush3.bf16.msra.mxu1 %v4771_v52 }
 0x2cd   :  { %1420 = vmatprep.subr.bf16.mxu0 %v4710_v26  ;;  %3644 = vmatprep.subr.bf16.mxu1 %v5937_v43 }
 0x2d0   :  { %1421 = vmatpush1.bf16.msra.mxu0 %v4716_v29  ;;  %3645 = vmatpush3.bf16.msra.mxu1 %v4775_v54 }
 0x2d1   :  { %1422 = vmatprep.subr.bf16.mxu0 %v4719_v30  ;;  %3646 = vmatprep.subr.bf16.mxu1 %v5937_v43 }
 0x2d4   :  { %1423 = vmatpush1.bf16.msra.mxu0 %v4725_v32  ;;  %3647 = vmatpush3.bf16.msra.mxu1 %v4780_v55 }
 0x2d5   :  { %1424 = vmatprep.subr.bf16.mxu0 %v4728_v34  ;;  %3648 = vmatprep.subr.bf16.mxu1 %v5937_v43 }
 0x2d8   :  { %1425 = vmatpush1.bf16.msra.mxu0 %v4735_v38  ;;  %3649 = vmatpush3.bf16.msra.mxu1 %v4784_v57 }
 0x2d9   :  { %1426 = vmatprep.subr.bf16.mxu0 %v4737_v39  ;;  %3650 = vmatprep.subr.bf16.mxu1 %v5937_v43 }
 0x2dc   :  { %1427 = vmatpush1.bf16.msra.mxu0 %v4743_v40  ;;  %3651 = vmatpush3.bf16.msra.mxu1 %v4789_v58 }
 0x2dd   :  { %1428 = vmatprep.subr.bf16.mxu0 %v4746_v42  ;;  %3652 = vmatprep.subr.bf16.mxu1 %v5937_v43 }
 0x2e0   :  { %1429 = vmatpush1.bf16.msra.mxu0 %v4751_v45  ;;  %3653 = vmatpush3.bf16.msra.mxu1 %v4793_v60 }
 0x2e1   :  { %1430 = vmatprep.subr.bf16.mxu0 %v4754_v47  ;;  %3654 = vmatprep.subr.bf16.mxu1 %v5937_v43 }
 0x2e4   :  { %1431 = vmatpush1.bf16.msra.mxu0 %v4760_v48  ;;  %3655 = vmatpush3.bf16.msra.mxu1 %v4798_v62 }
 0x2e5   :  { %1555 = vmatprep.subr.bf16.mxu0 %v5102_v21  ;;  %3660 = vmatprep.subr.bf16.mxu1 %v5937_v43 }
 0x39a   :  { %v1311_v22 = vpop.f32.mrb[8].mxu0  ;;  %v1354_v24 = vpop.f32.mrb[56].mxu1 }
 0x39b   :  { %v3924_v26 = vadd.f32 %v1311_v22, %v4988_v13  ;;  %v1313_v29 = vpop.f32.mrb[9].mxu0  ;;  %v3638_v30 = vpop.f32.mrb[57].mxu1  ;;  %v1389_v14 = vadd.f32 %v5000_v5, %v1354_v24 }
 0x39c   :  { %v1315_v32 = vpop.f32.mrb[10].mxu0  ;;  %v1357_v34 = vpop.f32.mrb[58].mxu1  ;;  %v3925_v8 = vadd.f32 %v1313_v29, %v4992_v6 }
 0x39d   :  { %v3308_v49 = vmul.f32 -1.442695, %v3924_v26  ;;  %v3926_v0 = vadd.f32 %v1315_v32, %v4988_v13  ;;  %v1317_v18 = vpop.f32.mrb[11].mxu0  ;;  %v3639_v7 = vpop.f32.mrb[59].mxu1  ;;  %v1390_v28 = vadd.f32 %v5000_v5, %v1357_v34 }
 0x39e   :  { %v3927_v12 = vadd.f32 %v1317_v18, %v4992_v6  ;;  %v3310_v4 = vmul.f32 -1.442695, %v3925_v8 }
 0x39f   :  { %4178 = vpow2.f32 %v3308_v49  ;;  %v3309_v10 = vmul.f32 -1.442695, %v3926_v0 }
 0x3a0   :  { %v3311_v19 = vmul.f32 -1.442695, %v3927_v12 }
 0x3a1   :  { %4180 = vpow2.f32 %v3309_v10 }
 0x3a2   :  { %4182 = vpow2.f32 %v3310_v4  ;;  %v5124_v4 = vld [vmem:[#allocation9] ss:$12 sps:$4 sm:$0xff]  }
 0x3a3   :  { %4184 = vpow2.f32 %v3311_v19  ;;  %v5139_v19 = vld [vmem:[#allocation9 + $0x34] ss:$12 sps:$4 sm:$0xff]  }
 0x3a9   :  { %v4179_v51 = vpop.eup %4178 }
 0x3aa   :  { %v1369_v17 = vadd.f32 1.0, %v4179_v51  ;;  %v5147_v51 = vld [vmem:[#allocation9 + $0x4c] ss:$12 sps:$4 sm:$0xff]  }
 0x3ab   :  { %v4181_v36 = vpop.eup %4180 }
 0x3ac   :  { %4186 = vrcp.f32 %v1369_v17  ;;  %v1370_v23 = vadd.f32 1.0, %v4181_v36  ;;  %v4183_v15 = vpop.eup %4182  ;;  %v5151_v17 = vld [vmem:[#allocation9 + $0x48] ss:$12 sps:$4 sm:$0xff]  }
 0x3ad   :  { %v4185_v20 = vpop.eup %4184  ;;  %v1383_v9 = vadd.f32 1.0, %v4183_v15 }
 0x3ae   :  { %4188 = vrcp.f32 %v1370_v23  ;;  %v1384_v31 = vadd.f32 1.0, %v4185_v20 }
 0x3af   :  { %4190 = vrcp.f32 %v1383_v9 }
 0x3b0   :  { %4192 = vrcp.f32 %v1384_v31 }
 0x3b6   :  { %v4187_v61 = vpop.eup %4186 }
 0x3b7   :  { %v1391_v27 = vmul.f32 %v4187_v61, %v1389_v14 }
 0x3b8   :  { %v4189_v41 = vpop.eup %4188 }
 0x3b9   :  { %v1393_v22 = vadd.f32 %v1391_v27, %v4905_v53  ;;  %v1392_v26 = vmul.f32 %v4189_v41, %v1390_v28  ;;  %v4191_v30 = vpop.eup %4190 }
 0x3ba   :  { %v4193_v32 = vpop.eup %4192  ;;  %v1397_v49 = vsub.f32 1.0, %v4191_v30  ;;  %v1401_v7 = vmul.f32 %v4191_v30, %v5061_v11  ;;  %v5128_v11 = vld [vmem:[#allocation9 + $0x1c] ss:$12 sps:$4 sm:$0xff]  }
 0x3bb   :  { %4194 = vtanh.f32 %v1393_v22  ;;  %v1394_v29 = vadd.f32 %v1392_v26, %v4911_v63  ;;  %v1398_v24 = vsub.f32 1.0, %v4193_v32  ;;  %v1402_v34 = vmul.f32 %v4193_v32, %v5063_v35  ;;  %v5135_v35 = vld [vmem:[#allocation9 + $0x18] ss:$12 sps:$4 sm:$0xff]  }
 0x3bd   :  { %4196 = vtanh.f32 %v1394_v29 }
 0x3c5   :  { %v4195_v0 = vpop.eup %4194 }
 0x3c6   :  { %v1399_v18 = vmul.f32 %v4195_v0, %v1397_v49 }
 0x3c7   :  { %v4197_v8 = vpop.eup %4196 }
 0x3c8   :  { %v1400_v10 = vmul.f32 %v4197_v8, %v1398_v24  ;;  %v5116_v12 = vadd.f32 %v1401_v7, %v1399_v18 }
 0x3ca   :  { %v5118_v53 = vadd.f32 %v1402_v34, %v1400_v10  ;;  %1406 = vst [vmem:[#allocation10 + $0x20] sm:$0xff] %v5116_v12 }
 0x3cc   :  { %1407 = vst [vmem:[#allocation10 + $0x28] sm:$0xff] %v5118_v53  ;;  %v1415_v63 = vpack.c.bf16 %v5118_v53, %v5116_v12 }
 0x3ce   :  { %1449 = vmatmul.mubr.bf16.vlgmr.msra.gmra.mrb[12].mxu0 %v1415_v63  ;;  %3657 = vmatmul.mubr.bf16.vlgmr.msra.gmra.mrb[60].mxu1 %v1415_v63 }
 0x3cf   :  { %1556 = vmatpush1.bf16.msra.mxu0 %v5124_v4  ;;  %3661 = vmatpush3.bf16.msra.mxu1 %v4763_v50  ;;  %v5143_v50 = vld [vmem:[#allocation9 + $0x30] ss:$12 sps:$4 sm:$0xff]  }
 0x3d0   :  { %1557 = vmatprep.subr.bf16.mxu0 %v5128_v11  ;;  %3662 = vmatprep.subr.bf16.mxu1 %v5937_v43 }
 0x3d1   :  { %1587 = vmatprep.mubr.bf16.mxu0 %v5938_v37  ;;  %3676 = vmatprep.mubr.msk.bf16.mxu1 %vm4611_vm0, %v5937_v43 }
 0x3d3   :  { %1558 = vmatpush1.bf16.msra.mxu0 %v5135_v35  ;;  %3663 = vmatpush3.bf16.msra.mxu1 %v4771_v52  ;;  %v5155_v52 = vld [vmem:[#allocation9 + $0x64] ss:$12 sps:$4 sm:$0xff]  }
 0x3d4   :  { %1559 = vmatprep.subr.bf16.mxu0 %v5139_v19  ;;  %3664 = vmatprep.subr.bf16.mxu1 %v5937_v43 }
 0x3d7   :  { %1560 = vmatpush1.bf16.msra.mxu0 %v5143_v50  ;;  %3665 = vmatpush3.bf16.msra.mxu1 %v4775_v54 }
 0x3d8   :  { %1561 = vmatprep.subr.bf16.mxu0 %v5147_v51  ;;  %3666 = vmatprep.subr.bf16.mxu1 %v5937_v43 }
 0x3db   :  { %1562 = vmatpush1.bf16.msra.mxu0 %v5151_v17  ;;  %3667 = vmatpush3.bf16.msra.mxu1 %v4780_v55 }
 0x3dc   :  { %1563 = vmatprep.subr.bf16.mxu0 %v5155_v52  ;;  %3668 = vmatprep.subr.bf16.mxu1 %v5937_v43 }
 0x3df   :  { %1564 = vmatpush1.bf16.msra.mxu0 %v4735_v38  ;;  %3669 = vmatpush3.bf16.msra.mxu1 %v4784_v57 }
 0x3e0   :  { %1565 = vmatprep.subr.bf16.mxu0 %v4737_v39  ;;  %3670 = vmatprep.subr.bf16.mxu1 %v5937_v43 }
 0x3e3   :  { %1566 = vmatpush1.bf16.msra.mxu0 %v4743_v40  ;;  %3671 = vmatpush3.bf16.msra.mxu1 %v4789_v58 }
 0x3e4   :  { %1567 = vmatprep.subr.bf16.mxu0 %v4746_v42  ;;  %3672 = vmatprep.subr.bf16.mxu1 %v5937_v43 }
 0x3e7   :  { %1568 = vmatpush1.bf16.msra.mxu0 %v4751_v45  ;;  %3673 = vmatpush3.bf16.msra.mxu1 %v4793_v60 }
 0x3e8   :  { %1569 = vmatprep.subr.bf16.mxu0 %v4754_v47  ;;  %3674 = vmatprep.subr.bf16.mxu1 %v5937_v43 }
 0x3eb   :  { %1570 = vmatpush1.bf16.msra.mxu0 %v4760_v48  ;;  %3675 = vmatpush3.bf16.msra.mxu1 %v4798_v62 }
 0x3ec   :  { %1694 = vmatprep.subr.bf16.mxu0 %v5102_v21  ;;  %3680 = vmatprep.subr.bf16.mxu1 %v5937_v43 }
 0x4a1   :  { %v1450_v38 = vpop.f32.mrb[12].mxu0  ;;  %v1493_v39 = vpop.f32.mrb[60].mxu1 }
 0x4a2   :  { %v3928_v40 = vadd.f32 %v1450_v38, %v4988_v13  ;;  %v1452_v42 = vpop.f32.mrb[13].mxu0  ;;  %v3658_v45 = vpop.f32.mrb[61].mxu1  ;;  %v1528_v41 = vadd.f32 %v5000_v5, %v1493_v39 }
 0x4a3   :  { %v1454_v54 = vpop.f32.mrb[14].mxu0  ;;  %v1496_v55 = vpop.f32.mrb[62].mxu1  ;;  %v3929_v48 = vadd.f32 %v1452_v42, %v4992_v6 }
 0x4a4   :  { %v3312_v57 = vmul.f32 -1.442695, %v3928_v40  ;;  %v3930_v47 = vadd.f32 %v1454_v54, %v4988_v13  ;;  %v1456_v58 = vpop.f32.mrb[15].mxu0  ;;  %v3659_v60 = vpop.f32.mrb[63].mxu1  ;;  %v1529_v30 = vadd.f32 %v5000_v5, %v1496_v55  ;;  %v5209_v54 = vld [vmem:[#allocation9 + $0x38] ss:$12 sps:$4 sm:$0xff]  }
 0x4a5   :  { %v3931_v36 = vadd.f32 %v1456_v58, %v4992_v6  ;;  %v3314_v23 = vmul.f32 -1.442695, %v3929_v48  ;;  %v5215_v55 = vld [vmem:[#allocation9 + $0x50] ss:$12 sps:$4 sm:$0xff]   ;;  %v5230_v60 = vld [vmem:[#allocation9 + $0x78] ss:$12 sps:$4 sm:$0xff]  }
 0x4a6   :  { %4198 = vpow2.f32 %v3312_v57  ;;  %v3313_v62 = vmul.f32 -1.442695, %v3930_v47  ;;  %v5220_v57 = vld [vmem:[#allocation9 + $0x60] ss:$12 sps:$4 sm:$0xff]   ;;  %v5223_v47 = vld [vmem:[#allocation9 + $0x68] ss:$12 sps:$4 sm:$0xff]  }
 0x4a7   :  { %v3315_v15 = vmul.f32 -1.442695, %v3931_v36  ;;  %v5226_v58 = vld [vmem:[#allocation9 + $0x7c] ss:$12 sps:$4 sm:$0xff]   ;;  %v5233_v48 = vld [vmem:[#allocation9 + $0x80] ss:$12 sps:$4 sm:$0xff]  }
 0x4a8   :  { %4200 = vpow2.f32 %v3313_v62  ;;  %v5236_v62 = vld [vmem:[#allocation9 + $0x94] ss:$12 sps:$4 sm:$0xff]   ;;  %v5240_v36 = vld [vmem:[#allocation9 + $0x90] ss:$12 sps:$4 sm:$0xff]  }
 0x4a9   :  { %4202 = vpow2.f32 %v3314_v23  ;;  %v5243_v23 = vld [vmem:[#allocation9 + $0x98] ss:$12 sps:$4 sm:$0xff]  }
 0x4aa   :  { %4204 = vpow2.f32 %v3315_v15  ;;  %v5246_v15 = vld [vmem:[#allocation9 + $0xac] ss:$12 sps:$4 sm:$0xff]  }
 0x4b0   :  { %v4199_v20 = vpop.eup %4198 }
 0x4b1   :  { %v1508_v9 = vadd.f32 1.0, %v4199_v20  ;;  %v5250_v20 = vld [vmem:[#allocation9 + $0xa8] ss:$12 sps:$4 sm:$0xff]  }
 0x4b2   :  { %v4201_v14 = vpop.eup %4200 }
 0x4b3   :  { %4206 = vrcp.f32 %v1508_v9  ;;  %v1509_v31 = vadd.f32 1.0, %v4201_v14  ;;  %v4203_v61 = vpop.eup %4202  ;;  %v5253_v9 = vld [vmem:[#allocation9 + $0xb0] ss:$12 sps:$4 sm:$0xff]  }
 0x4b4   :  { %v4205_v27 = vpop.eup %4204  ;;  %v1522_v28 = vadd.f32 1.0, %v4203_v61 }
 0x4b5   :  { %4208 = vrcp.f32 %v1509_v31  ;;  %v1523_v22 = vadd.f32 1.0, %v4205_v27 }
 0x4b6   :  { %4210 = vrcp.f32 %v1522_v28 }
 0x4b7   :  { %4212 = vrcp.f32 %v1523_v22 }
 0x4bd   :  { %v4207_v26 = vpop.eup %4206 }
 0x4be   :  { %v1530_v29 = vmul.f32 %v4207_v26, %v1528_v41 }
 0x4bf   :  { %v4209_v32 = vpop.eup %4208 }
 0x4c0   :  { %v1532_v49 = vadd.f32 %v1530_v29, %v4902_v46  ;;  %v1531_v0 = vmul.f32 %v4209_v32, %v1529_v30  ;;  %v4211_v18 = vpop.eup %4210 }
 0x4c1   :  { %v4213_v7 = vpop.eup %4212  ;;  %v1536_v8 = vsub.f32 1.0, %v4211_v18  ;;  %v1540_v38 = vmul.f32 %v4211_v18, %v5116_v12  ;;  %v5194_v12 = vld [vmem:[#allocation9 + $0x8] ss:$12 sps:$4 sm:$0xff]  }
 0x4c2   :  { %4214 = vtanh.f32 %v1532_v49  ;;  %v1533_v24 = vadd.f32 %v1531_v0, %v4908_v59  ;;  %v1537_v34 = vsub.f32 1.0, %v4213_v7  ;;  %v1541_v42 = vmul.f32 %v4213_v7, %v5118_v53  ;;  %v5203_v53 = vld [vmem:[#allocation9 + $0x20] ss:$12 sps:$4 sm:$0xff]  }
 0x4c4   :  { %4216 = vtanh.f32 %v1533_v24 }
 0x4cc   :  { %v4215_v10 = vpop.eup %4214 }
 0x4cd   :  { %v1538_v63 = vmul.f32 %v4215_v10, %v1536_v8 }
 0x4ce   :  { %v4217_v39 = vpop.eup %4216 }
 0x4cf   :  { %v1539_v40 = vmul.f32 %v4217_v39, %v1537_v34  ;;  %v5185_v45 = vadd.f32 %v1540_v38, %v1538_v63 }
 0x4d1   :  { %v5187_v46 = vadd.f32 %v1541_v42, %v1539_v40  ;;  %1545 = vst [vmem:[#allocation10 + $0x30] sm:$0xff] %v5185_v45 }
 0x4d3   :  { %1546 = vst [vmem:[#allocation10 + $0x38] sm:$0xff] %v5187_v46  ;;  %v1554_v59 = vpack.c.bf16 %v5187_v46, %v5185_v45 }
 0x4d5   :  { %1588 = vmatmul.mubr.bf16.vlgmr.msra.gmra.mrb[16].mxu0 %v1554_v59  ;;  %3677 = vmatmul.mubr.bf16.vlgmr.msra.gmra.mrb[64].mxu1 %v1554_v59 }
 0x4d6   :  { %1695 = vmatpush1.bf16.msra.mxu0 %v5124_v4  ;;  %3681 = vmatpush3.bf16.msra.mxu1 %v5194_v12 }
 0x4d7   :  { %1696 = vmatprep.subr.bf16.mxu0 %v5128_v11  ;;  %3682 = vmatprep.subr.bf16.mxu1 %v5937_v43 }
 0x4d8   :  { %1726 = vmatprep.mubr.bf16.mxu0 %v5938_v37  ;;  %3696 = vmatprep.mubr.msk.bf16.mxu1 %vm4611_vm0, %v5937_v43 }
 0x4da   :  { %1697 = vmatpush1.bf16.msra.mxu0 %v5135_v35  ;;  %3683 = vmatpush3.bf16.msra.mxu1 %v5203_v53 }
 0x4db   :  { %1698 = vmatprep.subr.bf16.mxu0 %v5139_v19  ;;  %3684 = vmatprep.subr.bf16.mxu1 %v5937_v43 }
 0x4de   :  { %1699 = vmatpush1.bf16.msra.mxu0 %v5143_v50  ;;  %3685 = vmatpush3.bf16.msra.mxu1 %v5209_v54 }
 0x4df   :  { %1700 = vmatprep.subr.bf16.mxu0 %v5147_v51  ;;  %3686 = vmatprep.subr.bf16.mxu1 %v5937_v43 }
 0x4e2   :  { %1701 = vmatpush1.bf16.msra.mxu0 %v5151_v17  ;;  %3687 = vmatpush3.bf16.msra.mxu1 %v5215_v55 }
 0x4e3   :  { %1702 = vmatprep.subr.bf16.mxu0 %v5155_v52  ;;  %3688 = vmatprep.subr.bf16.mxu1 %v5937_v43 }
 0x4e6   :  { %1703 = vmatpush1.bf16.msra.mxu0 %v5220_v57  ;;  %3689 = vmatpush3.bf16.msra.mxu1 %v5223_v47 }
 0x4e7   :  { %1704 = vmatprep.subr.bf16.mxu0 %v5226_v58  ;;  %3690 = vmatprep.subr.bf16.mxu1 %v5937_v43 }
 0x4ea   :  { %1705 = vmatpush1.bf16.msra.mxu0 %v5230_v60  ;;  %3691 = vmatpush3.bf16.msra.mxu1 %v5233_v48 }
 0x4eb   :  { %1706 = vmatprep.subr.bf16.mxu0 %v5236_v62  ;;  %3692 = vmatprep.subr.bf16.mxu1 %v5937_v43 }
 0x4ee   :  { %1707 = vmatpush1.bf16.msra.mxu0 %v5240_v36  ;;  %3693 = vmatpush3.bf16.msra.mxu1 %v5243_v23 }
 0x4ef   :  { %1708 = vmatprep.subr.bf16.mxu0 %v5246_v15  ;;  %3694 = vmatprep.subr.bf16.mxu1 %v5937_v43 }
 0x4f2   :  { %1709 = vmatpush1.bf16.msra.mxu0 %v5250_v20  ;;  %3695 = vmatpush3.bf16.msra.mxu1 %v5253_v9 }
 0x4f3   :  { %1833 = vmatprep.subr.bf16.mxu0 %v5102_v21  ;;  %3700 = vmatprep.subr.bf16.mxu1 %v5937_v43 }
 0x5a8   :  { %v1589_v14 = vpop.f32.mrb[16].mxu0  ;;  %v1632_v31 = vpop.f32.mrb[64].mxu1 }
 0x5a9   :  { %v3932_v61 = vadd.f32 %v1589_v14, %v4988_v13  ;;  %v1591_v27 = vpop.f32.mrb[17].mxu0  ;;  %v3678_v28 = vpop.f32.mrb[65].mxu1  ;;  %v1667_v42 = vadd.f32 %v5000_v5, %v1632_v31 }
 0x5aa   :  { %v1593_v41 = vpop.f32.mrb[18].mxu0  ;;  %v1635_v22 = vpop.f32.mrb[66].mxu1  ;;  %v3933_v49 = vadd.f32 %v1591_v27, %v4992_v6 }
 0x5ab   :  { %v3316_v26 = vmul.f32 -1.442695, %v3932_v61  ;;  %v3934_v29 = vadd.f32 %v1593_v41, %v4988_v13  ;;  %v1595_v30 = vpop.f32.mrb[19].mxu0  ;;  %v3679_v32 = vpop.f32.mrb[67].mxu1  ;;  %v1668_v27 = vadd.f32 %v5000_v5, %v1635_v22 }
 0x5ac   :  { %v3935_v24 = vadd.f32 %v1595_v30, %v4992_v6  ;;  %v3318_v18 = vmul.f32 -1.442695, %v3933_v49 }
 0x5ad   :  { %4218 = vpow2.f32 %v3316_v26  ;;  %v3317_v0 = vmul.f32 -1.442695, %v3934_v29 }
 0x5ae   :  { %v3319_v7 = vmul.f32 -1.442695, %v3935_v24 }
 0x5af   :  { %4220 = vpow2.f32 %v3317_v0 }
 0x5b0   :  { %4222 = vpow2.f32 %v3318_v18 }
 0x5b1   :  { %4224 = vpow2.f32 %v3319_v7 }
 0x5b7   :  { %v4219_v8 = vpop.eup %4218 }
 0x5b8   :  { %v1647_v10 = vadd.f32 1.0, %v4219_v8 }
 0x5b9   :  { %v4221_v34 = vpop.eup %4220 }
 0x5ba   :  { %4226 = vrcp.f32 %v1647_v10  ;;  %v1648_v63 = vadd.f32 1.0, %v4221_v34  ;;  %v4223_v38 = vpop.eup %4222 }
 0x5bb   :  { %v4225_v39 = vpop.eup %4224  ;;  %v1661_v40 = vadd.f32 1.0, %v4223_v38 }
 0x5bc   :  { %4228 = vrcp.f32 %v1648_v63  ;;  %v1662_v59 = vadd.f32 1.0, %v4225_v39 }
 0x5bd   :  { %4230 = vrcp.f32 %v1661_v40 }
 0x5be   :  { %4232 = vrcp.f32 %v1662_v59 }
 0x5c4   :  { %v4227_v14 = vpop.eup %4226 }
 0x5c5   :  { %v1669_v61 = vmul.f32 %v4227_v14, %v1667_v42 }
 0x5c6   :  { %v4229_v28 = vpop.eup %4228 }
 0x5c7   :  { %v1671_v41 = vadd.f32 %v1669_v61, %v4917_v16  ;;  %v1670_v26 = vmul.f32 %v4229_v28, %v1668_v27  ;;  %v4231_v30 = vpop.eup %4230 }
 0x5c8   :  { %v4233_v32 = vpop.eup %4232  ;;  %v1675_v49 = vsub.f32 1.0, %v4231_v30  ;;  %v1679_v18 = vmul.f32 %v4231_v30, %v5185_v45 }
 0x5c9   :  { %4234 = vtanh.f32 %v1671_v41  ;;  %v1672_v29 = vadd.f32 %v1670_v26, %v4923_v44  ;;  %v1676_v31 = vsub.f32 1.0, %v4233_v32  ;;  %v1680_v22 = vmul.f32 %v4233_v32, %v5187_v46 }
 0x5cb   :  { %4236 = vtanh.f32 %v1672_v29 }
 0x5d3   :  { %v4235_v0 = vpop.eup %4234 }
 0x5d4   :  { %v1677_v24 = vmul.f32 %v4235_v0, %v1675_v49 }
 0x5d5   :  { %v4237_v7 = vpop.eup %4236 }
 0x5d6   :  { %v1678_v8 = vmul.f32 %v4237_v7, %v1676_v31  ;;  %v5268_v10 = vadd.f32 %v1679_v18, %v1677_v24 }
 0x5d8   :  { %v5270_v16 = vadd.f32 %v1680_v22, %v1678_v8  ;;  %1684 = vst [vmem:[#allocation10 + $0x40] sm:$0xff] %v5268_v10 }
 0x5da   :  { %1685 = vst [vmem:[#allocation10 + $0x48] sm:$0xff] %v5270_v16  ;;  %v1693_v44 = vpack.c.bf16 %v5270_v16, %v5268_v10 }
 0x5dc   :  { %1727 = vmatmul.mubr.bf16.vlgmr.msra.gmra.mrb[20].mxu0 %v1693_v44  ;;  %3697 = vmatmul.mubr.bf16.vlgmr.msra.gmra.mrb[68].mxu1 %v1693_v44 }
 0x5dd   :  { %1834 = vmatpush1.bf16.msra.mxu0 %v5124_v4  ;;  %3701 = vmatpush3.bf16.msra.mxu1 %v5194_v12 }
 0x5de   :  { %1835 = vmatprep.subr.bf16.mxu0 %v5128_v11  ;;  %3702 = vmatprep.subr.bf16.mxu1 %v5937_v43 }
 0x5df   :  { %1865 = vmatprep.mubr.bf16.mxu0 %v5938_v37  ;;  %3716 = vmatprep.mubr.msk.bf16.mxu1 %vm4611_vm0, %v5937_v43 }
 0x5e1   :  { %1836 = vmatpush1.bf16.msra.mxu0 %v5135_v35  ;;  %3703 = vmatpush3.bf16.msra.mxu1 %v5203_v53 }
 0x5e2   :  { %1837 = vmatprep.subr.bf16.mxu0 %v5139_v19  ;;  %3704 = vmatprep.subr.bf16.mxu1 %v5937_v43 }
 0x5e5   :  { %1838 = vmatpush1.bf16.msra.mxu0 %v5143_v50  ;;  %3705 = vmatpush3.bf16.msra.mxu1 %v5209_v54 }
 0x5e6   :  { %1839 = vmatprep.subr.bf16.mxu0 %v5147_v51  ;;  %3706 = vmatprep.subr.bf16.mxu1 %v5937_v43 }
 0x5e9   :  { %1840 = vmatpush1.bf16.msra.mxu0 %v5151_v17  ;;  %3707 = vmatpush3.bf16.msra.mxu1 %v5215_v55 }
 0x5ea   :  { %1841 = vmatprep.subr.bf16.mxu0 %v5155_v52  ;;  %3708 = vmatprep.subr.bf16.mxu1 %v5937_v43 }
 0x5ed   :  { %1842 = vmatpush1.bf16.msra.mxu0 %v5220_v57  ;;  %3709 = vmatpush3.bf16.msra.mxu1 %v5223_v47 }
 0x5ee   :  { %1843 = vmatprep.subr.bf16.mxu0 %v5226_v58  ;;  %3710 = vmatprep.subr.bf16.mxu1 %v5937_v43 }
 0x5f1   :  { %1844 = vmatpush1.bf16.msra.mxu0 %v5230_v60  ;;  %3711 = vmatpush3.bf16.msra.mxu1 %v5233_v48 }
 0x5f2   :  { %1845 = vmatprep.subr.bf16.mxu0 %v5236_v62  ;;  %3712 = vmatprep.subr.bf16.mxu1 %v5937_v43 }
 0x5f5   :  { %1846 = vmatpush1.bf16.msra.mxu0 %v5240_v36  ;;  %3713 = vmatpush3.bf16.msra.mxu1 %v5243_v23 }
 0x5f6   :  { %1847 = vmatprep.subr.bf16.mxu0 %v5246_v15  ;;  %3714 = vmatprep.subr.bf16.mxu1 %v5937_v43 }
 0x5f9   :  { %1848 = vmatpush1.bf16.msra.mxu0 %v5250_v20  ;;  %3715 = vmatpush3.bf16.msra.mxu1 %v5253_v9 }
 0x5fa   :  { %1972 = vmatprep.subr.bf16.mxu0 %v5102_v21  ;;  %3720 = vmatprep.subr.bf16.mxu1 %v5937_v43 }
 0x6af   :  { %v1728_v45 = vpop.f32.mrb[20].mxu0  ;;  %v1771_v46 = vpop.f32.mrb[68].mxu1 }
 0x6b0   :  { %v3936_v34 = vadd.f32 %v1728_v45, %v4988_v13  ;;  %v1730_v63 = vpop.f32.mrb[21].mxu0  ;;  %v3698_v38 = vpop.f32.mrb[69].mxu1  ;;  %v1806_v7 = vadd.f32 %v5000_v5, %v1771_v46 }
 0x6b1   :  { %v1732_v39 = vpop.f32.mrb[22].mxu0  ;;  %v1774_v40 = vpop.f32.mrb[70].mxu1  ;;  %v3937_v27 = vadd.f32 %v1730_v63, %v4992_v6 }
 0x6b2   :  { %v3320_v42 = vmul.f32 -1.442695, %v3936_v34  ;;  %v3938_v59 = vadd.f32 %v1732_v39, %v4988_v13  ;;  %v1734_v14 = vpop.f32.mrb[23].mxu0  ;;  %v3699_v61 = vpop.f32.mrb[71].mxu1  ;;  %v1807_v45 = vadd.f32 %v5000_v5, %v1774_v40 }
 0x6b3   :  { %v3939_v41 = vadd.f32 %v1734_v14, %v4992_v6  ;;  %v3322_v26 = vmul.f32 -1.442695, %v3937_v27 }
 0x6b4   :  { %4238 = vpow2.f32 %v3320_v42  ;;  %v3321_v28 = vmul.f32 -1.442695, %v3938_v59 }
 0x6b5   :  { %v3323_v29 = vmul.f32 -1.442695, %v3939_v41 }
 0x6b6   :  { %4240 = vpow2.f32 %v3321_v28 }
 0x6b7   :  { %4242 = vpow2.f32 %v3322_v26 }
 0x6b8   :  { %4244 = vpow2.f32 %v3323_v29 }
 0x6be   :  { %v4239_v30 = vpop.eup %4238 }
 0x6bf   :  { %v1786_v32 = vadd.f32 1.0, %v4239_v30 }
 0x6c0   :  { %v4241_v49 = vpop.eup %4240 }
 0x6c1   :  { %4246 = vrcp.f32 %v1786_v32  ;;  %v1787_v0 = vadd.f32 1.0, %v4241_v49  ;;  %v4243_v31 = vpop.eup %4242 }
 0x6c2   :  { %v4245_v24 = vpop.eup %4244  ;;  %v1800_v18 = vadd.f32 1.0, %v4243_v31 }
 0x6c3   :  { %4248 = vrcp.f32 %v1787_v0  ;;  %v1801_v8 = vadd.f32 1.0, %v4245_v24 }
 0x6c4   :  { %4250 = vrcp.f32 %v1800_v18 }
 0x6c5   :  { %4252 = vrcp.f32 %v1801_v8 }
 0x6cb   :  { %v4247_v22 = vpop.eup %4246 }
 0x6cc   :  { %v1808_v44 = vmul.f32 %v4247_v22, %v1806_v7 }
 0x6cd   :  { %v4249_v34 = vpop.eup %4248 }
 0x6ce   :  { %v1810_v63 = vadd.f32 %v1808_v44, %v4914_v2  ;;  %v1809_v38 = vmul.f32 %v4249_v34, %v1807_v45  ;;  %v4251_v42 = vpop.eup %4250 }
 0x6cf   :  { %v4253_v59 = vpop.eup %4252  ;;  %v1814_v14 = vsub.f32 1.0, %v4251_v42  ;;  %v1818_v28 = vmul.f32 %v4251_v42, %v5268_v10 }
 0x6d0   :  { %4254 = vtanh.f32 %v1810_v63  ;;  %v1811_v39 = vadd.f32 %v1809_v38, %v4920_v33  ;;  %v1815_v46 = vsub.f32 1.0, %v4253_v59  ;;  %v1819_v5 = vmul.f32 %v4253_v59, %v5270_v16 }
 0x6d2   :  { %4256 = vtanh.f32 %v1811_v39 }
 0x6da   :  { %v4255_v61 = vpop.eup %4254 }
 0x6db   :  { %v1816_v27 = vmul.f32 %v4255_v61, %v1814_v14 }
 0x6dc   :  { %v4257_v41 = vpop.eup %4256 }
 0x6dd   :  { %v1817_v26 = vmul.f32 %v4257_v41, %v1815_v46  ;;  %v5321_v40 = vadd.f32 %v1818_v28, %v1816_v27  ;;  %v5371_v46 = vld [vmem:[%s5899_s4] ss:$0 sm:$0xff] }
 0x6df   :  { %v5323_v2 = vadd.f32 %v1819_v5, %v1817_v26  ;;  %1823 = vst [vmem:[#allocation10 + $0x50] sm:$0xff] %v5321_v40 }
 0x6e1   :  { %1824 = vst [vmem:[#allocation10 + $0x58] sm:$0xff] %v5323_v2  ;;  %v1832_v33 = vpack.c.bf16 %v5323_v2, %v5321_v40 }
 0x6e3   :  { %1866 = vmatmul.mubr.bf16.vlgmr.msra.gmra.mrb[24].mxu0 %v1832_v33  ;;  %3717 = vmatmul.mubr.bf16.vlgmr.msra.gmra.mrb[72].mxu1 %v1832_v33 }
 0x6e4   :  { %1973 = vmatpush1.bf16.msra.mxu0 %v5124_v4  ;;  %3721 = vmatpush3.bf16.msra.mxu1 %v5194_v12 }
 0x6e5   :  { %1974 = vmatprep.subr.bf16.mxu0 %v5128_v11  ;;  %3722 = vmatprep.subr.bf16.mxu1 %v5937_v43 }
 0x6e6   :  { %2004 = vmatprep.mubr.bf16.mxu0 %v5938_v37  ;;  %3736 = vmatprep.mubr.msk.bf16.mxu1 %vm4611_vm0, %v5937_v43 }
 0x6e8   :  { %1975 = vmatpush1.bf16.msra.mxu0 %v5135_v35  ;;  %3723 = vmatpush3.bf16.msra.mxu1 %v5203_v53 }
 0x6e9   :  { %1976 = vmatprep.subr.bf16.mxu0 %v5139_v19  ;;  %3724 = vmatprep.subr.bf16.mxu1 %v5937_v43 }
 0x6ec   :  { %1977 = vmatpush1.bf16.msra.mxu0 %v5143_v50  ;;  %3725 = vmatpush3.bf16.msra.mxu1 %v5209_v54 }
 0x6ed   :  { %1978 = vmatprep.subr.bf16.mxu0 %v5147_v51  ;;  %3726 = vmatprep.subr.bf16.mxu1 %v5937_v43 }
 0x6f0   :  { %1979 = vmatpush1.bf16.msra.mxu0 %v5151_v17  ;;  %3727 = vmatpush3.bf16.msra.mxu1 %v5215_v55 }
 0x6f1   :  { %1980 = vmatprep.subr.bf16.mxu0 %v5155_v52  ;;  %3728 = vmatprep.subr.bf16.mxu1 %v5937_v43 }
 0x6f4   :  { %1981 = vmatpush1.bf16.msra.mxu0 %v5220_v57  ;;  %3729 = vmatpush3.bf16.msra.mxu1 %v5223_v47 }
 0x6f5   :  { %1982 = vmatprep.subr.bf16.mxu0 %v5226_v58  ;;  %3730 = vmatprep.subr.bf16.mxu1 %v5937_v43 }
 0x6f8   :  { %1983 = vmatpush1.bf16.msra.mxu0 %v5230_v60  ;;  %3731 = vmatpush3.bf16.msra.mxu1 %v5233_v48 }
 0x6f9   :  { %1984 = vmatprep.subr.bf16.mxu0 %v5236_v62  ;;  %3732 = vmatprep.subr.bf16.mxu1 %v5937_v43 }
 0x6fc   :  { %1985 = vmatpush1.bf16.msra.mxu0 %v5240_v36  ;;  %3733 = vmatpush3.bf16.msra.mxu1 %v5243_v23 }
 0x6fd   :  { %1986 = vmatprep.subr.bf16.mxu0 %v5246_v15  ;;  %3734 = vmatprep.subr.bf16.mxu1 %v5937_v43 }
 0x700   :  { %1987 = vmatpush1.bf16.msra.mxu0 %v5250_v20  ;;  %3735 = vmatpush3.bf16.msra.mxu1 %v5253_v9 }
 0x701   :  { %2111 = vmatprep.subr.bf16.mxu0 %v5102_v21  ;;  %3740 = vmatprep.subr.bf16.mxu1 %v5937_v43 }
 0x7b6   :  { %v1867_v10 = vpop.f32.mrb[24].mxu0  ;;  %v1910_v16 = vpop.f32.mrb[72].mxu1 }
 0x7b7   :  { %v3940_v29 = vadd.f32 %v1867_v10, %v4988_v13  ;;  %v1869_v30 = vpop.f32.mrb[25].mxu0  ;;  %v3718_v32 = vpop.f32.mrb[73].mxu1  ;;  %v1945_v27 = vadd.f32 %v5371_v46, %v1910_v16 }
 0x7b8   :  { %v1871_v49 = vpop.f32.mrb[26].mxu0  ;;  %v1913_v0 = vpop.f32.mrb[74].mxu1  ;;  %v3941_v8 = vadd.f32 %v1869_v30, %v4992_v6 }
 0x7b9   :  { %v3324_v31 = vmul.f32 -1.442695, %v3940_v29  ;;  %v3942_v24 = vadd.f32 %v1871_v49, %v4988_v13  ;;  %v1873_v18 = vpop.f32.mrb[27].mxu0  ;;  %v3719_v7 = vpop.f32.mrb[75].mxu1  ;;  %v1946_v5 = vadd.f32 %v5371_v46, %v1913_v0 }
 0x7ba   :  { %v3943_v44 = vadd.f32 %v1873_v18, %v4992_v6  ;;  %v3326_v45 = vmul.f32 -1.442695, %v3941_v8 }
 0x7bb   :  { %4258 = vpow2.f32 %v3324_v31  ;;  %v3325_v22 = vmul.f32 -1.442695, %v3942_v24 }
 0x7bc   :  { %v3327_v34 = vmul.f32 -1.442695, %v3943_v44 }
 0x7bd   :  { %4260 = vpow2.f32 %v3325_v22 }
 0x7be   :  { %4262 = vpow2.f32 %v3326_v45 }
 0x7bf   :  { %4264 = vpow2.f32 %v3327_v34 }
 0x7c5   :  { %v4259_v63 = vpop.eup %4258 }
 0x7c6   :  { %v1925_v38 = vadd.f32 1.0, %v4259_v63 }
 0x7c7   :  { %v4261_v39 = vpop.eup %4260 }
 0x7c8   :  { %4266 = vrcp.f32 %v1925_v38  ;;  %v1926_v42 = vadd.f32 1.0, %v4261_v39  ;;  %v4263_v59 = vpop.eup %4262 }
 0x7c9   :  { %v4265_v14 = vpop.eup %4264  ;;  %v1939_v61 = vadd.f32 1.0, %v4263_v59 }
 0x7ca   :  { %4268 = vrcp.f32 %v1926_v42  ;;  %v1940_v28 = vadd.f32 1.0, %v4265_v14 }
 0x7cb   :  { %4270 = vrcp.f32 %v1939_v61 }
 0x7cc   :  { %4272 = vrcp.f32 %v1940_v28 }
 0x7d2   :  { %v4267_v41 = vpop.eup %4266 }
 0x7d3   :  { %v1947_v26 = vmul.f32 %v4267_v41, %v1945_v27 }
 0x7d4   :  { %v4269_v33 = vpop.eup %4268 }
 0x7d5   :  { %v1949_v10 = vadd.f32 %v1947_v26, %v4929_v1  ;;  %v1948_v29 = vmul.f32 %v4269_v33, %v1946_v5  ;;  %v4271_v32 = vpop.eup %4270 }
 0x7d6   :  { %v4273_v49 = vpop.eup %4272  ;;  %v1953_v31 = vsub.f32 1.0, %v4271_v32  ;;  %v1957_v7 = vmul.f32 %v4271_v32, %v5321_v40 }
 0x7d7   :  { %4274 = vtanh.f32 %v1949_v10  ;;  %v1950_v30 = vadd.f32 %v1948_v29, %v4935_v25  ;;  %v1954_v16 = vsub.f32 1.0, %v4273_v49  ;;  %v1958_v0 = vmul.f32 %v4273_v49, %v5323_v2 }
 0x7d9   :  { %4276 = vtanh.f32 %v1950_v30 }
 0x7e1   :  { %v4275_v24 = vpop.eup %4274 }
 0x7e2   :  { %v1955_v18 = vmul.f32 %v4275_v24, %v1953_v31 }
 0x7e3   :  { %v4277_v8 = vpop.eup %4276 }
 0x7e4   :  { %v1956_v22 = vmul.f32 %v4277_v8, %v1954_v16  ;;  %v5379_v44 = vadd.f32 %v1957_v7, %v1955_v18 }
 0x7e6   :  { %v5381_v1 = vadd.f32 %v1958_v0, %v1956_v22  ;;  %1962 = vst [vmem:[#allocation10 + $0x60] sm:$0xff] %v5379_v44 }
 0x7e8   :  { %1963 = vst [vmem:[#allocation10 + $0x68] sm:$0xff] %v5381_v1  ;;  %v1971_v25 = vpack.c.bf16 %v5381_v1, %v5379_v44 }
 0x7ea   :  { %2005 = vmatmul.mubr.bf16.vlgmr.msra.gmra.mrb[28].mxu0 %v1971_v25  ;;  %3737 = vmatmul.mubr.bf16.vlgmr.msra.gmra.mrb[76].mxu1 %v1971_v25 }
 0x7eb   :  { %2112 = vmatpush1.bf16.msra.mxu0 %v5124_v4  ;;  %3741 = vmatpush3.bf16.msra.mxu1 %v5194_v12 }
 0x7ec   :  { %2113 = vmatprep.subr.bf16.mxu0 %v5128_v11  ;;  %3742 = vmatprep.subr.bf16.mxu1 %v5937_v43 }
 0x7ed   :  { %2143 = vmatprep.mubr.bf16.mxu0 %v5938_v37  ;;  %3756 = vmatprep.mubr.msk.bf16.mxu1 %vm4611_vm0, %v5937_v43 }
 0x7ef   :  { %2114 = vmatpush1.bf16.msra.mxu0 %v5135_v35  ;;  %3743 = vmatpush3.bf16.msra.mxu1 %v5203_v53 }
 0x7f0   :  { %2115 = vmatprep.subr.bf16.mxu0 %v5139_v19  ;;  %3744 = vmatprep.subr.bf16.mxu1 %v5937_v43 }
 0x7f3   :  { %2116 = vmatpush1.bf16.msra.mxu0 %v5143_v50  ;;  %3745 = vmatpush3.bf16.msra.mxu1 %v5209_v54 }
 0x7f4   :  { %2117 = vmatprep.subr.bf16.mxu0 %v5147_v51  ;;  %3746 = vmatprep.subr.bf16.mxu1 %v5937_v43 }
 0x7f7   :  { %2118 = vmatpush1.bf16.msra.mxu0 %v5151_v17  ;;  %3747 = vmatpush3.bf16.msra.mxu1 %v5215_v55 }
 0x7f8   :  { %2119 = vmatprep.subr.bf16.mxu0 %v5155_v52  ;;  %3748 = vmatprep.subr.bf16.mxu1 %v5937_v43 }
 0x7fb   :  { %2120 = vmatpush1.bf16.msra.mxu0 %v5220_v57  ;;  %3749 = vmatpush3.bf16.msra.mxu1 %v5223_v47 }
 0x7fc   :  { %2121 = vmatprep.subr.bf16.mxu0 %v5226_v58  ;;  %3750 = vmatprep.subr.bf16.mxu1 %v5937_v43 }
 0x7ff   :  { %2122 = vmatpush1.bf16.msra.mxu0 %v5230_v60  ;;  %3751 = vmatpush3.bf16.msra.mxu1 %v5233_v48 }
 0x800   :  { %2123 = vmatprep.subr.bf16.mxu0 %v5236_v62  ;;  %3752 = vmatprep.subr.bf16.mxu1 %v5937_v43 }
 0x803   :  { %2124 = vmatpush1.bf16.msra.mxu0 %v5240_v36  ;;  %3753 = vmatpush3.bf16.msra.mxu1 %v5243_v23 }
 0x804   :  { %2125 = vmatprep.subr.bf16.mxu0 %v5246_v15  ;;  %3754 = vmatprep.subr.bf16.mxu1 %v5937_v43 }
 0x807   :  { %2126 = vmatpush1.bf16.msra.mxu0 %v5250_v20  ;;  %3755 = vmatpush3.bf16.msra.mxu1 %v5253_v9 }
 0x808   :  { %2250 = vmatprep.subr.bf16.mxu0 %v5102_v21  ;;  %3760 = vmatprep.subr.bf16.mxu1 %v5937_v43 }
 0x8bd   :  { %v2006_v40 = vpop.f32.mrb[28].mxu0  ;;  %v2049_v2 = vpop.f32.mrb[76].mxu1 }
 0x8be   :  { %v3944_v45 = vadd.f32 %v2006_v40, %v4988_v13  ;;  %v2008_v34 = vpop.f32.mrb[29].mxu0  ;;  %v3738_v63 = vpop.f32.mrb[77].mxu1  ;;  %v2084_v31 = vadd.f32 %v5371_v46, %v2049_v2 }
 0x8bf   :  { %v2010_v38 = vpop.f32.mrb[30].mxu0  ;;  %v2052_v39 = vpop.f32.mrb[78].mxu1  ;;  %v3945_v27 = vadd.f32 %v2008_v34, %v4992_v6 }
 0x8c0   :  { %v3328_v42 = vmul.f32 -1.442695, %v3944_v45  ;;  %v3946_v59 = vadd.f32 %v2010_v38, %v4988_v13  ;;  %v2012_v14 = vpop.f32.mrb[31].mxu0  ;;  %v3739_v61 = vpop.f32.mrb[79].mxu1  ;;  %v2085_v7 = vadd.f32 %v5371_v46, %v2052_v39 }
 0x8c1   :  { %v3947_v21 = vadd.f32 %v2012_v14, %v4992_v6  ;;  %v3330_v41 = vmul.f32 -1.442695, %v3945_v27 }
 0x8c2   :  { %4278 = vpow2.f32 %v3328_v42  ;;  %v3329_v28 = vmul.f32 -1.442695, %v3946_v59 }
 0x8c3   :  { %v3331_v26 = vmul.f32 -1.442695, %v3947_v21 }
 0x8c4   :  { %4280 = vpow2.f32 %v3329_v28 }
 0x8c5   :  { %4282 = vpow2.f32 %v3330_v41 }
 0x8c6   :  { %4284 = vpow2.f32 %v3331_v26 }
 0x8cc   :  { %v4279_v5 = vpop.eup %4278 }
 0x8cd   :  { %v2064_v33 = vadd.f32 1.0, %v4279_v5 }
 0x8ce   :  { %v4281_v10 = vpop.eup %4280 }
 0x8cf   :  { %4286 = vrcp.f32 %v2064_v33  ;;  %v2065_v29 = vadd.f32 1.0, %v4281_v10  ;;  %v4283_v30 = vpop.eup %4282 }
 0x8d0   :  { %v4285_v32 = vpop.eup %4284  ;;  %v2078_v49 = vadd.f32 1.0, %v4283_v30 }
 0x8d1   :  { %4288 = vrcp.f32 %v2065_v29  ;;  %v2079_v24 = vadd.f32 1.0, %v4285_v32 }
 0x8d2   :  { %4290 = vrcp.f32 %v2078_v49 }
 0x8d3   :  { %4292 = vrcp.f32 %v2079_v24 }
 0x8d9   :  { %v4287_v16 = vpop.eup %4286 }
 0x8da   :  { %v2086_v18 = vmul.f32 %v4287_v16, %v2084_v31 }
 0x8db   :  { %v4289_v8 = vpop.eup %4288 }
 0x8dc   :  { %v2088_v22 = vadd.f32 %v2086_v18, %v4926_v56  ;;  %v2087_v0 = vmul.f32 %v4289_v8, %v2085_v7  ;;  %v4291_v40 = vpop.eup %4290 }
 0x8dd   :  { %v4293_v45 = vpop.eup %4292  ;;  %v2092_v34 = vsub.f32 1.0, %v4291_v40  ;;  %v2096_v42 = vmul.f32 %v4291_v40, %v5379_v44 }
 0x8de   :  { %4294 = vtanh.f32 %v2088_v22  ;;  %v2089_v25 = vadd.f32 %v2087_v0, %v4932_v3  ;;  %v2093_v2 = vsub.f32 1.0, %v4293_v45  ;;  %v2097_v39 = vmul.f32 %v4293_v45, %v5381_v1 }
 0x8e0   :  { %4296 = vtanh.f32 %v2089_v25  ;;  %v5939_v25 = vld [vmem:[#allocation31_spill] sm:$0xff] }
 0x8e8   :  { %v4295_v63 = vpop.eup %4294 }
 0x8e9   :  { %v2094_v38 = vmul.f32 %v4295_v63, %v2092_v34  ;;  %v5940_v34 = vld [vmem:[#allocation33_spill] sm:$0xff] }
 0x8ea   :  { %v4297_v59 = vpop.eup %4296 }
 0x8eb   :  { %v2095_v14 = vmul.f32 %v4297_v59, %v2093_v2  ;;  %v5432_v61 = vadd.f32 %v2096_v42, %v2094_v38 }
 0x8ed   :  { %v5434_v56 = vadd.f32 %v2097_v39, %v2095_v14  ;;  %2101 = vst [vmem:[#allocation10 + $0x70] sm:$0xff] %v5432_v61 }
 0x8ef   :  { %2102 = vst [vmem:[#allocation10 + $0x78] sm:$0xff] %v5434_v56  ;;  %v2110_v3 = vpack.c.bf16 %v5434_v56, %v5432_v61 }
 0x8f1   :  { %2144 = vmatmul.mubr.bf16.vlgmr.msra.gmra.mrb[32].mxu0 %v2110_v3  ;;  %3757 = vmatmul.mubr.bf16.vlgmr.msra.gmra.mrb[80].mxu1 %v2110_v3 }
 0x8f2   :  { %2251 = vmatpush1.bf16.msra.mxu0 %v5124_v4  ;;  %3761 = vmatpush3.bf16.msra.mxu1 %v5194_v12  ;;  %v5473_v4 = vld [vmem:[#allocation9 + $0x4] ss:$12 sps:$4 sm:$0xff]  }
 0x8f3   :  { %2252 = vmatprep.subr.bf16.mxu0 %v5128_v11  ;;  %3762 = vmatprep.subr.bf16.mxu1 %v5937_v43 }
 0x8f4   :  { %2282 = vmatprep.mubr.bf16.mxu0 %v5938_v37  ;;  %3776 = vmatprep.mubr.msk.bf16.mxu1 %vm4611_vm0, %v5937_v43 }
 0x8f6   :  { %2253 = vmatpush1.bf16.msra.mxu0 %v5135_v35  ;;  %3763 = vmatpush3.bf16.msra.mxu1 %v5203_v53 }
 0x8f7   :  { %2254 = vmatprep.subr.bf16.mxu0 %v5139_v19  ;;  %3764 = vmatprep.subr.bf16.mxu1 %v5937_v43 }
 0x8fa   :  { %2255 = vmatpush1.bf16.msra.mxu0 %v5143_v50  ;;  %3765 = vmatpush3.bf16.msra.mxu1 %v5209_v54 }
 0x8fb   :  { %2256 = vmatprep.subr.bf16.mxu0 %v5147_v51  ;;  %3766 = vmatprep.subr.bf16.mxu1 %v5937_v43 }
 0x8fe   :  { %2257 = vmatpush1.bf16.msra.mxu0 %v5151_v17  ;;  %3767 = vmatpush3.bf16.msra.mxu1 %v5215_v55 }
 0x8ff   :  { %2258 = vmatprep.subr.bf16.mxu0 %v5155_v52  ;;  %3768 = vmatprep.subr.bf16.mxu1 %v5937_v43 }
 0x902   :  { %2259 = vmatpush1.bf16.msra.mxu0 %v5220_v57  ;;  %3769 = vmatpush3.bf16.msra.mxu1 %v5223_v47 }
 0x903   :  { %2260 = vmatprep.subr.bf16.mxu0 %v5226_v58  ;;  %3770 = vmatprep.subr.bf16.mxu1 %v5937_v43 }
 0x906   :  { %2261 = vmatpush1.bf16.msra.mxu0 %v5230_v60  ;;  %3771 = vmatpush3.bf16.msra.mxu1 %v5233_v48 }
 0x907   :  { %2262 = vmatprep.subr.bf16.mxu0 %v5236_v62  ;;  %3772 = vmatprep.subr.bf16.mxu1 %v5937_v43 }
 0x90a   :  { %2263 = vmatpush1.bf16.msra.mxu0 %v5240_v36  ;;  %3773 = vmatpush3.bf16.msra.mxu1 %v5243_v23 }
 0x90b   :  { %2264 = vmatprep.subr.bf16.mxu0 %v5246_v15  ;;  %3774 = vmatprep.subr.bf16.mxu1 %v5937_v43 }
 0x90e   :  { %2265 = vmatpush1.bf16.msra.mxu0 %v5250_v20  ;;  %3775 = vmatpush3.bf16.msra.mxu1 %v5253_v9 }
 0x90f   :  { %2389 = vmatprep.subr.bf16.mxu0 %v5473_v4  ;;  %3780 = vmatprep.subr.bf16.mxu1 %v5937_v43 }
 0x9c4   :  { %v2145_v11 = vpop.f32.mrb[32].mxu0  ;;  %v2188_v35 = vpop.f32.mrb[80].mxu1 }
 0x9c5   :  { %v3948_v19 = vadd.f32 %v2145_v11, %v4988_v13  ;;  %v2147_v50 = vpop.f32.mrb[33].mxu0  ;;  %v3758_v51 = vpop.f32.mrb[81].mxu1  ;;  %v2223_v16 = vadd.f32 %v5371_v46, %v2188_v35 }
 0x9c6   :  { %v2149_v17 = vpop.f32.mrb[34].mxu0  ;;  %v2191_v52 = vpop.f32.mrb[82].mxu1  ;;  %v3949_v21 = vadd.f32 %v2147_v50, %v4992_v6 }
 0x9c7   :  { %v3332_v44 = vmul.f32 -1.442695, %v3948_v19  ;;  %v3950_v1 = vadd.f32 %v2149_v17, %v4988_v13  ;;  %v2151_v27 = vpop.f32.mrb[35].mxu0  ;;  %v3759_v28 = vpop.f32.mrb[83].mxu1  ;;  %v2224_v22 = vadd.f32 %v5371_v46, %v2191_v52  ;;  %v5495_v52 = vld [vmem:[#allocation9] ss:$12 sps:$4 sm:$0xff]  }
 0x9c8   :  { %v3951_v26 = vadd.f32 %v2151_v27, %v4992_v6  ;;  %v3334_v5 = vmul.f32 -1.442695, %v3949_v21  ;;  %v5522_v27 = vld [vmem:[#allocation9 + $0x48] ss:$12 sps:$4 sm:$0xff]  }
 0x9c9   :  { %4298 = vpow2.f32 %v3332_v44  ;;  %v3333_v41 = vmul.f32 -1.442695, %v3950_v1  ;;  %v5510_v44 = vld [vmem:[#allocation9 + $0x34] ss:$12 sps:$4 sm:$0xff]   ;;  %v5518_v1 = vld [vmem:[#allocation9 + $0x4c] ss:$12 sps:$4 sm:$0xff]  }
 0x9ca   :  { %v3335_v33 = vmul.f32 -1.442695, %v3951_v26 }
 0x9cb   :  { %4300 = vpow2.f32 %v3333_v41 }
 0x9cc   :  { %4302 = vpow2.f32 %v3334_v5 }
 0x9cd   :  { %4304 = vpow2.f32 %v3335_v33 }
 0x9d3   :  { %v4299_v10 = vpop.eup %4298 }
 0x9d4   :  { %v2203_v29 = vadd.f32 1.0, %v4299_v10 }
 0x9d5   :  { %v4301_v30 = vpop.eup %4300 }
 0x9d6   :  { %4306 = vrcp.f32 %v2203_v29  ;;  %v2204_v32 = vadd.f32 1.0, %v4301_v30  ;;  %v4303_v49 = vpop.eup %4302 }
 0x9d7   :  { %v4305_v31 = vpop.eup %4304  ;;  %v2217_v24 = vadd.f32 1.0, %v4303_v49 }
 0x9d8   :  { %4308 = vrcp.f32 %v2204_v32  ;;  %v2218_v18 = vadd.f32 1.0, %v4305_v31 }
 0x9d9   :  { %4310 = vrcp.f32 %v2217_v24 }
 0x9da   :  { %4312 = vrcp.f32 %v2218_v18 }
 0x9e0   :  { %v4307_v7 = vpop.eup %4306 }
 0x9e1   :  { %v2225_v8 = vmul.f32 %v4307_v7, %v2223_v16 }
 0x9e2   :  { %v4309_v0 = vpop.eup %4308 }
 0x9e3   :  { %v2227_v40 = vadd.f32 %v2225_v8, %v5939_v25  ;;  %v2226_v45 = vmul.f32 %v4309_v0, %v2224_v22  ;;  %v4311_v2 = vpop.eup %4310  ;;  %v5941_v8 = vld [vmem:[#allocation30_spill] sm:$0xff]  ;;  %v5942_v25 = vld [vmem:[#allocation32_spill] sm:$0xff] }
 0x9e4   :  { %v4313_v38 = vpop.eup %4312  ;;  %v2231_v42 = vsub.f32 1.0, %v4311_v2  ;;  %v2235_v3 = vmul.f32 %v4311_v2, %v5432_v61  ;;  %v5499_v61 = vld [vmem:[#allocation9 + $0x1c] ss:$12 sps:$4 sm:$0xff]  }
 0x9e5   :  { %4314 = vtanh.f32 %v2227_v40  ;;  %v2228_v63 = vadd.f32 %v2226_v45, %v5940_v34  ;;  %v2232_v14 = vsub.f32 1.0, %v4313_v38  ;;  %v2236_v19 = vmul.f32 %v4313_v38, %v5434_v56  ;;  %v5506_v56 = vld [vmem:[#allocation9 + $0x18] ss:$12 sps:$4 sm:$0xff]  }
 0x9e7   :  { %4316 = vtanh.f32 %v2228_v63 }
 0x9ef   :  { %v4315_v59 = vpop.eup %4314 }
 0x9f0   :  { %v2233_v39 = vmul.f32 %v4315_v59, %v2231_v42 }
 0x9f1   :  { %v4317_v11 = vpop.eup %4316 }
 0x9f2   :  { %v2234_v35 = vmul.f32 %v4317_v11, %v2232_v14  ;;  %v5487_v50 = vadd.f32 %v2235_v3, %v2233_v39 }
 0x9f4   :  { %v5489_v51 = vadd.f32 %v2236_v19, %v2234_v35  ;;  %2240 = vst [vmem:[#allocation10 + $0x80] sm:$0xff] %v5487_v50 }
 0x9f6   :  { %2241 = vst [vmem:[#allocation10 + $0x88] sm:$0xff] %v5489_v51  ;;  %v2249_v17 = vpack.c.bf16 %v5489_v51, %v5487_v50 }
 0x9f8   :  { %2283 = vmatmul.mubr.bf16.vlgmr.msra.gmra.mrb[36].mxu0 %v2249_v17  ;;  %3777 = vmatmul.mubr.bf16.vlgmr.msra.gmra.mrb[84].mxu1 %v2249_v17  ;;  %v5580_v17 = vld [vmem:[#allocation9 + $0x38] ss:$12 sps:$4 sm:$0xff]  }
 0x9f9   :  { %2390 = vmatpush1.bf16.msra.mxu0 %v5495_v52  ;;  %3781 = vmatpush3.bf16.msra.mxu1 %v5194_v12  ;;  %v5514_v12 = vld [vmem:[#allocation9 + $0x30] ss:$12 sps:$4 sm:$0xff]  }
 0x9fa   :  { %2391 = vmatprep.subr.bf16.mxu0 %v5499_v61  ;;  %3782 = vmatprep.subr.bf16.mxu1 %v5937_v43 }
 0x9fb   :  { %2421 = vmatprep.mubr.bf16.mxu0 %v5938_v37  ;;  %3796 = vmatprep.mubr.msk.bf16.mxu1 %vm4611_vm0, %v5937_v43 }
 0x9fd   :  { %2392 = vmatpush1.bf16.msra.mxu0 %v5506_v56  ;;  %3783 = vmatpush3.bf16.msra.mxu1 %v5203_v53  ;;  %v5526_v53 = vld [vmem:[#allocation9 + $0x64] ss:$12 sps:$4 sm:$0xff]  }
 0x9fe   :  { %2393 = vmatprep.subr.bf16.mxu0 %v5510_v44  ;;  %3784 = vmatprep.subr.bf16.mxu1 %v5937_v43 }
 0xa01   :  { %2394 = vmatpush1.bf16.msra.mxu0 %v5514_v12  ;;  %3785 = vmatpush3.bf16.msra.mxu1 %v5209_v54 }
 0xa02   :  { %2395 = vmatprep.subr.bf16.mxu0 %v5518_v1  ;;  %3786 = vmatprep.subr.bf16.mxu1 %v5937_v43 }
 0xa05   :  { %2396 = vmatpush1.bf16.msra.mxu0 %v5522_v27  ;;  %3787 = vmatpush3.bf16.msra.mxu1 %v5215_v55 }
 0xa06   :  { %2397 = vmatprep.subr.bf16.mxu0 %v5526_v53  ;;  %3788 = vmatprep.subr.bf16.mxu1 %v5937_v43 }
 0xa09   :  { %2398 = vmatpush1.bf16.msra.mxu0 %v5220_v57  ;;  %3789 = vmatpush3.bf16.msra.mxu1 %v5223_v47 }
 0xa0a   :  { %2399 = vmatprep.subr.bf16.mxu0 %v5226_v58  ;;  %3790 = vmatprep.subr.bf16.mxu1 %v5937_v43 }
 0xa0d   :  { %2400 = vmatpush1.bf16.msra.mxu0 %v5230_v60  ;;  %3791 = vmatpush3.bf16.msra.mxu1 %v5233_v48 }
 0xa0e   :  { %2401 = vmatprep.subr.bf16.mxu0 %v5236_v62  ;;  %3792 = vmatprep.subr.bf16.mxu1 %v5937_v43 }
 0xa11   :  { %2402 = vmatpush1.bf16.msra.mxu0 %v5240_v36  ;;  %3793 = vmatpush3.bf16.msra.mxu1 %v5243_v23 }
 0xa12   :  { %2403 = vmatprep.subr.bf16.mxu0 %v5246_v15  ;;  %3794 = vmatprep.subr.bf16.mxu1 %v5937_v43 }
 0xa15   :  { %2404 = vmatpush1.bf16.msra.mxu0 %v5250_v20  ;;  %3795 = vmatpush3.bf16.msra.mxu1 %v5253_v9 }
 0xa16   :  { %2528 = vmatprep.subr.bf16.mxu0 %v5473_v4  ;;  %3800 = vmatprep.subr.bf16.mxu1 %v5937_v43 }
 0xacb   :  { %v2284_v54 = vpop.f32.mrb[36].mxu0  ;;  %v2327_v55 = vpop.f32.mrb[84].mxu1 }
 0xacc   :  { %v3952_v57 = vadd.f32 %v2284_v54, %v4988_v13  ;;  %v2286_v47 = vpop.f32.mrb[37].mxu0  ;;  %v3778_v58 = vpop.f32.mrb[85].mxu1  ;;  %v2362_v49 = vadd.f32 %v5371_v46, %v2327_v55  ;;  %v5586_v54 = vld [vmem:[#allocation9 + $0x50] ss:$12 sps:$4 sm:$0xff]   ;;  %v5591_v55 = vld [vmem:[#allocation9 + $0x60] ss:$12 sps:$4 sm:$0xff]  }
 0xacd   :  { %v2288_v60 = vpop.f32.mrb[38].mxu0  ;;  %v2330_v48 = vpop.f32.mrb[86].mxu1  ;;  %v3953_v20 = vadd.f32 %v2286_v47, %v4992_v6  ;;  %v5597_v47 = vld [vmem:[#allocation9 + $0x7c] ss:$12 sps:$4 sm:$0xff]   ;;  %v5601_v58 = vld [vmem:[#allocation9 + $0x78] ss:$12 sps:$4 sm:$0xff]  }
 0xace   :  { %v3336_v62 = vmul.f32 -1.442695, %v3952_v57  ;;  %v3954_v36 = vadd.f32 %v2288_v60, %v4988_v13  ;;  %v2290_v23 = vpop.f32.mrb[39].mxu0  ;;  %v3779_v15 = vpop.f32.mrb[87].mxu1  ;;  %v2363_v18 = vadd.f32 %v5371_v46, %v2330_v48  ;;  %v5594_v57 = vld [vmem:[#allocation9 + $0x68] ss:$12 sps:$4 sm:$0xff]  }
 0xacf   :  { %v3955_v28 = vadd.f32 %v2290_v23, %v4992_v6  ;;  %v3338_v21 = vmul.f32 -1.442695, %v3953_v20  ;;  %v5604_v60 = vld [vmem:[#allocation9 + $0x80] ss:$12 sps:$4 sm:$0xff]   ;;  %v5621_v15 = vld [vmem:[#allocation9 + $0xa8] ss:$12 sps:$4 sm:$0xff]  }
 0xad0   :  { %4318 = vpow2.f32 %v3336_v62  ;;  %v3337_v9 = vmul.f32 -1.442695, %v3954_v36  ;;  %v5607_v48 = vld [vmem:[#allocation9 + $0x94] ss:$12 sps:$4 sm:$0xff]   ;;  %v5611_v62 = vld [vmem:[#allocation9 + $0x90] ss:$12 sps:$4 sm:$0xff]  }
 0xad1   :  { %v3339_v41 = vmul.f32 -1.442695, %v3955_v28  ;;  %v5614_v36 = vld [vmem:[#allocation9 + $0x98] ss:$12 sps:$4 sm:$0xff]   ;;  %v5624_v20 = vld [vmem:[#allocation9 + $0xb0] ss:$12 sps:$4 sm:$0xff]  }
 0xad2   :  { %4320 = vpow2.f32 %v3337_v9  ;;  %v5617_v23 = vld [vmem:[#allocation9 + $0xac] ss:$12 sps:$4 sm:$0xff]  }
 0xad3   :  { %4322 = vpow2.f32 %v3338_v21 }
 0xad4   :  { %4324 = vpow2.f32 %v3339_v41 }
 0xada   :  { %v4319_v26 = vpop.eup %4318 }
 0xadb   :  { %v2342_v5 = vadd.f32 1.0, %v4319_v26 }
 0xadc   :  { %v4321_v33 = vpop.eup %4320 }
 0xadd   :  { %4326 = vrcp.f32 %v2342_v5  ;;  %v2343_v10 = vadd.f32 1.0, %v4321_v33  ;;  %v4323_v29 = vpop.eup %4322 }
 0xade   :  { %v4325_v30 = vpop.eup %4324  ;;  %v2356_v32 = vadd.f32 1.0, %v4323_v29 }
 0xadf   :  { %4328 = vrcp.f32 %v2343_v10  ;;  %v2357_v31 = vadd.f32 1.0, %v4325_v30 }
 0xae0   :  { %4330 = vrcp.f32 %v2356_v32 }
 0xae1   :  { %4332 = vrcp.f32 %v2357_v31 }
 0xae7   :  { %v4327_v24 = vpop.eup %4326 }
 0xae8   :  { %v2364_v16 = vmul.f32 %v4327_v24, %v2362_v49 }
 0xae9   :  { %v4329_v7 = vpop.eup %4328 }
 0xaea   :  { %v2366_v22 = vadd.f32 %v2364_v16, %v5941_v8  ;;  %v2365_v0 = vmul.f32 %v4329_v7, %v2363_v18  ;;  %v4331_v45 = vpop.eup %4330 }
 0xaeb   :  { %v4333_v34 = vpop.eup %4332  ;;  %v2370_v63 = vsub.f32 1.0, %v4331_v45  ;;  %v2374_v59 = vmul.f32 %v4331_v45, %v5487_v50  ;;  %v5565_v50 = vld [vmem:[#allocation9 + $0x8] ss:$12 sps:$4 sm:$0xff]  }
 0xaec   :  { %4334 = vtanh.f32 %v2366_v22  ;;  %v2367_v40 = vadd.f32 %v2365_v0, %v5942_v25  ;;  %v2371_v38 = vsub.f32 1.0, %v4333_v34  ;;  %v2375_v3 = vmul.f32 %v4333_v34, %v5489_v51  ;;  %v5574_v51 = vld [vmem:[#allocation9 + $0x20] ss:$12 sps:$4 sm:$0xff]  }
 0xaee   :  { %4336 = vtanh.f32 %v2367_v40 }
 0xaf6   :  { %v4335_v2 = vpop.eup %4334 }
 0xaf7   :  { %v2372_v42 = vmul.f32 %v4335_v2, %v2370_v63 }
 0xaf8   :  { %v4337_v14 = vpop.eup %4336 }
 0xaf9   :  { %v2373_v39 = vmul.f32 %v4337_v14, %v2371_v38  ;;  %v5556_v11 = vadd.f32 %v2374_v59, %v2372_v42  ;;  %v5943_v14 = vld [vmem:[#allocation35_spill] sm:$0xff] }
 0xafb   :  { %v5558_v35 = vadd.f32 %v2375_v3, %v2373_v39  ;;  %2379 = vst [vmem:[#allocation10 + $0x90] sm:$0xff] %v5556_v11 }
 0xafd   :  { %2380 = vst [vmem:[#allocation10 + $0x98] sm:$0xff] %v5558_v35  ;;  %v2388_v19 = vpack.c.bf16 %v5558_v35, %v5556_v11 }
 0xaff   :  { %2422 = vmatmul.mubr.bf16.vlgmr.msra.gmra.mrb[40].mxu0 %v2388_v19  ;;  %3797 = vmatmul.mubr.bf16.vlgmr.msra.gmra.mrb[88].mxu1 %v2388_v19  ;;  %v5944_v19 = vld [vmem:[#allocation37_spill] sm:$0xff] }
 0xb00   :  { %2529 = vmatpush1.bf16.msra.mxu0 %v5495_v52  ;;  %3801 = vmatpush3.bf16.msra.mxu1 %v5565_v50 }
 0xb01   :  { %2530 = vmatprep.subr.bf16.mxu0 %v5499_v61  ;;  %3802 = vmatprep.subr.bf16.mxu1 %v5937_v43 }
 0xb02   :  { %2560 = vmatprep.mubr.bf16.mxu0 %v5938_v37  ;;  %3816 = vmatprep.mubr.msk.bf16.mxu1 %vm4611_vm0, %v5937_v43 }
 0xb04   :  { %2531 = vmatpush1.bf16.msra.mxu0 %v5506_v56  ;;  %3803 = vmatpush3.bf16.msra.mxu1 %v5574_v51 }
 0xb05   :  { %2532 = vmatprep.subr.bf16.mxu0 %v5510_v44  ;;  %3804 = vmatprep.subr.bf16.mxu1 %v5937_v43 }
 0xb08   :  { %2533 = vmatpush1.bf16.msra.mxu0 %v5514_v12  ;;  %3805 = vmatpush3.bf16.msra.mxu1 %v5580_v17 }
 0xb09   :  { %2534 = vmatprep.subr.bf16.mxu0 %v5518_v1  ;;  %3806 = vmatprep.subr.bf16.mxu1 %v5937_v43 }
 0xb0c   :  { %2535 = vmatpush1.bf16.msra.mxu0 %v5522_v27  ;;  %3807 = vmatpush3.bf16.msra.mxu1 %v5586_v54 }
 0xb0d   :  { %2536 = vmatprep.subr.bf16.mxu0 %v5526_v53  ;;  %3808 = vmatprep.subr.bf16.mxu1 %v5937_v43 }
 0xb10   :  { %2537 = vmatpush1.bf16.msra.mxu0 %v5591_v55  ;;  %3809 = vmatpush3.bf16.msra.mxu1 %v5594_v57 }
 0xb11   :  { %2538 = vmatprep.subr.bf16.mxu0 %v5597_v47  ;;  %3810 = vmatprep.subr.bf16.mxu1 %v5937_v43 }
 0xb14   :  { %2539 = vmatpush1.bf16.msra.mxu0 %v5601_v58  ;;  %3811 = vmatpush3.bf16.msra.mxu1 %v5604_v60 }
 0xb15   :  { %2540 = vmatprep.subr.bf16.mxu0 %v5607_v48  ;;  %3812 = vmatprep.subr.bf16.mxu1 %v5937_v43 }
 0xb18   :  { %2541 = vmatpush1.bf16.msra.mxu0 %v5611_v62  ;;  %3813 = vmatpush3.bf16.msra.mxu1 %v5614_v36 }
 0xb19   :  { %2542 = vmatprep.subr.bf16.mxu0 %v5617_v23  ;;  %3814 = vmatprep.subr.bf16.mxu1 %v5937_v43 }
 0xb1c   :  { %2543 = vmatpush1.bf16.msra.mxu0 %v5621_v15  ;;  %3815 = vmatpush3.bf16.msra.mxu1 %v5624_v20 }
 0xb1d   :  { %2667 = vmatprep.subr.bf16.mxu0 %v5473_v4  ;;  %3820 = vmatprep.subr.bf16.mxu1 %v5937_v43 }
 0xbd2   :  { %v2423_v9 = vpop.f32.mrb[40].mxu0  ;;  %v2466_v28 = vpop.f32.mrb[88].mxu1 }
 0xbd3   :  { %v3956_v21 = vadd.f32 %v2423_v9, %v4988_v13  ;;  %v2425_v41 = vpop.f32.mrb[41].mxu0  ;;  %v3798_v26 = vpop.f32.mrb[89].mxu1  ;;  %v2501_v34 = vadd.f32 %v5371_v46, %v2466_v28 }
 0xbd4   :  { %v2427_v5 = vpop.f32.mrb[42].mxu0  ;;  %v2469_v33 = vpop.f32.mrb[90].mxu1  ;;  %v3957_v49 = vadd.f32 %v2425_v41, %v4992_v6 }
 0xbd5   :  { %v3340_v10 = vmul.f32 -1.442695, %v3956_v21  ;;  %v3958_v29 = vadd.f32 %v2427_v5, %v4988_v13  ;;  %v2429_v30 = vpop.f32.mrb[43].mxu0  ;;  %v3799_v32 = vpop.f32.mrb[91].mxu1  ;;  %v2502_v42 = vadd.f32 %v5371_v46, %v2469_v33 }
 0xbd6   :  { %v3959_v24 = vadd.f32 %v2429_v30, %v4992_v6  ;;  %v3342_v16 = vmul.f32 -1.442695, %v3957_v49 }
 0xbd7   :  { %4338 = vpow2.f32 %v3340_v10  ;;  %v3341_v31 = vmul.f32 -1.442695, %v3958_v29 }
 0xbd8   :  { %v3343_v18 = vmul.f32 -1.442695, %v3959_v24 }
 0xbd9   :  { %4340 = vpow2.f32 %v3341_v31 }
 0xbda   :  { %4342 = vpow2.f32 %v3342_v16 }
 0xbdb   :  { %4344 = vpow2.f32 %v3343_v18 }
 0xbe1   :  { %v4339_v7 = vpop.eup %4338 }
 0xbe2   :  { %v2481_v8 = vadd.f32 1.0, %v4339_v7 }
 0xbe3   :  { %v4341_v22 = vpop.eup %4340 }
 0xbe4   :  { %4346 = vrcp.f32 %v2481_v8  ;;  %v2482_v0 = vadd.f32 1.0, %v4341_v22  ;;  %v4343_v25 = vpop.eup %4342 }
 0xbe5   :  { %v4345_v40 = vpop.eup %4344  ;;  %v2495_v45 = vadd.f32 1.0, %v4343_v25 }
 0xbe6   :  { %4348 = vrcp.f32 %v2482_v0  ;;  %v2496_v63 = vadd.f32 1.0, %v4345_v40 }
 0xbe7   :  { %4350 = vrcp.f32 %v2495_v45 }
 0xbe8   :  { %4352 = vrcp.f32 %v2496_v63 }
 0xbee   :  { %v4347_v2 = vpop.eup %4346 }
 0xbef   :  { %v2503_v38 = vmul.f32 %v4347_v2, %v2501_v34 }
 0xbf0   :  { %v4349_v59 = vpop.eup %4348 }
 0xbf1   :  { %v2505_v39 = vadd.f32 %v2503_v38, %v5943_v14  ;;  %v2504_v3 = vmul.f32 %v4349_v59, %v2502_v42  ;;  %v4351_v21 = vpop.eup %4350 }
 0xbf2   :  { %v4353_v41 = vpop.eup %4352  ;;  %v2509_v26 = vsub.f32 1.0, %v4351_v21  ;;  %v2513_v29 = vmul.f32 %v4351_v21, %v5556_v11 }
 0xbf3   :  { %4354 = vtanh.f32 %v2505_v39  ;;  %v2506_v9 = vadd.f32 %v2504_v3, %v5944_v19  ;;  %v2510_v28 = vsub.f32 1.0, %v4353_v41  ;;  %v2514_v33 = vmul.f32 %v4353_v41, %v5558_v35 }
 0xbf5   :  { %4356 = vtanh.f32 %v2506_v9 }
 0xbfd   :  { %v4355_v5 = vpop.eup %4354 }
 0xbfe   :  { %v2511_v10 = vmul.f32 %v4355_v5, %v2509_v26 }
 0xbff   :  { %v4357_v30 = vpop.eup %4356 }
 0xc00   :  { %v2512_v32 = vmul.f32 %v4357_v30, %v2510_v28  ;;  %v5639_v49 = vadd.f32 %v2513_v29, %v2511_v10  ;;  %v5945_v30 = vld [vmem:[#allocation34_spill] sm:$0xff] }
 0xc02   :  { %v5641_v31 = vadd.f32 %v2514_v33, %v2512_v32  ;;  %2518 = vst [vmem:[#allocation10 + $0xa0] sm:$0xff] %v5639_v49 }
 0xc04   :  { %2519 = vst [vmem:[#allocation10 + $0xa8] sm:$0xff] %v5641_v31  ;;  %v2527_v24 = vpack.c.bf16 %v5641_v31, %v5639_v49 }
 0xc06   :  { %2561 = vmatmul.mubr.bf16.vlgmr.msra.gmra.mrb[44].mxu0 %v2527_v24  ;;  %3817 = vmatmul.mubr.bf16.vlgmr.msra.gmra.mrb[92].mxu1 %v2527_v24  ;;  %v5946_v24 = vld [vmem:[#allocation36_spill] sm:$0xff] }
 0xc07   :  { %2668 = vmatpush1.bf16.msra.mxu0 %v5495_v52  ;;  %3821 = vmatpush3.bf16.msra.mxu1 %v5565_v50 }
 0xc08   :  { %2669 = vmatprep.subr.bf16.mxu0 %v5499_v61  ;;  %3822 = vmatprep.subr.bf16.mxu1 %v5937_v43 }
 0xc09   :  { %2699 = vmatprep.mubr.bf16.mxu0 %v5938_v37  ;;  %3836 = vmatprep.mubr.msk.bf16.mxu1 %vm4611_vm0, %v5937_v43 }
 0xc0b   :  { %2670 = vmatpush1.bf16.msra.mxu0 %v5506_v56  ;;  %3823 = vmatpush3.bf16.msra.mxu1 %v5574_v51 }
 0xc0c   :  { %2671 = vmatprep.subr.bf16.mxu0 %v5510_v44  ;;  %3824 = vmatprep.subr.bf16.mxu1 %v5937_v43 }
 0xc0f   :  { %2672 = vmatpush1.bf16.msra.mxu0 %v5514_v12  ;;  %3825 = vmatpush3.bf16.msra.mxu1 %v5580_v17 }
 0xc10   :  { %2673 = vmatprep.subr.bf16.mxu0 %v5518_v1  ;;  %3826 = vmatprep.subr.bf16.mxu1 %v5937_v43 }
 0xc13   :  { %2674 = vmatpush1.bf16.msra.mxu0 %v5522_v27  ;;  %3827 = vmatpush3.bf16.msra.mxu1 %v5586_v54 }
 0xc14   :  { %2675 = vmatprep.subr.bf16.mxu0 %v5526_v53  ;;  %3828 = vmatprep.subr.bf16.mxu1 %v5937_v43 }
 0xc17   :  { %2676 = vmatpush1.bf16.msra.mxu0 %v5591_v55  ;;  %3829 = vmatpush3.bf16.msra.mxu1 %v5594_v57 }
 0xc18   :  { %2677 = vmatprep.subr.bf16.mxu0 %v5597_v47  ;;  %3830 = vmatprep.subr.bf16.mxu1 %v5937_v43 }
 0xc1b   :  { %2678 = vmatpush1.bf16.msra.mxu0 %v5601_v58  ;;  %3831 = vmatpush3.bf16.msra.mxu1 %v5604_v60 }
 0xc1c   :  { %2679 = vmatprep.subr.bf16.mxu0 %v5607_v48  ;;  %3832 = vmatprep.subr.bf16.mxu1 %v5937_v43 }
 0xc1f   :  { %2680 = vmatpush1.bf16.msra.mxu0 %v5611_v62  ;;  %3833 = vmatpush3.bf16.msra.mxu1 %v5614_v36 }
 0xc20   :  { %2681 = vmatprep.subr.bf16.mxu0 %v5617_v23  ;;  %3834 = vmatprep.subr.bf16.mxu1 %v5937_v43 }
 0xc23   :  { %2682 = vmatpush1.bf16.msra.mxu0 %v5621_v15  ;;  %3835 = vmatpush3.bf16.msra.mxu1 %v5624_v20 }
 0xc24   :  { %2806 = vmatprep.subr.bf16.mxu0 %v5473_v4  ;;  %3840 = vmatprep.subr.bf16.mxu1 %v5937_v43 }
 0xcd9   :  { %v2562_v11 = vpop.f32.mrb[44].mxu0  ;;  %v2605_v35 = vpop.f32.mrb[92].mxu1 }
 0xcda   :  { %v3960_v16 = vadd.f32 %v2562_v11, %v4988_v13  ;;  %v2564_v18 = vpop.f32.mrb[45].mxu0  ;;  %v3818_v7 = vpop.f32.mrb[93].mxu1  ;;  %v2640_v41 = vadd.f32 %v5371_v46, %v2605_v35 }
 0xcdb   :  { %v2566_v8 = vpop.f32.mrb[46].mxu0  ;;  %v2608_v22 = vpop.f32.mrb[94].mxu1  ;;  %v3961_v34 = vadd.f32 %v2564_v18, %v4992_v6 }
 0xcdc   :  { %v3344_v0 = vmul.f32 -1.442695, %v3960_v16  ;;  %v3962_v25 = vadd.f32 %v2566_v8, %v4988_v13  ;;  %v2568_v40 = vpop.f32.mrb[47].mxu0  ;;  %v3819_v45 = vpop.f32.mrb[95].mxu1  ;;  %v2641_v10 = vadd.f32 %v5371_v46, %v2608_v22 }
 0xcdd   :  { %v3963_v2 = vadd.f32 %v2568_v40, %v4992_v6  ;;  %v3346_v38 = vmul.f32 -1.442695, %v3961_v34 }
 0xcde   :  { %4358 = vpow2.f32 %v3344_v0  ;;  %v3345_v63 = vmul.f32 -1.442695, %v3962_v25 }
 0xcdf   :  { %v3347_v42 = vmul.f32 -1.442695, %v3963_v2  ;;  %v5948_v2 = vld [vmem:[#allocation15_spill] sm:$0xff] }
 0xce0   :  { %4360 = vpow2.f32 %v3345_v63 }
 0xce1   :  { %4362 = vpow2.f32 %v3346_v38  ;;  %v531_v38 = vadd.f32 %v5948_v2, %v4992_v6 }
 0xce2   :  { %4364 = vpow2.f32 %v3347_v42 }
 0xce8   :  { %v4359_v59 = vpop.eup %4358 }
 0xce9   :  { %v2620_v14 = vadd.f32 1.0, %v4359_v59 }
 0xcea   :  { %v4361_v39 = vpop.eup %4360 }
 0xceb   :  { %4366 = vrcp.f32 %v2620_v14  ;;  %v2621_v3 = vadd.f32 1.0, %v4361_v39  ;;  %v4363_v19 = vpop.eup %4362  ;;  %v5949_v14 = vld [vmem:[#allocation16_spill] sm:$0xff] }
 0xcec   :  { %v4365_v9 = vpop.eup %4364  ;;  %v2634_v21 = vadd.f32 1.0, %v4363_v19  ;;  %v533_v39 = vadd.f32 %v5949_v14, %v4988_v13 }
 0xced   :  { %4368 = vrcp.f32 %v2621_v3  ;;  %v2635_v26 = vadd.f32 1.0, %v4365_v9 }
 0xcee   :  { %4370 = vrcp.f32 %v2634_v21  ;;  %v5950_v21 = vld [vmem:[#allocation17_spill] sm:$0xff] }
 0xcef   :  { %4372 = vrcp.f32 %v2635_v26 }
 0xcf5   :  { %v4367_v5 = vpop.eup %4366 }
 0xcf6   :  { %v2642_v28 = vmul.f32 %v4367_v5, %v2640_v41  ;;  %v535_v41 = vadd.f32 %v5950_v21, %v4992_v6 }
 0xcf7   :  { %v4369_v29 = vpop.eup %4368 }
 0xcf8   :  { %v2644_v32 = vadd.f32 %v2642_v28, %v5945_v30  ;;  %v2643_v33 = vmul.f32 %v4369_v29, %v2641_v10  ;;  %v4371_v16 = vpop.eup %4370 }
 0xcf9   :  { %v4373_v18 = vpop.eup %4372  ;;  %v2648_v7 = vsub.f32 1.0, %v4371_v16  ;;  %v2652_v25 = vmul.f32 %v4371_v16, %v5639_v49  ;;  %v5947_v49 = vld [vmem:[#allocation14_spill] sm:$0xff] }
 0xcfa   :  { %4374 = vtanh.f32 %v2644_v32  ;;  %v2645_v11 = vadd.f32 %v2643_v33, %v5946_v24  ;;  %v2649_v35 = vsub.f32 1.0, %v4373_v18  ;;  %v2653_v46 = vmul.f32 %v4373_v18, %v5641_v31 }
 0xcfb   :  { %v529_v31 = vadd.f32 %v5947_v49, %v4988_v13 }
 0xcfc   :  { %4376 = vtanh.f32 %v2645_v11 }
 0xd04   :  { %v4375_v8 = vpop.eup %4374 }
 0xd05   :  { %v2650_v0 = vmul.f32 %v4375_v8, %v2648_v7 }
 0xd06   :  { %v4377_v40 = vpop.eup %4376 }
 0xd07   :  { %v2651_v45 = vmul.f32 %v4377_v40, %v2649_v35  ;;  %v5692_v22 = vadd.f32 %v2652_v25, %v2650_v0 }
 0xd09   :  { %v5694_v34 = vadd.f32 %v2653_v46, %v2651_v45  ;;  %2657 = vst [vmem:[#allocation10 + $0xb0] sm:$0xff] %v5692_v22  ;;  %v5746_v45 = vld [vmem:[%s5899_s4] ss:$0 sm:$0xff]  ;;  %s4613_s4 = smov [#allocation10]  }
 0xd0a   :  { %s3222_s12 = sshll.u32 %s4613_s4, 4  ;;  %s3223_s12 = int_to_ptr.vmem [resolvable:$true] %s3222_s12 }
 0xd0b   :  { %2658 = vst [vmem:[#allocation10 + $0xb8] sm:$0xff] %v5694_v34  ;;  %v2666_v63 = vpack.c.bf16 %v5694_v34, %v5692_v22  ;;  %s4574_s13 = scalar_lea.vmem %s3223_s12, 4096  ;;  %p4579_p11 = scmp.lt.s32.totalorder %s3223_s12, %s3223_s12 }
 0xd0c   :  { %p4575_p10 = scmp.ne.s32.totalorder %s3223_s12, %s4574_s13  ;;  %p4580_p12 = scmp.lt.s32.totalorder %s4574_s13, %s4574_s13 }
 0xd0d   :  { %2700 = vmatmul.mubr.bf16.vlgmr.msra.gmra.mrb[48].mxu0 %v2666_v63  ;;  %3837 = vmatmul.mubr.bf16.vlgmr.msra.gmra.mrb[96].mxu1 %v2666_v63 }
 0xd0e   :  { %2807 = vmatpush1.bf16.msra.mxu0 %v5495_v52  ;;  %3841 = vmatpush3.bf16.msra.mxu1 %v5565_v50  ;;  %p4581_p13 = por %p4580_p12, %p4579_p11 }
 0xd0f   :  { %2808 = vmatprep.subr.bf16.mxu0 %v5499_v61  ;;  %3842 = vmatprep.subr.bf16.mxu1 %v5937_v43 }
 0xd10   :  { %2838 = vmatprep.mubr.bf16.mxu0 %v5938_v37  ;;  %3856 = vmatprep.mubr.msk.bf16.mxu1 %vm4611_vm0, %v5937_v43  ;;  %p4582_p0 = pnand %p4581_p13, %p4575_p10 }
 0xd12   :  { %2809 = vmatpush1.bf16.msra.mxu0 %v5506_v56  ;;  %3843 = vmatpush3.bf16.msra.mxu1 %v5574_v51 }
 0xd13   :  { %2810 = vmatprep.subr.bf16.mxu0 %v5510_v44  ;;  %3844 = vmatprep.subr.bf16.mxu1 %v5937_v43 }
 0xd16   :  { %2811 = vmatpush1.bf16.msra.mxu0 %v5514_v12  ;;  %3845 = vmatpush3.bf16.msra.mxu1 %v5580_v17 }
 0xd17   :  { %2812 = vmatprep.subr.bf16.mxu0 %v5518_v1  ;;  %3846 = vmatprep.subr.bf16.mxu1 %v5937_v43 }
 0xd1a   :  { %2813 = vmatpush1.bf16.msra.mxu0 %v5522_v27  ;;  %3847 = vmatpush3.bf16.msra.mxu1 %v5586_v54 }
 0xd1b   :  { %2814 = vmatprep.subr.bf16.mxu0 %v5526_v53  ;;  %3848 = vmatprep.subr.bf16.mxu1 %v5937_v43 }
 0xd1e   :  { %2815 = vmatpush1.bf16.msra.mxu0 %v5591_v55  ;;  %3849 = vmatpush3.bf16.msra.mxu1 %v5594_v57 }
 0xd1f   :  { %2816 = vmatprep.subr.bf16.mxu0 %v5597_v47  ;;  %3850 = vmatprep.subr.bf16.mxu1 %v5937_v43 }
 0xd22   :  { %2817 = vmatpush1.bf16.msra.mxu0 %v5601_v58  ;;  %3851 = vmatpush3.bf16.msra.mxu1 %v5604_v60 }
 0xd23   :  { %2818 = vmatprep.subr.bf16.mxu0 %v5607_v48  ;;  %3852 = vmatprep.subr.bf16.mxu1 %v5937_v43 }
 0xd26   :  { %2819 = vmatpush1.bf16.msra.mxu0 %v5611_v62  ;;  %3853 = vmatpush3.bf16.msra.mxu1 %v5614_v36 }
 0xd27   :  { %2820 = vmatprep.subr.bf16.mxu0 %v5617_v23  ;;  %3854 = vmatprep.subr.bf16.mxu1 %v5937_v43 }
 0xd2a   :  { %2821 = vmatpush1.bf16.msra.mxu0 %v5621_v15  ;;  %3855 = vmatpush3.bf16.msra.mxu1 %v5624_v20 }
 0xd2b   :  { %2945 = vmatprep.subr.bf16.mxu0 %v5473_v4  ;;  %3860 = vmatprep.subr.bf16.mxu1 %v5937_v43 }
 0xde0   :  { %v2701_v42 = vpop.f32.mrb[48].mxu0  ;;  %v2744_v59 = vpop.f32.mrb[96].mxu1 }
 0xde1   :  { %v2751_v3 = vadd.f32 %v2701_v42, %v529_v31  ;;  %v2703_v19 = vpop.f32.mrb[49].mxu0  ;;  %v3838_v9 = vpop.f32.mrb[97].mxu1  ;;  %v2779_v46 = vadd.f32 %v5746_v45, %v2744_v59  ;;  %v5951_v42 = vld [vmem:[#allocation39_spill] sm:$0xff] }
 0xde2   :  { %v2765_v26 = vadd.f32 %v2703_v19, %v531_v38  ;;  %v2705_v5 = vpop.f32.mrb[50].mxu0  ;;  %v2747_v28 = vpop.f32.mrb[98].mxu1 }
 0xde3   :  { %v3348_v10 = vmul.f32 -1.442695, %v2751_v3  ;;  %v2752_v29 = vadd.f32 %v2705_v5, %v533_v39  ;;  %v2707_v30 = vpop.f32.mrb[51].mxu0  ;;  %v3839_v32 = vpop.f32.mrb[99].mxu1  ;;  %v2780_v2 = vadd.f32 %v5746_v45, %v2747_v28  ;;  %v5952_v3 = vld [vmem:[#allocation41_spill] sm:$0xff] }
 0xde4   :  { %v2766_v33 = vadd.f32 %v2707_v30, %v535_v41  ;;  %v3350_v11 = vmul.f32 -1.442695, %v2765_v26 }
 0xde5   :  { %4378 = vpow2.f32 %v3348_v10  ;;  %v3349_v24 = vmul.f32 -1.442695, %v2752_v29 }
 0xde6   :  { %v3351_v16 = vmul.f32 -1.442695, %v2766_v33 }
 0xde7   :  { %4380 = vpow2.f32 %v3349_v24 }
 0xde8   :  { %4382 = vpow2.f32 %v3350_v11  ;;  %v5954_v11 = vld [vmem:[#allocation19_spill] sm:$0xff] }
 0xde9   :  { %4384 = vpow2.f32 %v3351_v16  ;;  %v541_v16 = vadd.f32 %v5954_v11, %v4992_v6 }
 0xdef   :  { %v4379_v18 = vpop.eup %4378 }
 0xdf0   :  { %v2759_v7 = vadd.f32 1.0, %v4379_v18 }
 0xdf1   :  { %v4381_v8 = vpop.eup %4380 }
 0xdf2   :  { %4386 = vrcp.f32 %v2759_v7  ;;  %v2760_v35 = vadd.f32 1.0, %v4381_v8  ;;  %v4383_v0 = vpop.eup %4382  ;;  %v5955_v8 = vld [vmem:[#allocation20_spill] sm:$0xff] }
 0xdf3   :  { %v4385_v25 = vpop.eup %4384  ;;  %v2773_v40 = vadd.f32 1.0, %v4383_v0 }
 0xdf4   :  { %4388 = vrcp.f32 %v2760_v35  ;;  %v2774_v63 = vadd.f32 1.0, %v4385_v25  ;;  %v543_v35 = vadd.f32 %v5955_v8, %v4988_v13 }
 0xdf5   :  { %4390 = vrcp.f32 %v2773_v40 }
 0xdf6   :  { %4392 = vrcp.f32 %v2774_v63 }
 0xdfc   :  { %v4387_v49 = vpop.eup %4386 }
 0xdfd   :  { %v2781_v31 = vmul.f32 %v4387_v49, %v2779_v46  ;;  %v5956_v46 = vld [vmem:[#allocation21_spill] sm:$0xff] }
 0xdfe   :  { %v4389_v38 = vpop.eup %4388  ;;  %v545_v63 = vadd.f32 %v5956_v46, %v4992_v6 }
 0xdff   :  { %v2783_v14 = vadd.f32 %v2781_v31, %v5951_v42  ;;  %v2782_v39 = vmul.f32 %v4389_v38, %v2780_v2  ;;  %v4391_v9 = vpop.eup %4390 }
 0xe00   :  { %v4393_v21 = vpop.eup %4392  ;;  %v2787_v41 = vsub.f32 1.0, %v4391_v9  ;;  %v2791_v10 = vmul.f32 %v4391_v9, %v5692_v22  ;;  %v5953_v22 = vld [vmem:[#allocation18_spill] sm:$0xff] }
 0xe01   :  { %4394 = vtanh.f32 %v2783_v14  ;;  %v2784_v19 = vadd.f32 %v2782_v39, %v5952_v3  ;;  %v2788_v59 = vsub.f32 1.0, %v4393_v21  ;;  %v2792_v28 = vmul.f32 %v4393_v21, %v5694_v34 }
 0xe02   :  { %v539_v34 = vadd.f32 %v5953_v22, %v4988_v13 }
 0xe03   :  { %4396 = vtanh.f32 %v2784_v19 }
 0xe0b   :  { %v4395_v26 = vpop.eup %4394 }
 0xe0c   :  { %v2789_v5 = vmul.f32 %v4395_v26, %v2787_v41 }
 0xe0d   :  { %v4397_v29 = vpop.eup %4396 }
 0xe0e   :  { %v2790_v30 = vmul.f32 %v4397_v29, %v2788_v59  ;;  %v5754_v32 = vadd.f32 %v2791_v10, %v2789_v5 }
 0xe10   :  { %v5756_v33 = vadd.f32 %v2792_v28, %v2790_v30  ;;  %2796 = vst [vmem:[#allocation10 + $0xc0] sm:$0xff] %v5754_v32 }
 0xe12   :  { %2797 = vst [vmem:[#allocation10 + $0xc8] sm:$0xff] %v5756_v33  ;;  %v2805_v24 = vpack.c.bf16 %v5756_v33, %v5754_v32 }
 0xe14   :  { %2839 = vmatmul.mubr.bf16.vlgmr.msra.gmra.mrb[52].mxu0 %v2805_v24  ;;  %3857 = vmatmul.mubr.bf16.vlgmr.msra.gmra.mrb[100].mxu1 %v2805_v24 }
 0xe15   :  { %2946 = vmatpush1.bf16.msra.mxu0 %v5495_v52  ;;  %3861 = vmatpush3.bf16.msra.mxu1 %v5565_v50 }
 0xe16   :  { %2947 = vmatprep.subr.bf16.mxu0 %v5499_v61  ;;  %3862 = vmatprep.subr.bf16.mxu1 %v5937_v43 }
 0xe17   :  { %2977 = vmatprep.mubr.bf16.mxu0 %v5938_v37  ;;  %3876 = vmatprep.mubr.msk.bf16.mxu1 %vm4611_vm0, %v5937_v43 }
 0xe19   :  { %2948 = vmatpush1.bf16.msra.mxu0 %v5506_v56  ;;  %3863 = vmatpush3.bf16.msra.mxu1 %v5574_v51 }
 0xe1a   :  { %2949 = vmatprep.subr.bf16.mxu0 %v5510_v44  ;;  %3864 = vmatprep.subr.bf16.mxu1 %v5937_v43 }
 0xe1d   :  { %2950 = vmatpush1.bf16.msra.mxu0 %v5514_v12  ;;  %3865 = vmatpush3.bf16.msra.mxu1 %v5580_v17 }
 0xe1e   :  { %2951 = vmatprep.subr.bf16.mxu0 %v5518_v1  ;;  %3866 = vmatprep.subr.bf16.mxu1 %v5937_v43 }
 0xe21   :  { %2952 = vmatpush1.bf16.msra.mxu0 %v5522_v27  ;;  %3867 = vmatpush3.bf16.msra.mxu1 %v5586_v54 }
 0xe22   :  { %2953 = vmatprep.subr.bf16.mxu0 %v5526_v53  ;;  %3868 = vmatprep.subr.bf16.mxu1 %v5937_v43 }
 0xe25   :  { %2954 = vmatpush1.bf16.msra.mxu0 %v5591_v55  ;;  %3869 = vmatpush3.bf16.msra.mxu1 %v5594_v57 }
 0xe26   :  { %2955 = vmatprep.subr.bf16.mxu0 %v5597_v47  ;;  %3870 = vmatprep.subr.bf16.mxu1 %v5937_v43 }
 0xe29   :  { %2956 = vmatpush1.bf16.msra.mxu0 %v5601_v58  ;;  %3871 = vmatpush3.bf16.msra.mxu1 %v5604_v60 }
 0xe2a   :  { %2957 = vmatprep.subr.bf16.mxu0 %v5607_v48  ;;  %3872 = vmatprep.subr.bf16.mxu1 %v5937_v43 }
 0xe2d   :  { %2958 = vmatpush1.bf16.msra.mxu0 %v5611_v62  ;;  %3873 = vmatpush3.bf16.msra.mxu1 %v5614_v36 }
 0xe2e   :  { %2959 = vmatprep.subr.bf16.mxu0 %v5617_v23  ;;  %3874 = vmatprep.subr.bf16.mxu1 %v5937_v43 }
 0xe31   :  { %2960 = vmatpush1.bf16.msra.mxu0 %v5621_v15  ;;  %3875 = vmatpush3.bf16.msra.mxu1 %v5624_v20 }
 0xe32   :  { %3084 = vmatprep.subr.bf16.mxu0 %v5473_v4  ;;  %3880 = vmatprep.subr.bf16.mxu1 %v5937_v43 }
 0xee7   :  { %v2840_v18 = vpop.f32.mrb[52].mxu0  ;;  %v2883_v7 = vpop.f32.mrb[100].mxu1 }
 0xee8   :  { %v2890_v0 = vadd.f32 %v2840_v18, %v539_v34  ;;  %v2842_v25 = vpop.f32.mrb[53].mxu0  ;;  %v3858_v40 = vpop.f32.mrb[101].mxu1  ;;  %v2918_v30 = vadd.f32 %v5746_v45, %v2883_v7 }
 0xee9   :  { %v2904_v4 = vadd.f32 %v2842_v25, %v541_v16  ;;  %v2844_v49 = vpop.f32.mrb[54].mxu0  ;;  %v2886_v31 = vpop.f32.mrb[102].mxu1  ;;  %v5957_v16 = vld [vmem:[#allocation38_spill] sm:$0xff] }
 0xeea   :  { %v3352_v2 = vmul.f32 -1.442695, %v2890_v0  ;;  %v2891_v38 = vadd.f32 %v2844_v49, %v543_v35  ;;  %v2846_v42 = vpop.f32.mrb[55].mxu0  ;;  %v3859_v14 = vpop.f32.mrb[103].mxu1  ;;  %v2919_v34 = vadd.f32 %v5746_v45, %v2886_v31  ;;  %v5958_v35 = vld [vmem:[#allocation40_spill] sm:$0xff] }
 0xeeb   :  { %v2905_v39 = vadd.f32 %v2846_v42, %v545_v63  ;;  %v3354_v19 = vmul.f32 -1.442695, %v2904_v4 }
 0xeec   :  { %4398 = vpow2.f32 %v3352_v2  ;;  %v3353_v3 = vmul.f32 -1.442695, %v2891_v38 }
 0xeed   :  { %v3355_v9 = vmul.f32 -1.442695, %v2905_v39 }
 0xeee   :  { %4400 = vpow2.f32 %v3353_v3 }
 0xeef   :  { %4402 = vpow2.f32 %v3354_v19 }
 0xef0   :  { %4404 = vpow2.f32 %v3355_v9 }
 0xef6   :  { %v4399_v21 = vpop.eup %4398 }
 0xef7   :  { %v2898_v41 = vadd.f32 1.0, %v4399_v21 }
 0xef8   :  { %v4401_v26 = vpop.eup %4400 }
 0xef9   :  { %4406 = vrcp.f32 %v2898_v41  ;;  %v2899_v59 = vadd.f32 1.0, %v4401_v26  ;;  %v4403_v5 = vpop.eup %4402 }
 0xefa   :  { %v4405_v10 = vpop.eup %4404  ;;  %v2912_v29 = vadd.f32 1.0, %v4403_v5 }
 0xefb   :  { %4408 = vrcp.f32 %v2899_v59  ;;  %v2913_v28 = vadd.f32 1.0, %v4405_v10 }
 0xefc   :  { %4410 = vrcp.f32 %v2912_v29 }
 0xefd   :  { %4412 = vrcp.f32 %v2913_v28 }
 0xf03   :  { %v4407_v24 = vpop.eup %4406 }
 0xf04   :  { %v2920_v22 = vmul.f32 %v4407_v24, %v2918_v30  ;;  %v5963_v30 = vld [vmem:[#allocation43_spill] sm:$0xff] }
 0xf05   :  { %v4409_v11 = vpop.eup %4408 }
 0xf06   :  { %v2922_v18 = vadd.f32 %v2920_v22, %v5957_v16  ;;  %v2921_v8 = vmul.f32 %v4409_v11, %v2919_v34  ;;  %v4411_v25 = vpop.eup %4410  ;;  %v5964_v22 = vld [vmem:[#allocation45_spill] sm:$0xff] }
 0xf07   :  { %v4413_v40 = vpop.eup %4412  ;;  %v2926_v46 = vsub.f32 1.0, %v4411_v25  ;;  %v2930_v49 = vmul.f32 %v4411_v25, %v5754_v32 }
 0xf08   :  { %4414 = vtanh.f32 %v2922_v18  ;;  %v2923_v0 = vadd.f32 %v2921_v8, %v5958_v35  ;;  %v2927_v7 = vsub.f32 1.0, %v4413_v40  ;;  %v2931_v31 = vmul.f32 %v4413_v40, %v5756_v33 }
 0xf0a   :  { %4416 = vtanh.f32 %v2923_v0 }
 0xf12   :  { %v4415_v63 = vpop.eup %4414 }
 0xf13   :  { %v2928_v4 = vmul.f32 %v4415_v63, %v2926_v46 }
 0xf14   :  { %v4417_v2 = vpop.eup %4416 }
 0xf15   :  { %v2929_v38 = vmul.f32 %v4417_v2, %v2927_v7  ;;  %v5811_v42 = vadd.f32 %v2930_v49, %v2928_v4  ;;  %v5965_v2 = vld [vmem:[#allocation26_spill] sm:$0xff] }
 0xf17   :  { %v5813_v14 = vadd.f32 %v2931_v31, %v2929_v38  ;;  %2935 = vst [vmem:[#allocation10 + $0xd0] sm:$0xff] %v5811_v42  ;;  %v559_v38 = vadd.f32 %v5965_v2, %v4988_v13  ;;  %v5966_v31 = vld [vmem:[#allocation27_spill] sm:$0xff] }
 0xf19   :  { %2936 = vst [vmem:[#allocation10 + $0xd8] sm:$0xff] %v5813_v14  ;;  %v2944_v39 = vpack.c.bf16 %v5813_v14, %v5811_v42 }
 0xf1b   :  { %2978 = vmatmul.mubr.bf16.vlgmr.msra.gmra.mrb[56].mxu0 %v2944_v39  ;;  %3877 = vmatmul.mubr.bf16.vlgmr.msra.gmra.mrb[104].mxu1 %v2944_v39 }
 0xf1c   :  { %3085 = vmatpush1.bf16.msra.mxu0 %v5495_v52  ;;  %3881 = vmatpush3.bf16.msra.mxu1 %v5565_v50 }
 0xf1d   :  { %3086 = vmatprep.subr.bf16.mxu0 %v5499_v61  ;;  %3882 = vmatprep.subr.bf16.mxu1 %v5937_v43  ;;  %v5960_v61 = vld [vmem:[#allocation23_spill] sm:$0xff] }
 0xf1e   :  { %3116 = vmatprep.mubr.bf16.mxu0 %v5938_v37  ;;  %3896 = vmatprep.mubr.msk.bf16.mxu1 %vm4611_vm0, %v5937_v43  ;;  %v5959_v37 = vld [vmem:[#allocation22_spill] sm:$0xff] }
 0xf1f   :  { %v549_v52 = vadd.f32 %v5959_v37, %v4988_v13 }
 0xf20   :  { %3087 = vmatpush1.bf16.msra.mxu0 %v5506_v56  ;;  %3883 = vmatpush3.bf16.msra.mxu1 %v5574_v51  ;;  %v551_v56 = vadd.f32 %v5960_v61, %v4992_v6 }
 0xf21   :  { %3088 = vmatprep.subr.bf16.mxu0 %v5510_v44  ;;  %3884 = vmatprep.subr.bf16.mxu1 %v5937_v43 }
 0xf24   :  { %3089 = vmatpush1.bf16.msra.mxu0 %v5514_v12  ;;  %3885 = vmatpush3.bf16.msra.mxu1 %v5580_v17 }
 0xf25   :  { %3090 = vmatprep.subr.bf16.mxu0 %v5518_v1  ;;  %3886 = vmatprep.subr.bf16.mxu1 %v5937_v43  ;;  %v5961_v1 = vld [vmem:[#allocation24_spill] sm:$0xff] }
 0xf28   :  { %3091 = vmatpush1.bf16.msra.mxu0 %v5522_v27  ;;  %3887 = vmatpush3.bf16.msra.mxu1 %v5586_v54  ;;  %v553_v27 = vadd.f32 %v5961_v1, %v4988_v13 }
 0xf29   :  { %3092 = vmatprep.subr.bf16.mxu0 %v5526_v53  ;;  %3888 = vmatprep.subr.bf16.mxu1 %v5937_v43 }
 0xf2c   :  { %3093 = vmatpush1.bf16.msra.mxu0 %v5591_v55  ;;  %3889 = vmatpush3.bf16.msra.mxu1 %v5594_v57 }
 0xf2d   :  { %3094 = vmatprep.subr.bf16.mxu0 %v5597_v47  ;;  %3890 = vmatprep.subr.bf16.mxu1 %v5937_v43 }
 0xf30   :  { %3095 = vmatpush1.bf16.msra.mxu0 %v5601_v58  ;;  %3891 = vmatpush3.bf16.msra.mxu1 %v5604_v60 }
 0xf31   :  { %3096 = vmatprep.subr.bf16.mxu0 %v5607_v48  ;;  %3892 = vmatprep.subr.bf16.mxu1 %v5937_v43 }
 0xf34   :  { %3097 = vmatpush1.bf16.msra.mxu0 %v5611_v62  ;;  %3893 = vmatpush3.bf16.msra.mxu1 %v5614_v36 }
 0xf35   :  { %3098 = vmatprep.subr.bf16.mxu0 %v5617_v23  ;;  %3894 = vmatprep.subr.bf16.mxu1 %v5937_v43  ;;  %v5962_v43 = vld [vmem:[#allocation25_spill] sm:$0xff] }
 0xf36   :  { %v555_v17 = vadd.f32 %v5962_v43, %v4992_v6 }
 0xf38   :  { %3099 = vmatpush1.bf16.msra.mxu0 %v5621_v15  ;;  %3895 = vmatpush3.bf16.msra.mxu1 %v5624_v20 }
 0xfee   :  { %v2979_v44 = vpop.f32.mrb[56].mxu0  ;;  %v3022_v12 = vpop.f32.mrb[104].mxu1 }
 0xfef   :  { %v3029_v53 = vadd.f32 %v2979_v44, %v549_v52  ;;  %v2981_v50 = vpop.f32.mrb[57].mxu0  ;;  %v3878_v51 = vpop.f32.mrb[105].mxu1  ;;  %v3057_v41 = vadd.f32 %v5746_v45, %v3022_v12  ;;  %v5968_v12 = vld [vmem:[#allocation29_spill] sm:$0xff] }
 0xff0   :  { %v3043_v54 = vadd.f32 %v2981_v50, %v551_v56  ;;  %v2983_v55 = vpop.f32.mrb[58].mxu0  ;;  %v3025_v57 = vpop.f32.mrb[106].mxu1  ;;  %v565_v1 = vadd.f32 %v5968_v12, %v4992_v6 }
 0xff1   :  { %v3356_v47 = vmul.f32 -1.442695, %v3029_v53  ;;  %v3030_v58 = vadd.f32 %v2983_v55, %v553_v27  ;;  %v2985_v60 = vpop.f32.mrb[59].mxu0  ;;  %v3879_v48 = vpop.f32.mrb[107].mxu1  ;;  %v3058_v10 = vadd.f32 %v5746_v45, %v3025_v57 }
 0xff2   :  { %v3044_v62 = vadd.f32 %v2985_v60, %v555_v17  ;;  %v3358_v23 = vmul.f32 -1.442695, %v3043_v54 }
 0xff3   :  { %4418 = vpow2.f32 %v3356_v47  ;;  %v3357_v36 = vmul.f32 -1.442695, %v3030_v58 }
 0xff4   :  { %v3359_v15 = vmul.f32 -1.442695, %v3044_v62 }
 0xff5   :  { %4420 = vpow2.f32 %v3357_v36 }
 0xff6   :  { %4422 = vpow2.f32 %v3358_v23 }
 0xff7   :  { %4424 = vpow2.f32 %v3359_v15 }
 0xffd   :  { %v4419_v20 = vpop.eup %4418 }
 0xffe   :  { %v3037_v32 = vadd.f32 1.0, %v4419_v20 }
 0xfff   :  { %v4421_v33 = vpop.eup %4420 }
0x1000   :  { %4426 = vrcp.f32 %v3037_v32  ;;  %v3038_v3 = vadd.f32 1.0, %v4421_v33  ;;  %v4423_v19 = vpop.eup %4422 }
0x1001   :  { %v4425_v9 = vpop.eup %4424  ;;  %v3051_v21 = vadd.f32 1.0, %v4423_v19 }
0x1002   :  { %4428 = vrcp.f32 %v3038_v3  ;;  %v3052_v26 = vadd.f32 1.0, %v4425_v9  ;;  %v5969_v9 = vld [vmem:[#allocation42_spill] sm:$0xff] }
0x1003   :  { %4430 = vrcp.f32 %v3051_v21 }
0x1004   :  { %4432 = vrcp.f32 %v3052_v26  ;;  %v5970_v26 = vld [vmem:[#allocation44_spill] sm:$0xff] }
0x100a   :  { %v4427_v59 = vpop.eup %4426 }
0x100b   :  { %v3059_v5 = vmul.f32 %v4427_v59, %v3057_v41 }
0x100c   :  { %v4429_v29 = vpop.eup %4428 }
0x100d   :  { %v3061_v28 = vadd.f32 %v3059_v5, %v5963_v30  ;;  %v3060_v24 = vmul.f32 %v4429_v29, %v3058_v10  ;;  %v4431_v11 = vpop.eup %4430 }
0x100e   :  { %v4433_v16 = vpop.eup %4432  ;;  %v3065_v18 = vsub.f32 1.0, %v4431_v11  ;;  %v3069_v25 = vmul.f32 %v4431_v11, %v5811_v42  ;;  %v561_v42 = vadd.f32 %v5966_v31, %v4992_v6 }
0x100f   :  { %4434 = vtanh.f32 %v3061_v28  ;;  %v3062_v34 = vadd.f32 %v3060_v24, %v5964_v22  ;;  %v3066_v35 = vsub.f32 1.0, %v4433_v16  ;;  %v3070_v63 = vmul.f32 %v4433_v16, %v5813_v14  ;;  %v5967_v14 = vld [vmem:[#allocation28_spill] sm:$0xff] }
0x1010   :  { %v563_v52 = vadd.f32 %v5967_v14, %v4988_v13 }
0x1011   :  { %4436 = vtanh.f32 %v3062_v34 }
0x1019   :  { %v4435_v8 = vpop.eup %4434 }
0x101a   :  { %v3067_v0 = vmul.f32 %v4435_v8, %v3065_v18 }
0x101b   :  { %v4437_v40 = vpop.eup %4436 }
0x101c   :  { %v3068_v46 = vmul.f32 %v4437_v40, %v3066_v35  ;;  %v3071_v7 = vadd.f32 %v3069_v25, %v3067_v0 }
0x101e   :  { %v5866_v4 = vadd.f32 %v3070_v63, %v3068_v46  ;;  %3074 = vst [vmem:[#allocation10 + $0xe0] sm:$0xff] %v3071_v7 }
0x1020   :  { %3075 = vst [vmem:[#allocation10 + $0xe8] sm:$0xff] %v5866_v4  ;;  %v3083_v49 = vpack.c.bf16 %v5866_v4, %v3071_v7 }
0x1022   :  { %3117 = vmatmul.mubr.bf16.vlgmr.msra.gmra.mrb[60].mxu0 %v3083_v49  ;;  %3897 = vmatmul.mubr.bf16.vlgmr.msra.gmra.mrb[108].mxu1 %v3083_v49 }
0x10f5   :  { %v3118_v39 = vpop.f32.mrb[60].mxu0  ;;  %v3161_v37 = vpop.f32.mrb[108].mxu1 }
0x10f6   :  { %v3168_v61 = vadd.f32 %v3118_v39, %v559_v38  ;;  %v3120_v56 = vpop.f32.mrb[61].mxu0  ;;  %v3898_v44 = vpop.f32.mrb[109].mxu1  ;;  %v3196_v15 = vadd.f32 %v5746_v45, %v3161_v37 }
0x10f7   :  { %v3182_v27 = vadd.f32 %v3120_v56, %v561_v42  ;;  %v3122_v53 = vpop.f32.mrb[62].mxu0  ;;  %v3164_v50 = vpop.f32.mrb[110].mxu1 }
0x10f8   :  { %v3360_v51 = vmul.f32 -1.442695, %v3168_v61  ;;  %v3169_v43 = vadd.f32 %v3122_v53, %v563_v52  ;;  %v3124_v17 = vpop.f32.mrb[63].mxu0  ;;  %v3899_v54 = vpop.f32.mrb[111].mxu1  ;;  %v3197_v3 = vadd.f32 %v5746_v45, %v3164_v50 }
0x10f9   :  { %v3183_v55 = vadd.f32 %v3124_v17, %v565_v1  ;;  %v3362_v47 = vmul.f32 -1.442695, %v3182_v27 }
0x10fa   :  { %4438 = vpow2.f32 %v3360_v51  ;;  %v3361_v57 = vmul.f32 -1.442695, %v3169_v43 }
0x10fb   :  { %v3363_v58 = vmul.f32 -1.442695, %v3183_v55 }
0x10fc   :  { %4440 = vpow2.f32 %v3361_v57 }
0x10fd   :  { %4442 = vpow2.f32 %v3362_v47 }
0x10fe   :  { %4444 = vpow2.f32 %v3363_v58 }
0x1104   :  { %v4439_v13 = vpop.eup %4438 }
0x1105   :  { %v3176_v60 = vadd.f32 1.0, %v4439_v13 }
0x1106   :  { %v4441_v48 = vpop.eup %4440 }
0x1107   :  { %4446 = vrcp.f32 %v3176_v60  ;;  %v3177_v6 = vadd.f32 1.0, %v4441_v48  ;;  %v4443_v62 = vpop.eup %4442 }
0x1108   :  { %v4445_v36 = vpop.eup %4444  ;;  %v3190_v23 = vadd.f32 1.0, %v4443_v62 }
0x1109   :  { %4448 = vrcp.f32 %v3177_v6  ;;  %v3191_v20 = vadd.f32 1.0, %v4445_v36 }
0x110a   :  { %4450 = vrcp.f32 %v3190_v23 }
0x110b   :  { %4452 = vrcp.f32 %v3191_v20 }
0x1111   :  { %v4447_v32 = vpop.eup %4446 }
0x1112   :  { %v3198_v33 = vmul.f32 %v4447_v32, %v3196_v15 }
0x1113   :  { %v4449_v19 = vpop.eup %4448 }
0x1114   :  { %v3200_v21 = vadd.f32 %v3198_v33, %v5969_v9  ;;  %v3199_v41 = vmul.f32 %v4449_v19, %v3197_v3  ;;  %v4451_v5 = vpop.eup %4450 }
0x1115   :  { %v4453_v10 = vpop.eup %4452  ;;  %v3204_v29 = vsub.f32 1.0, %v4451_v5  ;;  %v3208_v24 = vmul.f32 %v4451_v5, %v3071_v7 }
0x1116   :  { %4454 = vtanh.f32 %v3200_v21  ;;  %v3201_v59 = vadd.f32 %v3199_v41, %v5970_v26  ;;  %v3205_v22 = vsub.f32 1.0, %v4453_v10  ;;  %v3209_v16 = vmul.f32 %v4453_v10, %v5866_v4 }
0x1118   :  { %4456 = vtanh.f32 %v3201_v59 }
0x1120   :  { %v4455_v30 = vpop.eup %4454 }
0x1121   :  { %v3206_v28 = vmul.f32 %v4455_v30, %v3204_v29 }
0x1122   :  { %v4457_v34 = vpop.eup %4456 }
0x1123   :  { %v3210_v45 = vadd.f32 %v3208_v24, %v3206_v28  ;;  %v3207_v11 = vmul.f32 %v4457_v34, %v3205_v22 }
0x1125   :  { %3213 = vst [vmem:[#allocation10 + $0xf0] sm:$0xff] %v3210_v45  ;;  %v3211_v18 = vadd.f32 %v3209_v16, %v3207_v11 }
0x1127   :  { %3214 = vst [vmem:[#allocation10 + $0xf8] sm:$0xff] %v3211_v18 }
0x1128   :  { %4585 = shalt.err (!%p4582_p0)
}
0x1129   :  { %s4586_s16 = scalar_lea.hbm %s5900_s5, 4096 }
0x112a   :  { %p4587_p1 = scmp.ne.s32.totalorder %s5900_s5, %s4586_s16  ;;  %p4590_p2 = scmp.lt.u32.totalorder %s4586_s16, %s5900_s5 }
0x112c   :  { %p4592_p3 = pnand %p4590_p2, %p4587_p1 }
0x112e   :  { %4595 = shalt.err (!%p4592_p3)
}
0x112f   :  { %s4614_s20 = smov 128   ;;  %s4615_s21 = smov 8  }
0x1130   :  { %3228 = dma.vmem_to_hbm [thread:$0]  %s3223_s12, 4096, %s5900_s5, [#allocation6], %s4614_s20, %s4614_s20, %s4615_s21  }
0x1131   :  { %4600 = dma.done.wait [#allocation6], 4096  }
0x1132   :  { %4601 = vsyncadd [#allocation6], 4294963200 }
0x1133   :  { %3232 = vsyncpa [#allocation5], 1 }
0x1134   :  { %3233 = vsyncpa [#allocation8], 1 }
0x1135   :  { %3234 = vsyncpa [#allocation6], 1 }

</bundles_post_ra>
